<compile_context>
chip_gen: v7x
topology: tpu7x:2x2x1
jax: 0.10.0
libtpu: 0.0.40
codegen_flags: <defaults>
</compile_context>

<pallas_src>
import math

import jax
import jax.numpy as jnp
import numpy as np
from jax.experimental import pallas as pl
from jax.experimental.pallas import tpu as pltpu

H = 32            # hidden_size
NUM_LAYERS = 4    # num_layers (weighted top transformer layers)
NUM_HEADS = 4
HEAD_DIM = H // NUM_HEADS
LN_EPS_HEAD = 1e-7    # nn.LayerNorm(num_features, 1e-07)
LN_EPS_BERT = 1e-12   # transformers BertConfig default layer_norm_eps

VMEM = pl.BlockSpec(memory_space=pltpu.MemorySpace.VMEM)
SMEM = pl.BlockSpec(memory_space=pltpu.MemorySpace.SMEM)


# ------------------------------------------------------------- fused kernel --

def _multiscale_kernel(lw_ref,                       # SMEM (L,)  softmaxed layer weights
                       hs_ref,                       # (L, B, S, H)
                       amask_ref,                    # (B, 1, S)
                       p_head_ref, p_tail_ref,       # (B, P, 1) int32
                       p_mask_ref,                   # (B, 1, P)
                       s_head_ref, s_tail_ref,       # (B, NS, 1) int32
                       s_mask_ref,                   # (B, 1, NS)
                       ctx_dw_ref, ctx_db_ref,       # (H, H), (1, H)
                       mha_g_ref, mha_b_ref,         # (1, 1, H)
                       attn_wqkv_ref, attn_bqkv_ref,  # (3, H, 3H), (3, 1, 1, 3H)
                       attn_wo_ref, attn_bo_ref,      # (3, H, H), (3, 1, 1, H)
                       attn_lng_ref, attn_lnb_ref,    # (3, 1, 1, H)
                       br_lng_ref, br_lnb_ref,        # (2, 1, 1, H)
                       lstm_wih_ref, lstm_bi_ref, lstm_whh_ref,  # (2,H,4H), (2,1,1,4H), (2,H,4H)
                       cls_w_ref, cls_b_ref,          # (4H, 1), (1, 1)
                       out_ref):                      # (B, 1)
    L, B, S, Hd = hs_ref.shape
    hid = Hd // 2

    def layer_norm(x, g, b, eps):
        mu = jnp.mean(x, axis=-1, keepdims=True)
        var = jnp.mean((x - mu) ** 2, axis=-1, keepdims=True)
        return (x - mu) * jax.lax.rsqrt(var + eps) * g + b

    def bmm(x, w):
        # (B, T, K) @ (K, N) -> (B, T, N) as ONE flat 2-D MXU matmul
        # (no broadcast_to of the weight, no per-batch tiny matmuls).
        b, t, k = x.shape
        y = jnp.dot(x.reshape(b * t, k), w, preferred_element_type=jnp.float32)
        return y.reshape(b, t, w.shape[-1])

    def row(x, t):
        # static squeeze of axis 1 at index t: (B, T, N) -> (B, N)
        # (slice + size-1 reduce: proven-to-lower pattern; every call below is
        #  hoisted off the LSTM recurrence critical path.)
        return jnp.sum(x[:, t:t + 1, :], axis=1)

    def attention(x, mask, idx):
        # x: (B, T, Hd); mask: (B, 1, T) with 1 = keep.  Fused QKV projection;
        # heads batched by stacking masked per-head queries along the sublane
        # axis -> one score matmul + one softmax + one context matmul.
        T = x.shape[1]
        add_mask = (1.0 - mask) * -10000.0                               # (B,1,T)
        qkv = bmm(x, attn_wqkv_ref[idx]) + attn_bqkv_ref[idx]            # (B,T,3H)
        q = qkv[:, :, 0:Hd]
        k = qkv[:, :, Hd:2 * Hd]
        v = qkv[:, :, 2 * Hd:3 * Hd]
        lane = jax.lax.broadcasted_iota(jnp.int32, (1, 1, Hd), 2)
        hmasks = [((lane >= h * HEAD_DIM) &
                   (lane < (h + 1) * HEAD_DIM)).astype(jnp.float32)      # (1,1,Hd)
                  for h in range(NUM_HEADS)]
        q_st = jnp.concatenate([q * hmasks[h] for h in range(NUM_HEADS)],
                               axis=1)                                   # (B,NH*T,Hd)
        scale = 1.0 / math.sqrt(HEAD_DIM)
        s = jnp.einsum('bqd,bkd->bqk', q_st, k,
                       preferred_element_type=jnp.float32) * scale + add_mask  # (B,NH*T,T)
        p = jax.nn.softmax(s, axis=-1)                                   # one softmax
        c_st = jnp.einsum('bqk,bkd->bqd', p, v,
                          preferred_element_type=jnp.float32)            # (B,NH*T,Hd)
        ctx = c_st[:, 0:T, :] * hmasks[0]
        for h in range(1, NUM_HEADS):
            ctx = ctx + c_st[:, h * T:(h + 1) * T, :] * hmasks[h]
        y = bmm(ctx, attn_wo_ref[idx]) + attn_bo_ref[idx] + x            # residual
        return layer_norm(y, attn_lng_ref[idx], attn_lnb_ref[idx], LN_EPS_BERT)

    def mean_pool(x, mask):
        # x: (B, T, Hd); mask: (B, 1, T) -> (B, Hd)
        se = jnp.einsum('bqt,bth->bqh', mask, x, preferred_element_type=jnp.float32)
        den = jnp.maximum(jnp.sum(mask, axis=-1, keepdims=True), 1e-9)
        # exact divide kept here: it feeds the classifier directly and nothing
        # downstream normalizes an approx-reciprocal error away.
        return jnp.sum(se / den, axis=1)

    def span_mean(x, head, tail):
        # x: (B, S, Hd); head/tail: (B, P, 1) int32.  Mask built in-kernel.
        P = head.shape[1]
        pos = jax.lax.broadcasted_iota(jnp.int32, (B, P, S), 2)
        sel = ((pos >= head + 1) & (pos < tail)).astype(jnp.float32)     # (B, P, S)
        cnt = (tail - head - 1).astype(jnp.float32)                      # (B, P, 1)
        # TODO(synk): empty spans (tail <= head + 1) divide by zero, same as the PyTorch module.
        # approx reciprocal (EUP vrcp) is safe: the per-row scale error cancels
        # exactly in the scale-invariant LayerNorm that immediately follows.
        return jnp.einsum('bps,bsh->bph', sel, x,
                          preferred_element_type=jnp.float32) * pl.reciprocal(cnt, approx=True)

    def bilstm(x, idx):
        # x: (B, T, Hd) -> (B, T, Hd).  Both directions fused:
        # state = [h_fwd | h_bwd] (Hd lanes), gates are 4*Hd = 128 lanes wide
        # (each gate block interleaves the fwd / bwd halves).
        T = x.shape[1]
        wih = lstm_wih_ref[idx]                                          # (Hd, 4Hd)
        bi = lstm_bi_ref[idx]                                            # (1,1,4Hd)
        whh = lstm_whh_ref[idx]                                          # (Hd, 4Hd)
        xp = bmm(x, wih) + bi                                            # (B,T,4Hd)

        gate_lane = jax.lax.broadcasted_iota(jnp.int32, (1, 1, 4 * Hd), 2)
        fwd_gate = (gate_lane % Hd) < hid                                # fwd gate lanes
        # time-reversed copy via static slices; computed ONCE, off the recurrence.
        xp_rev = jnp.concatenate([xp[:, t:t + 1, :] for t in range(T - 1, -1, -1)],
                                 axis=1)
        gx_all = jnp.where(fwd_gate, xp, xp_rev)                         # single select
        gx_rows = [row(gx_all, t) for t in range(T)]                     # hoisted out of loop

        h = jnp.zeros((B, Hd), jnp.float32)
        c = jnp.zeros((B, Hd), jnp.float32)
        states = []
        for t in range(T):                                               # static, small
            gates = gx_rows[t] + jnp.dot(h, whh, preferred_element_type=jnp.float32)
            sig = jax.nn.sigmoid(gates)                                  # one EUP pass / step
            gi = sig[:, 0:Hd]
            gf = sig[:, Hd:2 * Hd]
            go = sig[:, 3 * Hd:4 * Hd]
            gg = jnp.tanh(gates[:, 2 * Hd:3 * Hd])
            c = gf * c + gi * gg
            h = go * jnp.tanh(c)
            states.append(h)
        # output position t = [h_fwd(step t) | h_bwd(step T-1-t)]
        state_lane = jax.lax.broadcasted_iota(jnp.int32, (1, 1, Hd), 2)
        fwd_half = state_lane < hid
        fwd_stack = jnp.stack(states, axis=1)                            # (B,T,Hd)
        bwd_stack = jnp.stack(states[::-1], axis=1)                      # (B,T,Hd)
        return jnp.where(fwd_half, fwd_stack, bwd_stack)

    # ---- ContextPooler + weighted layer sum ----
    last = hs_ref[L - 1]                                                 # (B, S, Hd)
    ctx_tok = jnp.sum(last[:, 0:1, :], axis=1)                           # (B, Hd)
    ctx_feat = jnp.maximum(
        jnp.dot(ctx_tok, ctx_dw_ref[...], preferred_element_type=jnp.float32)
        + ctx_db_ref[...], 0.0)

    acc = lw_ref[0] * hs_ref[0]
    for l in range(1, L):
        acc = acc + lw_ref[l] * hs_ref[l]
    enc = layer_norm(acc, mha_g_ref[...], mha_b_ref[...], LN_EPS_HEAD)   # (B, S, Hd)

    amask = amask_ref[...]                                               # (B, 1, S)
    enc = attention(enc, amask, 0)
    mean_feat = mean_pool(enc, amask)

    # ---- paragraph branch ----
    pf = span_mean(enc, p_head_ref[...], p_tail_ref[...])
    pf = layer_norm(pf, br_lng_ref[0], br_lnb_ref[0], LN_EPS_HEAD)
    pf = bilstm(pf, 0)
    pmask = p_mask_ref[...]
    pf = attention(pf, pmask, 1)
    para_feat = mean_pool(pf, pmask)

    # ---- sentence branch ----
    sf = span_mean(enc, s_head_ref[...], s_tail_ref[...])
    sf = layer_norm(sf, br_lng_ref[1], br_lnb_ref[1], LN_EPS_HEAD)
    sf = bilstm(sf, 1)
    smask = s_mask_ref[...]
    sf = attention(sf, smask, 2)
    sent_feat = mean_pool(sf, smask)

    # ---- fused classifiers (ctx, mean, para, sent) + final sum ----
    feats = jnp.concatenate([ctx_feat, mean_feat, para_feat, sent_feat], axis=-1)  # (B, 4H)
    out_ref[...] = (jnp.dot(feats, cls_w_ref[...], preferred_element_type=jnp.float32)
                    + cls_b_ref[...])


# --------------------------------------------------------- parameter packing --

def _interleave_gates(wf, wb, hid):
    # per-gate blocks become [fwd(hid) | bwd(hid)] so combined gates slice at
    # multiples of 2*hid and all gate math stays elementwise over 128 lanes.
    cols = []
    for g in range(4):
        cols.append(wf[:, g * hid:(g + 1) * hid])
        cols.append(wb[:, g * hid:(g + 1) * hid])
    return jnp.concatenate(cols, axis=1)


def _pack_lstm(p, hid):
    wih = _interleave_gates(p["wih_f"], p["wih_b"], hid)                 # (H, 4H)
    bi = _interleave_gates(p["bi_f"], p["bi_b"], hid)                    # (1, 4H)
    zf = jnp.zeros_like(p["whh_f"])
    whh = jnp.concatenate([_interleave_gates(p["whh_f"], zf, hid),       # h_fwd rows
                           _interleave_gates(zf, p["whh_b"], hid)],      # h_bwd rows
                          axis=0)                                        # (H, 4H)
    return wih, bi, whh


def _pack_params(params):
    hid = H // 2

    def ln3(x):  # (1, D) -> (1, 1, D)
        return x.reshape(1, 1, -1)

    attn_keys = ["attention", "para_attention", "sent_attention"]
    packed = {
        "ctx_dw": params["ctx_dense_w"],
        "ctx_db": params["ctx_dense_b"],
        "mha_g": ln3(params["mha_ln_g"]),
        "mha_b": ln3(params["mha_ln_b"]),
        "attn_wqkv": jnp.stack([jnp.concatenate(
            [params[k]["wq"], params[k]["wk"], params[k]["wv"]], axis=1)
            for k in attn_keys]),
        "attn_bqkv": jnp.stack([ln3(jnp.concatenate(
            [params[k]["bq"], params[k]["bk"], params[k]["bv"]], axis=1))
            for k in attn_keys]),
        "attn_wo": jnp.stack([params[k]["wo"] for k in attn_keys]),
        "attn_bo": jnp.stack([ln3(params[k]["bo"]) for k in attn_keys]),
        "attn_lng": jnp.stack([ln3(params[k]["ln_g"]) for k in attn_keys]),
        "attn_lnb": jnp.stack([ln3(params[k]["ln_b"]) for k in attn_keys]),
        "br_lng": jnp.stack([ln3(params["para_ln_g"]), ln3(params["sent_ln_g"])]),
        "br_lnb": jnp.stack([ln3(params["para_ln_b"]), ln3(params["sent_ln_b"])]),
        # feats = [ctx | mean | para | sent]; mean reuses the context classifier
        # (same as the PyTorch module, mean_pool_classifier is unused).
        "cls_w": jnp.concatenate([params["ctx_cls_w"], params["ctx_cls_w"],
                                  params["para_cls_w"], params["sent_cls_w"]], axis=0),
        "cls_b": (2.0 * params["ctx_cls_b"] + params["para_cls_b"]
                  + params["sent_cls_b"]),
    }
    lp = [_pack_lstm(params["para_lstm"], hid), _pack_lstm(params["sent_lstm"], hid)]
    packed["lstm_wih"] = jnp.stack([lp[0][0], lp[1][0]])
    packed["lstm_bi"] = jnp.stack([lp[0][1].reshape(1, 1, -1),
                                   lp[1][1].reshape(1, 1, -1)])
    packed["lstm_whh"] = jnp.stack([lp[0][2], lp[1][2]])
    return packed


# ---------------------------------------------------------------- forward ----

@jax.jit
def multiscale_head_forward(params, hidden_states, attention_mask,
                            p_head, p_tail, p_mask, s_head, s_tail, s_mask):
    L, B, S, Hd = hidden_states.shape
    P = p_head.shape[1]
    NS = s_head.shape[1]

    pk = _pack_params(params)
    lw = jax.nn.softmax(params["layer_weights"], axis=0)

    args = (
        lw,
        hidden_states,
        attention_mask.astype(jnp.float32).reshape(B, 1, S),
        p_head.astype(jnp.int32).reshape(B, P, 1),
        p_tail.astype(jnp.int32).reshape(B, P, 1),
        p_mask.astype(jnp.float32).reshape(B, 1, P),
        s_head.astype(jnp.int32).reshape(B, NS, 1),
        s_tail.astype(jnp.int32).reshape(B, NS, 1),
        s_mask.astype(jnp.float32).reshape(B, 1, NS),
        pk["ctx_dw"], pk["ctx_db"], pk["mha_g"], pk["mha_b"],
        pk["attn_wqkv"], pk["attn_bqkv"], pk["attn_wo"], pk["attn_bo"],
        pk["attn_lng"], pk["attn_lnb"],
        pk["br_lng"], pk["br_lnb"],
        pk["lstm_wih"], pk["lstm_bi"], pk["lstm_whh"],
        pk["cls_w"], pk["cls_b"],
    )
    in_specs = [SMEM] + [VMEM] * (len(args) - 1)

    # Explicit scoped-VMEM limit sized from the real footprint so the
    # fully-resident (no-grid) structure keeps working as shapes grow,
    # while staying within physical VMEM on v7x (64 MiB) / v5e-v6e (128 MiB).
    footprint = sum(int(a.size) * a.dtype.itemsize for a in args)
    vmem_limit = int(min(48 << 20, max(16 << 20, 8 * footprint + (4 << 20))))

    # TODO(synk): on v7x the paragraph and sentence branches are independent and
    # should be split across the two TensorCores (pl.core_map over
    # pltpu.create_tensorcore_mesh) for ~1.3-1.6x; kept single-core here so the
    # identical kernel runs unmodified on 1-TC v5e/v6e parts.
    return pl.pallas_call(
        _multiscale_kernel,
        out_shape=jax.ShapeDtypeStruct((B, 1), jnp.float32),
        in_specs=in_specs,
        out_specs=VMEM,
        compiler_params=pltpu.CompilerParams(vmem_limit_bytes=vmem_limit),
    )(*args)


# --------------------------------------------------------- parameter init ----

def init_params(key):
    keys = iter(jax.random.split(key, 96))

    def dense(din, dout, scale=0.05):
        w = scale * jax.random.normal(next(keys), (din, dout), jnp.float32)
        b = scale * jax.random.normal(next(keys), (1, dout), jnp.float32)
        return w, b

    def ln():
        g = 1.0 + 0.05 * jax.random.normal(next(keys), (1, H), jnp.float32)
        b = 0.05 * jax.random.normal(next(keys), (1, H), jnp.float32)
        return g, b

    def attn():
        p = {}
        p["wq"], p["bq"] = dense(H, H)
        p["wk"], p["bk"] = dense(H, H)
        p["wv"], p["bv"] = dense(H, H)
        p["wo"], p["bo"] = dense(H, H)
        p["ln_g"], p["ln_b"] = ln()
        return p

    def lstm():
        hid = H // 2
        p = {}
        for d in ("f", "b"):
            p[f"wih_{d}"] = 0.05 * jax.random.normal(next(keys), (H, 4 * hid), jnp.float32)
            p[f"whh_{d}"] = 0.05 * jax.random.normal(next(keys), (hid, 4 * hid), jnp.float32)
            b_ih = 0.05 * jax.random.normal(next(keys), (4 * hid,), jnp.float32)
            b_hh = 0.05 * jax.random.normal(next(keys), (4 * hid,), jnp.float32)
            p[f"bi_{d}"] = (b_ih + b_hh).reshape(1, 4 * hid)
        return p

    params = {"layer_weights": jnp.linspace(-5.0, 5.0, NUM_LAYERS)}   # linspace(-5, 5, L)
    params["mha_ln_g"], params["mha_ln_b"] = ln()
    params["attention"] = attn()
    params["para_ln_g"], params["para_ln_b"] = ln()
    params["para_lstm"] = lstm()
    params["para_attention"] = attn()
    params["sent_ln_g"], params["sent_ln_b"] = ln()
    params["sent_lstm"] = lstm()
    params["sent_attention"] = attn()
    params["ctx_dense_w"], params["ctx_dense_b"] = dense(H, H)
    params["ctx_cls_w"], params["ctx_cls_b"] = dense(H, 1)
    params["para_cls_w"], params["para_cls_b"] = dense(H, 1)
    params["sent_cls_w"], params["sent_cls_b"] = dense(H, 1)
    return params


# ------------------------------------------------------ pure-JAX reference ---

def ref_forward(params, hidden_states, attention_mask,
                p_head, p_tail, p_mask, s_head, s_tail, s_mask):
    def lin(x, w, b, act=None):
        y = x @ w + b
        return jnp.maximum(y, 0.0) if act == "relu" else y

    def ln(x, g, b, eps):
        mu = x.mean(-1, keepdims=True)
        var = ((x - mu) ** 2).mean(-1, keepdims=True)
        return (x - mu) / jnp.sqrt(var + eps) * g + b

    def attn(x, mask, p):
        B, S, Hd = x.shape
        hd = Hd // NUM_HEADS
        q = lin(x, p["wq"], p["bq"]).reshape(B, S, NUM_HEADS, hd).transpose(0, 2, 1, 3)
        k = lin(x, p["wk"], p["bk"]).reshape(B, S, NUM_HEADS, hd).transpose(0, 2, 1, 3)
        v = lin(x, p["wv"], p["bv"]).reshape(B, S, NUM_HEADS, hd).transpose(0, 2, 1, 3)
        s = q @ k.transpose(0, 1, 3, 2) / math.sqrt(hd)
        s = s + ((1.0 - mask.astype(jnp.float32)) * -10000.0)[:, None, None, :]
        pr = jax.nn.softmax(s, axis=-1)
        ctx = (pr @ v).transpose(0, 2, 1, 3).reshape(B, S, Hd)
        return ln(lin(ctx, p["wo"], p["bo"]) + x, p["ln_g"], p["ln_b"], LN_EPS_BERT)

    def mpool(x, m):
        mm = m.astype(jnp.float32)[..., None]
        return (x * mm).sum(1) / jnp.maximum(mm.sum(1), 1e-9)

    def spans(x, hd, tl):
        S = x.shape[1]
        pos = jnp.arange(S)
        sel = ((pos[None, None, :] >= hd[:, :, None] + 1) &
               (pos[None, None, :] < tl[:, :, None])).astype(jnp.float32)
        cnt = (tl - hd - 1).astype(jnp.float32)[..., None]
        return jnp.einsum("bps,bsh->bph", sel, x) / cnt

    def bilstm_ref(x, p):
        B, T, Hd = x.shape
        hid = Hd // 2

        def run(xp, whh):
            def step(carry, xt):
                h, c = carry
                g = xt + h @ whh
                i = jax.nn.sigmoid(g[:, :hid]); f = jax.nn.sigmoid(g[:, hid:2 * hid])
                gg = jnp.tanh(g[:, 2 * hid:3 * hid]); o = jax.nn.sigmoid(g[:, 3 * hid:])
                c = f * c + i * gg
                h = o * jnp.tanh(c)
                return (h, c), h
            init = (jnp.zeros((B, hid), jnp.float32), jnp.zeros((B, hid), jnp.float32))
            _, hs = jax.lax.scan(step, init, xp)
            return hs

        xf = (x.reshape(B * T, Hd) @ p["wih_f"] + p["bi_f"]).reshape(B, T, 4 * hid).transpose(1, 0, 2)
        xb = (x.reshape(B * T, Hd) @ p["wih_b"] + p["bi_b"]).reshape(B, T, 4 * hid).transpose(1, 0, 2)[::-1]
        hf = run(xf, p["whh_f"])
        hb = run(xb, p["whh_b"])[::-1]
        return jnp.concatenate([hf, hb], -1).transpose(1, 0, 2)

    L, B, S, Hd = hidden_states.shape
    last = hidden_states[-1]
    ctx = lin(last[:, 0, :], params["ctx_dense_w"], params["ctx_dense_b"], "relu")
    context_logits = lin(ctx, params["ctx_cls_w"], params["ctx_cls_b"])

    w = jax.nn.softmax(params["layer_weights"], axis=0)
    enc = (w[:, None, None, None] * hidden_states).sum(0)
    enc = ln(enc, params["mha_ln_g"], params["mha_ln_b"], LN_EPS_HEAD)
    enc = attn(enc, attention_mask, params["attention"])
    mean_logits = lin(mpool(enc, attention_mask), params["ctx_cls_w"], params["ctx_cls_b"])

    pf = spans(enc, p_head, p_tail)
    pf = ln(pf, params["para_ln_g"], params["para_ln_b"], LN_EPS_HEAD)
    pf = bilstm_ref(pf, params["para_lstm"])
    pf = attn(pf, p_mask, params["para_attention"])
    para_logits = lin(mpool(pf, p_mask), params["para_cls_w"], params["para_cls_b"])

    sf = spans(enc, s_head, s_tail)
    sf = ln(sf, params["sent_ln_g"], params["sent_ln_b"], LN_EPS_HEAD)
    sf = bilstm_ref(sf, params["sent_lstm"])
    sf = attn(sf, s_mask, params["sent_attention"])
    sent_logits = lin(mpool(sf, s_mask), params["sent_cls_w"], params["sent_cls_b"])

    return (context_logits + mean_logits + para_logits + sent_logits).reshape(B, 1)


# ------------------------------------------------------------------- main ----

if __name__ == "__main__":
    key = jax.random.PRNGKey(0)
    kp, kx = jax.random.split(key)

    B, S, L = 2, 16, NUM_LAYERS
    P, NS = 4, 6

    params = init_params(kp)
    hidden_states = 0.5 * jax.random.normal(kx, (L, B, S, H), jnp.float32)
    attention_mask = jnp.concatenate(
        [jnp.ones((B, 12), jnp.float32), jnp.zeros((B, S - 12), jnp.float32)], axis=1)

    p_head = jnp.tile(jnp.array([[0, 3, 6, 9]], jnp.int32), (B, 1))
    p_tail = jnp.tile(jnp.array([[3, 6, 9, 12]], jnp.int32), (B, 1))
    p_mask = jnp.ones((B, P), jnp.float32)

    s_head = jnp.tile(jnp.array([[0, 2, 4, 6, 8, 10]], jnp.int32), (B, 1))
    s_tail = jnp.tile(jnp.array([[2, 4, 6, 8, 10, 12]], jnp.int32), (B, 1))
    s_mask = jnp.ones((B, NS), jnp.float32)

    logits = multiscale_head_forward(params, hidden_states, attention_mask,
                                     p_head, p_tail, p_mask, s_head, s_tail, s_mask)
    logits = jax.block_until_ready(logits)
    assert logits.shape == (B, 1)

    ref = ref_forward(params, hidden_states, attention_mask,
                      p_head, p_tail, p_mask, s_head, s_tail, s_mask)
    np.testing.assert_allclose(np.asarray(logits), np.asarray(ref), rtol=2e-3, atol=2e-3)

    print("KERNEL_OK")
</pallas_src>

<mosaic_0001>
module attributes {stable_mosaic.version = 11 : i64} {
  func.func @_multiscale_kernel(%arg0: memref<4xf32, #tpu.memory_space<smem>>, %arg1: memref<4x2x16x32xf32, #tpu.memory_space<vmem>>, %arg2: memref<2x1x16xf32, #tpu.memory_space<vmem>>, %arg3: memref<2x4x1xi32, #tpu.memory_space<vmem>>, %arg4: memref<2x4x1xi32, #tpu.memory_space<vmem>>, %arg5: memref<2x1x4xf32, #tpu.memory_space<vmem>>, %arg6: memref<2x6x1xi32, #tpu.memory_space<vmem>>, %arg7: memref<2x6x1xi32, #tpu.memory_space<vmem>>, %arg8: memref<2x1x6xf32, #tpu.memory_space<vmem>>, %arg9: memref<32x32xf32, #tpu.memory_space<vmem>>, %arg10: memref<1x32xf32, #tpu.memory_space<vmem>>, %arg11: memref<1x1x32xf32, #tpu.memory_space<vmem>>, %arg12: memref<1x1x32xf32, #tpu.memory_space<vmem>>, %arg13: memref<3x32x96xf32, #tpu.memory_space<vmem>>, %arg14: memref<3x1x1x96xf32, #tpu.memory_space<vmem>>, %arg15: memref<3x32x32xf32, #tpu.memory_space<vmem>>, %arg16: memref<3x1x1x32xf32, #tpu.memory_space<vmem>>, %arg17: memref<3x1x1x32xf32, #tpu.memory_space<vmem>>, %arg18: memref<3x1x1x32xf32, #tpu.memory_space<vmem>>, %arg19: memref<2x1x1x32xf32, #tpu.memory_space<vmem>>, %arg20: memref<2x1x1x32xf32, #tpu.memory_space<vmem>>, %arg21: memref<2x32x128xf32, #tpu.memory_space<vmem>>, %arg22: memref<2x1x1x128xf32, #tpu.memory_space<vmem>>, %arg23: memref<2x32x128xf32, #tpu.memory_space<vmem>>, %arg24: memref<128x1xf32, #tpu.memory_space<vmem>>, %arg25: memref<1x1xf32, #tpu.memory_space<vmem>>, %arg26: memref<2x1xf32, #tpu.memory_space<vmem>>) attributes {dimension_semantics = [], scalar_prefetch = 0 : i64, scratch_operands = 0 : i64, tpu.core_type = #tpu.core_type<tc>} {
    %c3 = arith.constant 3 : index
    %c0 = arith.constant 0 : index
    %c0_0 = arith.constant 0 : index
    %c0_1 = arith.constant 0 : index
    %0 = vector.load %arg1[%c3, %c0, %c0_0, %c0_1] : memref<4x2x16x32xf32, #tpu.memory_space<vmem>>, vector<1x2x16x32xf32>
    %1 = vector.shape_cast %0 : vector<1x2x16x32xf32> to vector<2x16x32xf32>
    %2 = vector.extract_strided_slice %1 {offsets = [0, 0, 0], sizes = [2, 1, 32], strides = [1, 1, 1]} : vector<2x16x32xf32> to vector<2x1x32xf32>
    %cst = arith.constant dense<0.000000e+00> : vector<2x32xf32>
    %3 = vector.multi_reduction <add>, %2, %cst [1] : vector<2x1x32xf32> to vector<2x32xf32>
    %c0_2 = arith.constant 0 : index
    %c0_3 = arith.constant 0 : index
    %4 = vector.load %arg9[%c0_2, %c0_3] : memref<32x32xf32, #tpu.memory_space<vmem>>, vector<32x32xf32>
    %cst_4 = arith.constant dense<0.000000e+00> : vector<2x32xf32>
    %5 = tpu.matmul %3, %4, %cst_4 {dimension_numbers = #tpu.dot_dimension_numbers<[1], [0], [0], [1], [0, 0, 1, 1], [], []>} : vector<2x32xf32>, vector<32x32xf32>, vector<2x32xf32> -> vector<2x32xf32>
    %c0_5 = arith.constant 0 : index
    %c0_6 = arith.constant 0 : index
    %6 = vector.load %arg10[%c0_5, %c0_6] : memref<1x32xf32, #tpu.memory_space<vmem>>, vector<1x32xf32>
    %7 = vector.broadcast %6 : vector<1x32xf32> to vector<2x32xf32>
    %8 = arith.addf %5, %7 : vector<2x32xf32>
    %cst_7 = arith.constant 0.000000e+00 : f32
    %9 = vector.broadcast %cst_7 : f32 to vector<2x32xf32>
    %10 = arith.maximumf %8, %9 : vector<2x32xf32>
    %c0_8 = arith.constant 0 : index
    %11 = memref.load %arg0[%c0_8] : memref<4xf32, #tpu.memory_space<smem>>
    %c0_9 = arith.constant 0 : index
    %c0_10 = arith.constant 0 : index
    %c0_11 = arith.constant 0 : index
    %c0_12 = arith.constant 0 : index
    %12 = vector.load %arg1[%c0_9, %c0_10, %c0_11, %c0_12] : memref<4x2x16x32xf32, #tpu.memory_space<vmem>>, vector<1x2x16x32xf32>
    %13 = vector.shape_cast %12 : vector<1x2x16x32xf32> to vector<2x16x32xf32>
    %14 = vector.broadcast %11 : f32 to vector<2x16x32xf32>
    %15 = arith.mulf %14, %13 : vector<2x16x32xf32>
    %c1 = arith.constant 1 : index
    %16 = memref.load %arg0[%c1] : memref<4xf32, #tpu.memory_space<smem>>
    %c1_13 = arith.constant 1 : index
    %c0_14 = arith.constant 0 : index
    %c0_15 = arith.constant 0 : index
    %c0_16 = arith.constant 0 : index
    %17 = vector.load %arg1[%c1_13, %c0_14, %c0_15, %c0_16] : memref<4x2x16x32xf32, #tpu.memory_space<vmem>>, vector<1x2x16x32xf32>
    %18 = vector.shape_cast %17 : vector<1x2x16x32xf32> to vector<2x16x32xf32>
    %19 = vector.broadcast %16 : f32 to vector<2x16x32xf32>
    %20 = arith.mulf %19, %18 : vector<2x16x32xf32>
    %21 = arith.addf %15, %20 : vector<2x16x32xf32>
    %c2 = arith.constant 2 : index
    %22 = memref.load %arg0[%c2] : memref<4xf32, #tpu.memory_space<smem>>
    %c2_17 = arith.constant 2 : index
    %c0_18 = arith.constant 0 : index
    %c0_19 = arith.constant 0 : index
    %c0_20 = arith.constant 0 : index
    %23 = vector.load %arg1[%c2_17, %c0_18, %c0_19, %c0_20] : memref<4x2x16x32xf32, #tpu.memory_space<vmem>>, vector<1x2x16x32xf32>
    %24 = vector.shape_cast %23 : vector<1x2x16x32xf32> to vector<2x16x32xf32>
    %25 = vector.broadcast %22 : f32 to vector<2x16x32xf32>
    %26 = arith.mulf %25, %24 : vector<2x16x32xf32>
    %27 = arith.addf %21, %26 : vector<2x16x32xf32>
    %c3_21 = arith.constant 3 : index
    %28 = memref.load %arg0[%c3_21] : memref<4xf32, #tpu.memory_space<smem>>
    %c3_22 = arith.constant 3 : index
    %c0_23 = arith.constant 0 : index
    %c0_24 = arith.constant 0 : index
    %c0_25 = arith.constant 0 : index
    %29 = vector.load %arg1[%c3_22, %c0_23, %c0_24, %c0_25] : memref<4x2x16x32xf32, #tpu.memory_space<vmem>>, vector<1x2x16x32xf32>
    %30 = vector.shape_cast %29 : vector<1x2x16x32xf32> to vector<2x16x32xf32>
    %31 = vector.broadcast %28 : f32 to vector<2x16x32xf32>
    %32 = arith.mulf %31, %30 : vector<2x16x32xf32>
    %33 = arith.addf %27, %32 : vector<2x16x32xf32>
    %c0_26 = arith.constant 0 : index
    %c0_27 = arith.constant 0 : index
    %c0_28 = arith.constant 0 : index
    %34 = vector.load %arg11[%c0_26, %c0_27, %c0_28] : memref<1x1x32xf32, #tpu.memory_space<vmem>>, vector<1x1x32xf32>
    %c0_29 = arith.constant 0 : index
    %c0_30 = arith.constant 0 : index
    %c0_31 = arith.constant 0 : index
    %35 = vector.load %arg12[%c0_29, %c0_30, %c0_31] : memref<1x1x32xf32, #tpu.memory_space<vmem>>, vector<1x1x32xf32>
    %cst_32 = arith.constant dense<0.000000e+00> : vector<2x16xf32>
    %36 = vector.multi_reduction <add>, %33, %cst_32 [2] : vector<2x16x32xf32> to vector<2x16xf32>
    %37 = vector.shape_cast %36 : vector<2x16xf32> to vector<2x16x1xf32>
    %cst_33 = arith.constant 3.200000e+01 : f32
    %38 = vector.broadcast %cst_33 : f32 to vector<2x16x1xf32>
    %39 = arith.divf %37, %38 : vector<2x16x1xf32>
    %40 = vector.broadcast %39 : vector<2x16x1xf32> to vector<2x16x32xf32>
    %41 = arith.subf %33, %40 : vector<2x16x32xf32>
    %42 = arith.mulf %41, %41 : vector<2x16x32xf32>
    %cst_34 = arith.constant dense<0.000000e+00> : vector<2x16xf32>
    %43 = vector.multi_reduction <add>, %42, %cst_34 [2] : vector<2x16x32xf32> to vector<2x16xf32>
    %44 = vector.shape_cast %43 : vector<2x16xf32> to vector<2x16x1xf32>
    %cst_35 = arith.constant 3.200000e+01 : f32
    %45 = vector.broadcast %cst_35 : f32 to vector<2x16x1xf32>
    %46 = arith.divf %44, %45 : vector<2x16x1xf32>
    %47 = vector.broadcast %39 : vector<2x16x1xf32> to vector<2x16x32xf32>
    %48 = arith.subf %33, %47 : vector<2x16x32xf32>
    %cst_36 = arith.constant 1.000000e-07 : f32
    %49 = vector.broadcast %cst_36 : f32 to vector<2x16x1xf32>
    %50 = arith.addf %46, %49 : vector<2x16x1xf32>
    %51 = math.rsqrt %50 : vector<2x16x1xf32>
    %52 = vector.broadcast %51 : vector<2x16x1xf32> to vector<2x16x32xf32>
    %53 = arith.mulf %48, %52 : vector<2x16x32xf32>
    %54 = vector.broadcast %34 : vector<1x1x32xf32> to vector<2x16x32xf32>
    %55 = arith.mulf %53, %54 : vector<2x16x32xf32>
    %56 = vector.broadcast %35 : vector<1x1x32xf32> to vector<2x16x32xf32>
    %57 = arith.addf %55, %56 : vector<2x16x32xf32>
    %c0_37 = arith.constant 0 : index
    %c0_38 = arith.constant 0 : index
    %c0_39 = arith.constant 0 : index
    %58 = vector.load %arg2[%c0_37, %c0_38, %c0_39] : memref<2x1x16xf32, #tpu.memory_space<vmem>>, vector<2x1x16xf32>
    %cst_40 = arith.constant 1.000000e+00 : f32
    %59 = vector.broadcast %cst_40 : f32 to vector<2x1x16xf32>
    %60 = arith.subf %59, %58 : vector<2x1x16xf32>
    %cst_41 = arith.constant -1.000000e+04 : f32
    %61 = vector.broadcast %cst_41 : f32 to vector<2x1x16xf32>
    %62 = arith.mulf %60, %61 : vector<2x1x16xf32>
    %c0_42 = arith.constant 0 : index
    %c0_43 = arith.constant 0 : index
    %c0_44 = arith.constant 0 : index
    %63 = vector.load %arg13[%c0_42, %c0_43, %c0_44] : memref<3x32x96xf32, #tpu.memory_space<vmem>>, vector<1x32x96xf32>
    %64 = vector.shape_cast %63 : vector<1x32x96xf32> to vector<32x96xf32>
    %65 = vector.shape_cast %57 : vector<2x16x32xf32> to vector<32x32xf32>
    %cst_45 = arith.constant dense<0.000000e+00> : vector<32x96xf32>
    %66 = tpu.matmul %65, %64, %cst_45 {dimension_numbers = #tpu.dot_dimension_numbers<[1], [0], [0], [1], [0, 0, 1, 1], [], []>} : vector<32x32xf32>, vector<32x96xf32>, vector<32x96xf32> -> vector<32x96xf32>
    %67 = vector.shape_cast %66 : vector<32x96xf32> to vector<2x16x96xf32>
    %c0_46 = arith.constant 0 : index
    %c0_47 = arith.constant 0 : index
    %c0_48 = arith.constant 0 : index
    %c0_49 = arith.constant 0 : index
    %68 = vector.load %arg14[%c0_46, %c0_47, %c0_48, %c0_49] : memref<3x1x1x96xf32, #tpu.memory_space<vmem>>, vector<1x1x1x96xf32>
    %69 = vector.shape_cast %68 : vector<1x1x1x96xf32> to vector<1x1x96xf32>
    %70 = vector.broadcast %69 : vector<1x1x96xf32> to vector<2x16x96xf32>
    %71 = arith.addf %67, %70 : vector<2x16x96xf32>
    %72 = vector.extract_strided_slice %71 {offsets = [0, 0, 0], sizes = [2, 16, 32], strides = [1, 1, 1]} : vector<2x16x96xf32> to vector<2x16x32xf32>
    %73 = vector.extract_strided_slice %71 {offsets = [0, 0, 32], sizes = [2, 16, 32], strides = [1, 1, 1]} : vector<2x16x96xf32> to vector<2x16x32xf32>
    %74 = vector.extract_strided_slice %71 {offsets = [0, 0, 64], sizes = [2, 16, 32], strides = [1, 1, 1]} : vector<2x16x96xf32> to vector<2x16x32xf32>
    %75 = tpu.iota {dimensions = array<i32: 2>} : vector<1x1x32xi32>
    %c0_i32 = arith.constant 0 : i32
    %76 = vector.broadcast %c0_i32 : i32 to vector<1x1x32xi32>
    %77 = arith.cmpi sge, %75, %76 : vector<1x1x32xi32>
    %c8_i32 = arith.constant 8 : i32
    %78 = vector.broadcast %c8_i32 : i32 to vector<1x1x32xi32>
    %79 = arith.cmpi slt, %75, %78 : vector<1x1x32xi32>
    %80 = arith.andi %77, %79 : vector<1x1x32xi1>
    %81 = arith.extui %80 : vector<1x1x32xi1> to vector<1x1x32xi32>
    %82 = arith.sitofp %81 : vector<1x1x32xi32> to vector<1x1x32xf32>
    %c8_i32_50 = arith.constant 8 : i32
    %83 = vector.broadcast %c8_i32_50 : i32 to vector<1x1x32xi32>
    %84 = arith.cmpi sge, %75, %83 : vector<1x1x32xi32>
    %c16_i32 = arith.constant 16 : i32
    %85 = vector.broadcast %c16_i32 : i32 to vector<1x1x32xi32>
    %86 = arith.cmpi slt, %75, %85 : vector<1x1x32xi32>
    %87 = arith.andi %84, %86 : vector<1x1x32xi1>
    %88 = arith.extui %87 : vector<1x1x32xi1> to vector<1x1x32xi32>
    %89 = arith.sitofp %88 : vector<1x1x32xi32> to vector<1x1x32xf32>
    %c16_i32_51 = arith.constant 16 : i32
    %90 = vector.broadcast %c16_i32_51 : i32 to vector<1x1x32xi32>
    %91 = arith.cmpi sge, %75, %90 : vector<1x1x32xi32>
    %c24_i32 = arith.constant 24 : i32
    %92 = vector.broadcast %c24_i32 : i32 to vector<1x1x32xi32>
    %93 = arith.cmpi slt, %75, %92 : vector<1x1x32xi32>
    %94 = arith.andi %91, %93 : vector<1x1x32xi1>
    %95 = arith.extui %94 : vector<1x1x32xi1> to vector<1x1x32xi32>
    %96 = arith.sitofp %95 : vector<1x1x32xi32> to vector<1x1x32xf32>
    %c24_i32_52 = arith.constant 24 : i32
    %97 = vector.broadcast %c24_i32_52 : i32 to vector<1x1x32xi32>
    %98 = arith.cmpi sge, %75, %97 : vector<1x1x32xi32>
    %c32_i32 = arith.constant 32 : i32
    %99 = vector.broadcast %c32_i32 : i32 to vector<1x1x32xi32>
    %100 = arith.cmpi slt, %75, %99 : vector<1x1x32xi32>
    %101 = arith.andi %98, %100 : vector<1x1x32xi1>
    %102 = arith.extui %101 : vector<1x1x32xi1> to vector<1x1x32xi32>
    %103 = arith.sitofp %102 : vector<1x1x32xi32> to vector<1x1x32xf32>
    %104 = vector.broadcast %82 : vector<1x1x32xf32> to vector<2x16x32xf32>
    %105 = arith.mulf %72, %104 : vector<2x16x32xf32>
    %106 = vector.broadcast %89 : vector<1x1x32xf32> to vector<2x16x32xf32>
    %107 = arith.mulf %72, %106 : vector<2x16x32xf32>
    %108 = vector.broadcast %96 : vector<1x1x32xf32> to vector<2x16x32xf32>
    %109 = arith.mulf %72, %108 : vector<2x16x32xf32>
    %110 = vector.broadcast %103 : vector<1x1x32xf32> to vector<2x16x32xf32>
    %111 = arith.mulf %72, %110 : vector<2x16x32xf32>
    %112 = tpu.concatenate %105, %107, %109, %111 in 1 : vector<2x16x32xf32>, vector<2x16x32xf32>, vector<2x16x32xf32>, vector<2x16x32xf32> -> vector<2x64x32xf32>
    "tpu.trace_start"() <{level = 10 : i32, message = "bqd,bkd->bqk"}> : () -> ()
    %cst_53 = arith.constant dense<0.000000e+00> : vector<2x64x16xf32>
    %113 = tpu.matmul %112, %73, %cst_53 {dimension_numbers = #tpu.dot_dimension_numbers<[2], [2], [1], [1], [0, 0, 0, 1, 1, 1], [0], [0]>} : vector<2x64x32xf32>, vector<2x16x32xf32>, vector<2x64x16xf32> -> vector<2x64x16xf32>
    "tpu.trace_stop"() : () -> ()
    %cst_54 = arith.constant 0.353553385 : f32
    %114 = vector.broadcast %cst_54 : f32 to vector<2x64x16xf32>
    %115 = arith.mulf %113, %114 : vector<2x64x16xf32>
    %116 = vector.broadcast %62 : vector<2x1x16xf32> to vector<2x64x16xf32>
    %117 = arith.addf %115, %116 : vector<2x64x16xf32>
    %cst_55 = arith.constant dense<0xFF800000> : vector<2x64xf32>
    %118 = vector.multi_reduction <maximumf>, %117, %cst_55 [2] : vector<2x64x16xf32> to vector<2x64xf32>
    %cst_56 = arith.constant 0xFF800000 : f32
    %119 = vector.broadcast %cst_56 : f32 to vector<2x64xf32>
    %120 = arith.maximumf %119, %118 : vector<2x64xf32>
    %121 = vector.shape_cast %120 : vector<2x64xf32> to vector<2x64x1xf32>
    %122 = vector.broadcast %121 : vector<2x64x1xf32> to vector<2x64x16xf32>
    %123 = arith.subf %117, %122 : vector<2x64x16xf32>
    %124 = math.exp %123 : vector<2x64x16xf32>
    %cst_57 = arith.constant dense<0.000000e+00> : vector<2x64xf32>
    %125 = vector.multi_reduction <add>, %124, %cst_57 [2] : vector<2x64x16xf32> to vector<2x64xf32>
    %126 = vector.shape_cast %125 : vector<2x64xf32> to vector<2x64x1xf32>
    %127 = vector.broadcast %126 : vector<2x64x1xf32> to vector<2x64x16xf32>
    %128 = arith.divf %124, %127 : vector<2x64x16xf32>
    "tpu.trace_start"() <{level = 10 : i32, message = "bqk,bkd->bqd"}> : () -> ()
    %cst_58 = arith.constant dense<0.000000e+00> : vector<2x64x32xf32>
    %129 = tpu.matmul %128, %74, %cst_58 {dimension_numbers = #tpu.dot_dimension_numbers<[2], [1], [1], [2], [0, 0, 0, 1, 1, 2], [0], [0]>} : vector<2x64x16xf32>, vector<2x16x32xf32>, vector<2x64x32xf32> -> vector<2x64x32xf32>
    "tpu.trace_stop"() : () -> ()
    %130 = vector.extract_strided_slice %129 {offsets = [0, 0, 0], sizes = [2, 16, 32], strides = [1, 1, 1]} : vector<2x64x32xf32> to vector<2x16x32xf32>
    %131 = vector.broadcast %82 : vector<1x1x32xf32> to vector<2x16x32xf32>
    %132 = arith.mulf %130, %131 : vector<2x16x32xf32>
    %133 = vector.extract_strided_slice %129 {offsets = [0, 16, 0], sizes = [2, 16, 32], strides = [1, 1, 1]} : vector<2x64x32xf32> to vector<2x16x32xf32>
    %134 = vector.broadcast %89 : vector<1x1x32xf32> to vector<2x16x32xf32>
    %135 = arith.mulf %133, %134 : vector<2x16x32xf32>
    %136 = arith.addf %132, %135 : vector<2x16x32xf32>
    %137 = vector.extract_strided_slice %129 {offsets = [0, 32, 0], sizes = [2, 16, 32], strides = [1, 1, 1]} : vector<2x64x32xf32> to vector<2x16x32xf32>
    %138 = vector.broadcast %96 : vector<1x1x32xf32> to vector<2x16x32xf32>
    %139 = arith.mulf %137, %138 : vector<2x16x32xf32>
    %140 = arith.addf %136, %139 : vector<2x16x32xf32>
    %141 = vector.extract_strided_slice %129 {offsets = [0, 48, 0], sizes = [2, 16, 32], strides = [1, 1, 1]} : vector<2x64x32xf32> to vector<2x16x32xf32>
    %142 = vector.broadcast %103 : vector<1x1x32xf32> to vector<2x16x32xf32>
    %143 = arith.mulf %141, %142 : vector<2x16x32xf32>
    %144 = arith.addf %140, %143 : vector<2x16x32xf32>
    %c0_59 = arith.constant 0 : index
    %c0_60 = arith.constant 0 : index
    %c0_61 = arith.constant 0 : index
    %145 = vector.load %arg15[%c0_59, %c0_60, %c0_61] : memref<3x32x32xf32, #tpu.memory_space<vmem>>, vector<1x32x32xf32>
    %146 = vector.shape_cast %145 : vector<1x32x32xf32> to vector<32x32xf32>
    %147 = vector.shape_cast %144 : vector<2x16x32xf32> to vector<32x32xf32>
    %cst_62 = arith.constant dense<0.000000e+00> : vector<32x32xf32>
    %148 = tpu.matmul %147, %146, %cst_62 {dimension_numbers = #tpu.dot_dimension_numbers<[1], [0], [0], [1], [0, 0, 1, 1], [], []>} : vector<32x32xf32>, vector<32x32xf32>, vector<32x32xf32> -> vector<32x32xf32>
    %149 = vector.shape_cast %148 : vector<32x32xf32> to vector<2x16x32xf32>
    %c0_63 = arith.constant 0 : index
    %c0_64 = arith.constant 0 : index
    %c0_65 = arith.constant 0 : index
    %c0_66 = arith.constant 0 : index
    %150 = vector.load %arg16[%c0_63, %c0_64, %c0_65, %c0_66] : memref<3x1x1x32xf32, #tpu.memory_space<vmem>>, vector<1x1x1x32xf32>
    %151 = vector.shape_cast %150 : vector<1x1x1x32xf32> to vector<1x1x32xf32>
    %152 = vector.broadcast %151 : vector<1x1x32xf32> to vector<2x16x32xf32>
    %153 = arith.addf %149, %152 : vector<2x16x32xf32>
    %154 = arith.addf %153, %57 : vector<2x16x32xf32>
    %c0_67 = arith.constant 0 : index
    %c0_68 = arith.constant 0 : index
    %c0_69 = arith.constant 0 : index
    %c0_70 = arith.constant 0 : index
    %155 = vector.load %arg17[%c0_67, %c0_68, %c0_69, %c0_70] : memref<3x1x1x32xf32, #tpu.memory_space<vmem>>, vector<1x1x1x32xf32>
    %156 = vector.shape_cast %155 : vector<1x1x1x32xf32> to vector<1x1x32xf32>
    %c0_71 = arith.constant 0 : index
    %c0_72 = arith.constant 0 : index
    %c0_73 = arith.constant 0 : index
    %c0_74 = arith.constant 0 : index
    %157 = vector.load %arg18[%c0_71, %c0_72, %c0_73, %c0_74] : memref<3x1x1x32xf32, #tpu.memory_space<vmem>>, vector<1x1x1x32xf32>
    %158 = vector.shape_cast %157 : vector<1x1x1x32xf32> to vector<1x1x32xf32>
    %cst_75 = arith.constant dense<0.000000e+00> : vector<2x16xf32>
    %159 = vector.multi_reduction <add>, %154, %cst_75 [2] : vector<2x16x32xf32> to vector<2x16xf32>
    %160 = vector.shape_cast %159 : vector<2x16xf32> to vector<2x16x1xf32>
    %cst_76 = arith.constant 3.200000e+01 : f32
    %161 = vector.broadcast %cst_76 : f32 to vector<2x16x1xf32>
    %162 = arith.divf %160, %161 : vector<2x16x1xf32>
    %163 = vector.broadcast %162 : vector<2x16x1xf32> to vector<2x16x32xf32>
    %164 = arith.subf %154, %163 : vector<2x16x32xf32>
    %165 = arith.mulf %164, %164 : vector<2x16x32xf32>
    %cst_77 = arith.constant dense<0.000000e+00> : vector<2x16xf32>
    %166 = vector.multi_reduction <add>, %165, %cst_77 [2] : vector<2x16x32xf32> to vector<2x16xf32>
    %167 = vector.shape_cast %166 : vector<2x16xf32> to vector<2x16x1xf32>
    %cst_78 = arith.constant 3.200000e+01 : f32
    %168 = vector.broadcast %cst_78 : f32 to vector<2x16x1xf32>
    %169 = arith.divf %167, %168 : vector<2x16x1xf32>
    %170 = vector.broadcast %162 : vector<2x16x1xf32> to vector<2x16x32xf32>
    %171 = arith.subf %154, %170 : vector<2x16x32xf32>
    %cst_79 = arith.constant 9.99999996E-13 : f32
    %172 = vector.broadcast %cst_79 : f32 to vector<2x16x1xf32>
    %173 = arith.addf %169, %172 : vector<2x16x1xf32>
    %174 = math.rsqrt %173 : vector<2x16x1xf32>
    %175 = vector.broadcast %174 : vector<2x16x1xf32> to vector<2x16x32xf32>
    %176 = arith.mulf %171, %175 : vector<2x16x32xf32>
    %177 = vector.broadcast %156 : vector<1x1x32xf32> to vector<2x16x32xf32>
    %178 = arith.mulf %176, %177 : vector<2x16x32xf32>
    %179 = vector.broadcast %158 : vector<1x1x32xf32> to vector<2x16x32xf32>
    %180 = arith.addf %178, %179 : vector<2x16x32xf32>
    "tpu.trace_start"() <{level = 10 : i32, message = "bqt,bth->bqh"}> : () -> ()
    %cst_80 = arith.constant dense<0.000000e+00> : vector<2x1x32xf32>
    %181 = tpu.matmul %58, %180, %cst_80 {dimension_numbers = #tpu.dot_dimension_numbers<[2], [1], [1], [2], [0, 0, 0, 1, 1, 2], [0], [0]>} : vector<2x1x16xf32>, vector<2x16x32xf32>, vector<2x1x32xf32> -> vector<2x1x32xf32>
    "tpu.trace_stop"() : () -> ()
    %cst_81 = arith.constant dense<0.000000e+00> : vector<2x1xf32>
    %182 = vector.multi_reduction <add>, %58, %cst_81 [2] : vector<2x1x16xf32> to vector<2x1xf32>
    %183 = vector.shape_cast %182 : vector<2x1xf32> to vector<2x1x1xf32>
    %cst_82 = arith.constant 9.99999971E-10 : f32
    %184 = vector.broadcast %cst_82 : f32 to vector<2x1x1xf32>
    %185 = arith.maximumf %183, %184 : vector<2x1x1xf32>
    %186 = vector.broadcast %185 : vector<2x1x1xf32> to vector<2x1x32xf32>
    %187 = arith.divf %181, %186 : vector<2x1x32xf32>
    %cst_83 = arith.constant dense<0.000000e+00> : vector<2x32xf32>
    %188 = vector.multi_reduction <add>, %187, %cst_83 [1] : vector<2x1x32xf32> to vector<2x32xf32>
    %c0_84 = arith.constant 0 : index
    %c0_85 = arith.constant 0 : index
    %c0_86 = arith.constant 0 : index
    %189 = vector.load %arg3[%c0_84, %c0_85, %c0_86] : memref<2x4x1xi32, #tpu.memory_space<vmem>>, vector<2x4x1xi32>
    %c0_87 = arith.constant 0 : index
    %c0_88 = arith.constant 0 : index
    %c0_89 = arith.constant 0 : index
    %190 = vector.load %arg4[%c0_87, %c0_88, %c0_89] : memref<2x4x1xi32, #tpu.memory_space<vmem>>, vector<2x4x1xi32>
    %191 = tpu.iota {dimensions = array<i32: 2>} : vector<2x4x16xi32>
    %c1_i32 = arith.constant 1 : i32
    %192 = vector.broadcast %c1_i32 : i32 to vector<2x4x1xi32>
    %193 = arith.addi %189, %192 : vector<2x4x1xi32>
    %194 = vector.broadcast %193 : vector<2x4x1xi32> to vector<2x4x16xi32>
    %195 = arith.cmpi sge, %191, %194 : vector<2x4x16xi32>
    %196 = vector.broadcast %190 : vector<2x4x1xi32> to vector<2x4x16xi32>
    %197 = arith.cmpi slt, %191, %196 : vector<2x4x16xi32>
    %198 = arith.andi %195, %197 : vector<2x4x16xi1>
    %199 = arith.extui %198 : vector<2x4x16xi1> to vector<2x4x16xi32>
    %200 = arith.sitofp %199 : vector<2x4x16xi32> to vector<2x4x16xf32>
    %201 = arith.subi %190, %189 : vector<2x4x1xi32>
    %c1_i32_90 = arith.constant 1 : i32
    %202 = vector.broadcast %c1_i32_90 : i32 to vector<2x4x1xi32>
    %203 = arith.subi %201, %202 : vector<2x4x1xi32>
    %204 = arith.sitofp %203 : vector<2x4x1xi32> to vector<2x4x1xf32>
    "tpu.trace_start"() <{level = 10 : i32, message = "bps,bsh->bph"}> : () -> ()
    %cst_91 = arith.constant dense<0.000000e+00> : vector<2x4x32xf32>
    %205 = tpu.matmul %200, %180, %cst_91 {dimension_numbers = #tpu.dot_dimension_numbers<[2], [1], [1], [2], [0, 0, 0, 1, 1, 2], [0], [0]>} : vector<2x4x16xf32>, vector<2x16x32xf32>, vector<2x4x32xf32> -> vector<2x4x32xf32>
    "tpu.trace_stop"() : () -> ()
    %206 = tpu.reciprocal %204 {approx = true} : vector<2x4x1xf32> -> vector<2x4x1xf32>
    %207 = vector.broadcast %206 : vector<2x4x1xf32> to vector<2x4x32xf32>
    %208 = arith.mulf %205, %207 : vector<2x4x32xf32>
    %c0_92 = arith.constant 0 : index
    %c0_93 = arith.constant 0 : index
    %c0_94 = arith.constant 0 : index
    %c0_95 = arith.constant 0 : index
    %209 = vector.load %arg19[%c0_92, %c0_93, %c0_94, %c0_95] : memref<2x1x1x32xf32, #tpu.memory_space<vmem>>, vector<1x1x1x32xf32>
    %210 = vector.shape_cast %209 : vector<1x1x1x32xf32> to vector<1x1x32xf32>
    %c0_96 = arith.constant 0 : index
    %c0_97 = arith.constant 0 : index
    %c0_98 = arith.constant 0 : index
    %c0_99 = arith.constant 0 : index
    %211 = vector.load %arg20[%c0_96, %c0_97, %c0_98, %c0_99] : memref<2x1x1x32xf32, #tpu.memory_space<vmem>>, vector<1x1x1x32xf32>
    %212 = vector.shape_cast %211 : vector<1x1x1x32xf32> to vector<1x1x32xf32>
    %cst_100 = arith.constant dense<0.000000e+00> : vector<2x4xf32>
    %213 = vector.multi_reduction <add>, %208, %cst_100 [2] : vector<2x4x32xf32> to vector<2x4xf32>
    %214 = vector.shape_cast %213 : vector<2x4xf32> to vector<2x4x1xf32>
    %cst_101 = arith.constant 3.200000e+01 : f32
    %215 = vector.broadcast %cst_101 : f32 to vector<2x4x1xf32>
    %216 = arith.divf %214, %215 : vector<2x4x1xf32>
    %217 = vector.broadcast %216 : vector<2x4x1xf32> to vector<2x4x32xf32>
    %218 = arith.subf %208, %217 : vector<2x4x32xf32>
    %219 = arith.mulf %218, %218 : vector<2x4x32xf32>
    %cst_102 = arith.constant dense<0.000000e+00> : vector<2x4xf32>
    %220 = vector.multi_reduction <add>, %219, %cst_102 [2] : vector<2x4x32xf32> to vector<2x4xf32>
    %221 = vector.shape_cast %220 : vector<2x4xf32> to vector<2x4x1xf32>
    %cst_103 = arith.constant 3.200000e+01 : f32
    %222 = vector.broadcast %cst_103 : f32 to vector<2x4x1xf32>
    %223 = arith.divf %221, %222 : vector<2x4x1xf32>
    %224 = vector.broadcast %216 : vector<2x4x1xf32> to vector<2x4x32xf32>
    %225 = arith.subf %208, %224 : vector<2x4x32xf32>
    %cst_104 = arith.constant 1.000000e-07 : f32
    %226 = vector.broadcast %cst_104 : f32 to vector<2x4x1xf32>
    %227 = arith.addf %223, %226 : vector<2x4x1xf32>
    %228 = math.rsqrt %227 : vector<2x4x1xf32>
    %229 = vector.broadcast %228 : vector<2x4x1xf32> to vector<2x4x32xf32>
    %230 = arith.mulf %225, %229 : vector<2x4x32xf32>
    %231 = vector.broadcast %210 : vector<1x1x32xf32> to vector<2x4x32xf32>
    %232 = arith.mulf %230, %231 : vector<2x4x32xf32>
    %233 = vector.broadcast %212 : vector<1x1x32xf32> to vector<2x4x32xf32>
    %234 = arith.addf %232, %233 : vector<2x4x32xf32>
    %c0_105 = arith.constant 0 : index
    %c0_106 = arith.constant 0 : index
    %c0_107 = arith.constant 0 : index
    %235 = vector.load %arg21[%c0_105, %c0_106, %c0_107] : memref<2x32x128xf32, #tpu.memory_space<vmem>>, vector<1x32x128xf32>
    %236 = vector.shape_cast %235 : vector<1x32x128xf32> to vector<32x128xf32>
    %c0_108 = arith.constant 0 : index
    %c0_109 = arith.constant 0 : index
    %c0_110 = arith.constant 0 : index
    %c0_111 = arith.constant 0 : index
    %237 = vector.load %arg22[%c0_108, %c0_109, %c0_110, %c0_111] : memref<2x1x1x128xf32, #tpu.memory_space<vmem>>, vector<1x1x1x128xf32>
    %238 = vector.shape_cast %237 : vector<1x1x1x128xf32> to vector<1x1x128xf32>
    %c0_112 = arith.constant 0 : index
    %c0_113 = arith.constant 0 : index
    %c0_114 = arith.constant 0 : index
    %239 = vector.load %arg23[%c0_112, %c0_113, %c0_114] : memref<2x32x128xf32, #tpu.memory_space<vmem>>, vector<1x32x128xf32>
    %240 = vector.shape_cast %239 : vector<1x32x128xf32> to vector<32x128xf32>
    %241 = vector.shape_cast %234 : vector<2x4x32xf32> to vector<8x32xf32>
    %cst_115 = arith.constant dense<0.000000e+00> : vector<8x128xf32>
    %242 = tpu.matmul %241, %236, %cst_115 {dimension_numbers = #tpu.dot_dimension_numbers<[1], [0], [0], [1], [0, 0, 1, 1], [], []>} : vector<8x32xf32>, vector<32x128xf32>, vector<8x128xf32> -> vector<8x128xf32>
    %243 = vector.shape_cast %242 : vector<8x128xf32> to vector<2x4x128xf32>
    %244 = vector.broadcast %238 : vector<1x1x128xf32> to vector<2x4x128xf32>
    %245 = arith.addf %243, %244 : vector<2x4x128xf32>
    %246 = tpu.iota {dimensions = array<i32: 2>} : vector<1x1x128xi32>
    %c32_i32_116 = arith.constant 32 : i32
    %c0_i32_117 = arith.constant 0 : i32
    %247 = arith.cmpi eq, %c32_i32_116, %c0_i32_117 : i32
    %c1_i32_118 = arith.constant 1 : i32
    %248 = arith.select %247, %c1_i32_118, %c32_i32_116 : i32
    %249 = vector.broadcast %248 : i32 to vector<1x1x128xi32>
    %250 = arith.remsi %246, %249 : vector<1x1x128xi32>
    %c0_i32_119 = arith.constant 0 : i32
    %251 = vector.broadcast %c0_i32_119 : i32 to vector<1x1x128xi32>
    %252 = arith.cmpi ne, %250, %251 : vector<1x1x128xi32>
    %c0_i32_120 = arith.constant 0 : i32
    %253 = vector.broadcast %c0_i32_120 : i32 to vector<1x1x128xi32>
    %254 = arith.cmpi slt, %250, %253 : vector<1x1x128xi32>
    %c0_i32_121 = arith.constant 0 : i32
    %255 = arith.cmpi slt, %248, %c0_i32_121 : i32
    %256 = vector.broadcast %255 : i1 to vector<1x1x128xi1>
    %257 = vector.broadcast %256 : vector<1x1x128xi1> to vector<1x1x128xi1>
    %258 = arith.xori %254, %257 : vector<1x1x128xi1>
    %259 = arith.andi %258, %252 : vector<1x1x128xi1>
    %260 = vector.broadcast %248 : i32 to vector<1x1x128xi32>
    %261 = arith.addi %250, %260 : vector<1x1x128xi32>
    %262 = arith.select %259, %261, %250 : vector<1x1x128xi1>, vector<1x1x128xi32>
    %c16_i32_122 = arith.constant 16 : i32
    %263 = vector.broadcast %c16_i32_122 : i32 to vector<1x1x128xi32>
    %264 = arith.cmpi slt, %262, %263 : vector<1x1x128xi32>
    %265 = vector.extract_strided_slice %245 {offsets = [0, 3, 0], sizes = [2, 1, 128], strides = [1, 1, 1]} : vector<2x4x128xf32> to vector<2x1x128xf32>
    %266 = vector.extract_strided_slice %245 {offsets = [0, 2, 0], sizes = [2, 1, 128], strides = [1, 1, 1]} : vector<2x4x128xf32> to vector<2x1x128xf32>
    %267 = vector.extract_strided_slice %245 {offsets = [0, 1, 0], sizes = [2, 1, 128], strides = [1, 1, 1]} : vector<2x4x128xf32> to vector<2x1x128xf32>
    %268 = vector.extract_strided_slice %245 {offsets = [0, 0, 0], sizes = [2, 1, 128], strides = [1, 1, 1]} : vector<2x4x128xf32> to vector<2x1x128xf32>
    %269 = tpu.concatenate %265, %266, %267, %268 in 1 : vector<2x1x128xf32>, vector<2x1x128xf32>, vector<2x1x128xf32>, vector<2x1x128xf32> -> vector<2x4x128xf32>
    %270 = vector.shape_cast %264 : vector<1x1x128xi1> to vector<1x1x128xi1>
    %271 = vector.broadcast %270 : vector<1x1x128xi1> to vector<2x4x128xi1>
    %272 = arith.select %271, %245, %269 : vector<2x4x128xi1>, vector<2x4x128xf32>
    %273 = vector.extract_strided_slice %272 {offsets = [0, 0, 0], sizes = [2, 1, 128], strides = [1, 1, 1]} : vector<2x4x128xf32> to vector<2x1x128xf32>
    %cst_123 = arith.constant dense<0.000000e+00> : vector<2x128xf32>
    %274 = vector.multi_reduction <add>, %273, %cst_123 [1] : vector<2x1x128xf32> to vector<2x128xf32>
    %275 = vector.extract_strided_slice %272 {offsets = [0, 1, 0], sizes = [2, 1, 128], strides = [1, 1, 1]} : vector<2x4x128xf32> to vector<2x1x128xf32>
    %cst_124 = arith.constant dense<0.000000e+00> : vector<2x128xf32>
    %276 = vector.multi_reduction <add>, %275, %cst_124 [1] : vector<2x1x128xf32> to vector<2x128xf32>
    %277 = vector.extract_strided_slice %272 {offsets = [0, 2, 0], sizes = [2, 1, 128], strides = [1, 1, 1]} : vector<2x4x128xf32> to vector<2x1x128xf32>
    %cst_125 = arith.constant dense<0.000000e+00> : vector<2x128xf32>
    %278 = vector.multi_reduction <add>, %277, %cst_125 [1] : vector<2x1x128xf32> to vector<2x128xf32>
    %279 = vector.extract_strided_slice %272 {offsets = [0, 3, 0], sizes = [2, 1, 128], strides = [1, 1, 1]} : vector<2x4x128xf32> to vector<2x1x128xf32>
    %cst_126 = arith.constant dense<0.000000e+00> : vector<2x128xf32>
    %280 = vector.multi_reduction <add>, %279, %cst_126 [1] : vector<2x1x128xf32> to vector<2x128xf32>
    %cst_127 = arith.constant 0.000000e+00 : f32
    %281 = vector.broadcast %cst_127 : f32 to vector<2x32xf32>
    %cst_128 = arith.constant 0.000000e+00 : f32
    %282 = vector.broadcast %cst_128 : f32 to vector<2x32xf32>
    %cst_129 = arith.constant dense<0.000000e+00> : vector<2x128xf32>
    %283 = tpu.matmul %281, %240, %cst_129 {dimension_numbers = #tpu.dot_dimension_numbers<[1], [0], [0], [1], [0, 0, 1, 1], [], []>} : vector<2x32xf32>, vector<32x128xf32>, vector<2x128xf32> -> vector<2x128xf32>
    %284 = arith.addf %274, %283 : vector<2x128xf32>
    %285 = arith.negf %284 : vector<2x128xf32>
    %286 = math.exp %285 : vector<2x128xf32>
    %cst_130 = arith.constant 1.000000e+00 : f32
    %287 = vector.broadcast %cst_130 : f32 to vector<2x128xf32>
    %288 = arith.addf %287, %286 : vector<2x128xf32>
    %289 = arith.divf %287, %288 : vector<2x128xf32>
    %290 = vector.extract_strided_slice %289 {offsets = [0, 0], sizes = [2, 32], strides = [1, 1]} : vector<2x128xf32> to vector<2x32xf32>
    %291 = vector.extract_strided_slice %289 {offsets = [0, 32], sizes = [2, 32], strides = [1, 1]} : vector<2x128xf32> to vector<2x32xf32>
    %292 = vector.extract_strided_slice %289 {offsets = [0, 96], sizes = [2, 32], strides = [1, 1]} : vector<2x128xf32> to vector<2x32xf32>
    %293 = vector.extract_strided_slice %284 {offsets = [0, 64], sizes = [2, 32], strides = [1, 1]} : vector<2x128xf32> to vector<2x32xf32>
    %294 = math.tanh %293 : vector<2x32xf32>
    %295 = arith.mulf %291, %282 : vector<2x32xf32>
    %296 = arith.mulf %290, %294 : vector<2x32xf32>
    %297 = arith.addf %295, %296 : vector<2x32xf32>
    %298 = math.tanh %297 : vector<2x32xf32>
    %299 = arith.mulf %292, %298 : vector<2x32xf32>
    %cst_131 = arith.constant dense<0.000000e+00> : vector<2x128xf32>
    %300 = tpu.matmul %299, %240, %cst_131 {dimension_numbers = #tpu.dot_dimension_numbers<[1], [0], [0], [1], [0, 0, 1, 1], [], []>} : vector<2x32xf32>, vector<32x128xf32>, vector<2x128xf32> -> vector<2x128xf32>
    %301 = arith.addf %276, %300 : vector<2x128xf32>
    %302 = arith.negf %301 : vector<2x128xf32>
    %303 = math.exp %302 : vector<2x128xf32>
    %cst_132 = arith.constant 1.000000e+00 : f32
    %304 = vector.broadcast %cst_132 : f32 to vector<2x128xf32>
    %305 = arith.addf %304, %303 : vector<2x128xf32>
    %306 = arith.divf %304, %305 : vector<2x128xf32>
    %307 = vector.extract_strided_slice %306 {offsets = [0, 0], sizes = [2, 32], strides = [1, 1]} : vector<2x128xf32> to vector<2x32xf32>
    %308 = vector.extract_strided_slice %306 {offsets = [0, 32], sizes = [2, 32], strides = [1, 1]} : vector<2x128xf32> to vector<2x32xf32>
    %309 = vector.extract_strided_slice %306 {offsets = [0, 96], sizes = [2, 32], strides = [1, 1]} : vector<2x128xf32> to vector<2x32xf32>
    %310 = vector.extract_strided_slice %301 {offsets = [0, 64], sizes = [2, 32], strides = [1, 1]} : vector<2x128xf32> to vector<2x32xf32>
    %311 = math.tanh %310 : vector<2x32xf32>
    %312 = arith.mulf %308, %297 : vector<2x32xf32>
    %313 = arith.mulf %307, %311 : vector<2x32xf32>
    %314 = arith.addf %312, %313 : vector<2x32xf32>
    %315 = math.tanh %314 : vector<2x32xf32>
    %316 = arith.mulf %309, %315 : vector<2x32xf32>
    %cst_133 = arith.constant dense<0.000000e+00> : vector<2x128xf32>
    %317 = tpu.matmul %316, %240, %cst_133 {dimension_numbers = #tpu.dot_dimension_numbers<[1], [0], [0], [1], [0, 0, 1, 1], [], []>} : vector<2x32xf32>, vector<32x128xf32>, vector<2x128xf32> -> vector<2x128xf32>
    %318 = arith.addf %278, %317 : vector<2x128xf32>
    %319 = arith.negf %318 : vector<2x128xf32>
    %320 = math.exp %319 : vector<2x128xf32>
    %cst_134 = arith.constant 1.000000e+00 : f32
    %321 = vector.broadcast %cst_134 : f32 to vector<2x128xf32>
    %322 = arith.addf %321, %320 : vector<2x128xf32>
    %323 = arith.divf %321, %322 : vector<2x128xf32>
    %324 = vector.extract_strided_slice %323 {offsets = [0, 0], sizes = [2, 32], strides = [1, 1]} : vector<2x128xf32> to vector<2x32xf32>
    %325 = vector.extract_strided_slice %323 {offsets = [0, 32], sizes = [2, 32], strides = [1, 1]} : vector<2x128xf32> to vector<2x32xf32>
    %326 = vector.extract_strided_slice %323 {offsets = [0, 96], sizes = [2, 32], strides = [1, 1]} : vector<2x128xf32> to vector<2x32xf32>
    %327 = vector.extract_strided_slice %318 {offsets = [0, 64], sizes = [2, 32], strides = [1, 1]} : vector<2x128xf32> to vector<2x32xf32>
    %328 = math.tanh %327 : vector<2x32xf32>
    %329 = arith.mulf %325, %314 : vector<2x32xf32>
    %330 = arith.mulf %324, %328 : vector<2x32xf32>
    %331 = arith.addf %329, %330 : vector<2x32xf32>
    %332 = math.tanh %331 : vector<2x32xf32>
    %333 = arith.mulf %326, %332 : vector<2x32xf32>
    %cst_135 = arith.constant dense<0.000000e+00> : vector<2x128xf32>
    %334 = tpu.matmul %333, %240, %cst_135 {dimension_numbers = #tpu.dot_dimension_numbers<[1], [0], [0], [1], [0, 0, 1, 1], [], []>} : vector<2x32xf32>, vector<32x128xf32>, vector<2x128xf32> -> vector<2x128xf32>
    %335 = arith.addf %280, %334 : vector<2x128xf32>
    %336 = arith.negf %335 : vector<2x128xf32>
    %337 = math.exp %336 : vector<2x128xf32>
    %cst_136 = arith.constant 1.000000e+00 : f32
    %338 = vector.broadcast %cst_136 : f32 to vector<2x128xf32>
    %339 = arith.addf %338, %337 : vector<2x128xf32>
    %340 = arith.divf %338, %339 : vector<2x128xf32>
    %341 = vector.extract_strided_slice %340 {offsets = [0, 0], sizes = [2, 32], strides = [1, 1]} : vector<2x128xf32> to vector<2x32xf32>
    %342 = vector.extract_strided_slice %340 {offsets = [0, 32], sizes = [2, 32], strides = [1, 1]} : vector<2x128xf32> to vector<2x32xf32>
    %343 = vector.extract_strided_slice %340 {offsets = [0, 96], sizes = [2, 32], strides = [1, 1]} : vector<2x128xf32> to vector<2x32xf32>
    %344 = vector.extract_strided_slice %335 {offsets = [0, 64], sizes = [2, 32], strides = [1, 1]} : vector<2x128xf32> to vector<2x32xf32>
    %345 = math.tanh %344 : vector<2x32xf32>
    %346 = arith.mulf %342, %331 : vector<2x32xf32>
    %347 = arith.mulf %341, %345 : vector<2x32xf32>
    %348 = arith.addf %346, %347 : vector<2x32xf32>
    %349 = math.tanh %348 : vector<2x32xf32>
    %350 = arith.mulf %343, %349 : vector<2x32xf32>
    %351 = tpu.iota {dimensions = array<i32: 2>} : vector<1x1x32xi32>
    %c16_i32_137 = arith.constant 16 : i32
    %352 = vector.broadcast %c16_i32_137 : i32 to vector<1x1x32xi32>
    %353 = arith.cmpi slt, %351, %352 : vector<1x1x32xi32>
    %354 = vector.shape_cast %299 : vector<2x32xf32> to vector<2x1x32xf32>
    %355 = vector.shape_cast %316 : vector<2x32xf32> to vector<2x1x32xf32>
    %356 = vector.shape_cast %333 : vector<2x32xf32> to vector<2x1x32xf32>
    %357 = vector.shape_cast %350 : vector<2x32xf32> to vector<2x1x32xf32>
    %358 = tpu.concatenate %354, %355, %356, %357 in 1 : vector<2x1x32xf32>, vector<2x1x32xf32>, vector<2x1x32xf32>, vector<2x1x32xf32> -> vector<2x4x32xf32>
    %359 = vector.shape_cast %350 : vector<2x32xf32> to vector<2x1x32xf32>
    %360 = vector.shape_cast %333 : vector<2x32xf32> to vector<2x1x32xf32>
    %361 = vector.shape_cast %316 : vector<2x32xf32> to vector<2x1x32xf32>
    %362 = vector.shape_cast %299 : vector<2x32xf32> to vector<2x1x32xf32>
    %363 = tpu.concatenate %359, %360, %361, %362 in 1 : vector<2x1x32xf32>, vector<2x1x32xf32>, vector<2x1x32xf32>, vector<2x1x32xf32> -> vector<2x4x32xf32>
    %364 = vector.shape_cast %353 : vector<1x1x32xi1> to vector<1x1x32xi1>
    %365 = vector.broadcast %364 : vector<1x1x32xi1> to vector<2x4x32xi1>
    %366 = arith.select %365, %358, %363 : vector<2x4x32xi1>, vector<2x4x32xf32>
    %c0_138 = arith.constant 0 : index
    %c0_139 = arith.constant 0 : index
    %c0_140 = arith.constant 0 : index
    %367 = vector.load %arg5[%c0_138, %c0_139, %c0_140] : memref<2x1x4xf32, #tpu.memory_space<vmem>>, vector<2x1x4xf32>
    %cst_141 = arith.constant 1.000000e+00 : f32
    %368 = vector.broadcast %cst_141 : f32 to vector<2x1x4xf32>
    %369 = arith.subf %368, %367 : vector<2x1x4xf32>
    %cst_142 = arith.constant -1.000000e+04 : f32
    %370 = vector.broadcast %cst_142 : f32 to vector<2x1x4xf32>
    %371 = arith.mulf %369, %370 : vector<2x1x4xf32>
    %c1_143 = arith.constant 1 : index
    %c0_144 = arith.constant 0 : index
    %c0_145 = arith.constant 0 : index
    %372 = vector.load %arg13[%c1_143, %c0_144, %c0_145] : memref<3x32x96xf32, #tpu.memory_space<vmem>>, vector<1x32x96xf32>
    %373 = vector.shape_cast %372 : vector<1x32x96xf32> to vector<32x96xf32>
    %374 = vector.shape_cast %366 : vector<2x4x32xf32> to vector<8x32xf32>
    %cst_146 = arith.constant dense<0.000000e+00> : vector<8x96xf32>
    %375 = tpu.matmul %374, %373, %cst_146 {dimension_numbers = #tpu.dot_dimension_numbers<[1], [0], [0], [1], [0, 0, 1, 1], [], []>} : vector<8x32xf32>, vector<32x96xf32>, vector<8x96xf32> -> vector<8x96xf32>
    %376 = vector.shape_cast %375 : vector<8x96xf32> to vector<2x4x96xf32>
    %c1_147 = arith.constant 1 : index
    %c0_148 = arith.constant 0 : index
    %c0_149 = arith.constant 0 : index
    %c0_150 = arith.constant 0 : index
    %377 = vector.load %arg14[%c1_147, %c0_148, %c0_149, %c0_150] : memref<3x1x1x96xf32, #tpu.memory_space<vmem>>, vector<1x1x1x96xf32>
    %378 = vector.shape_cast %377 : vector<1x1x1x96xf32> to vector<1x1x96xf32>
    %379 = vector.broadcast %378 : vector<1x1x96xf32> to vector<2x4x96xf32>
    %380 = arith.addf %376, %379 : vector<2x4x96xf32>
    %381 = vector.extract_strided_slice %380 {offsets = [0, 0, 0], sizes = [2, 4, 32], strides = [1, 1, 1]} : vector<2x4x96xf32> to vector<2x4x32xf32>
    %382 = vector.extract_strided_slice %380 {offsets = [0, 0, 32], sizes = [2, 4, 32], strides = [1, 1, 1]} : vector<2x4x96xf32> to vector<2x4x32xf32>
    %383 = vector.extract_strided_slice %380 {offsets = [0, 0, 64], sizes = [2, 4, 32], strides = [1, 1, 1]} : vector<2x4x96xf32> to vector<2x4x32xf32>
    %384 = tpu.iota {dimensions = array<i32: 2>} : vector<1x1x32xi32>
    %c0_i32_151 = arith.constant 0 : i32
    %385 = vector.broadcast %c0_i32_151 : i32 to vector<1x1x32xi32>
    %386 = arith.cmpi sge, %384, %385 : vector<1x1x32xi32>
    %c8_i32_152 = arith.constant 8 : i32
    %387 = vector.broadcast %c8_i32_152 : i32 to vector<1x1x32xi32>
    %388 = arith.cmpi slt, %384, %387 : vector<1x1x32xi32>
    %389 = arith.andi %386, %388 : vector<1x1x32xi1>
    %390 = arith.extui %389 : vector<1x1x32xi1> to vector<1x1x32xi32>
    %391 = arith.sitofp %390 : vector<1x1x32xi32> to vector<1x1x32xf32>
    %c8_i32_153 = arith.constant 8 : i32
    %392 = vector.broadcast %c8_i32_153 : i32 to vector<1x1x32xi32>
    %393 = arith.cmpi sge, %384, %392 : vector<1x1x32xi32>
    %c16_i32_154 = arith.constant 16 : i32
    %394 = vector.broadcast %c16_i32_154 : i32 to vector<1x1x32xi32>
    %395 = arith.cmpi slt, %384, %394 : vector<1x1x32xi32>
    %396 = arith.andi %393, %395 : vector<1x1x32xi1>
    %397 = arith.extui %396 : vector<1x1x32xi1> to vector<1x1x32xi32>
    %398 = arith.sitofp %397 : vector<1x1x32xi32> to vector<1x1x32xf32>
    %c16_i32_155 = arith.constant 16 : i32
    %399 = vector.broadcast %c16_i32_155 : i32 to vector<1x1x32xi32>
    %400 = arith.cmpi sge, %384, %399 : vector<1x1x32xi32>
    %c24_i32_156 = arith.constant 24 : i32
    %401 = vector.broadcast %c24_i32_156 : i32 to vector<1x1x32xi32>
    %402 = arith.cmpi slt, %384, %401 : vector<1x1x32xi32>
    %403 = arith.andi %400, %402 : vector<1x1x32xi1>
    %404 = arith.extui %403 : vector<1x1x32xi1> to vector<1x1x32xi32>
    %405 = arith.sitofp %404 : vector<1x1x32xi32> to vector<1x1x32xf32>
    %c24_i32_157 = arith.constant 24 : i32
    %406 = vector.broadcast %c24_i32_157 : i32 to vector<1x1x32xi32>
    %407 = arith.cmpi sge, %384, %406 : vector<1x1x32xi32>
    %c32_i32_158 = arith.constant 32 : i32
    %408 = vector.broadcast %c32_i32_158 : i32 to vector<1x1x32xi32>
    %409 = arith.cmpi slt, %384, %408 : vector<1x1x32xi32>
    %410 = arith.andi %407, %409 : vector<1x1x32xi1>
    %411 = arith.extui %410 : vector<1x1x32xi1> to vector<1x1x32xi32>
    %412 = arith.sitofp %411 : vector<1x1x32xi32> to vector<1x1x32xf32>
    %413 = vector.broadcast %391 : vector<1x1x32xf32> to vector<2x4x32xf32>
    %414 = arith.mulf %381, %413 : vector<2x4x32xf32>
    %415 = vector.broadcast %398 : vector<1x1x32xf32> to vector<2x4x32xf32>
    %416 = arith.mulf %381, %415 : vector<2x4x32xf32>
    %417 = vector.broadcast %405 : vector<1x1x32xf32> to vector<2x4x32xf32>
    %418 = arith.mulf %381, %417 : vector<2x4x32xf32>
    %419 = vector.broadcast %412 : vector<1x1x32xf32> to vector<2x4x32xf32>
    %420 = arith.mulf %381, %419 : vector<2x4x32xf32>
    %421 = tpu.concatenate %414, %416, %418, %420 in 1 : vector<2x4x32xf32>, vector<2x4x32xf32>, vector<2x4x32xf32>, vector<2x4x32xf32> -> vector<2x16x32xf32>
    "tpu.trace_start"() <{level = 10 : i32, message = "bqd,bkd->bqk"}> : () -> ()
    %cst_159 = arith.constant dense<0.000000e+00> : vector<2x16x4xf32>
    %422 = tpu.matmul %421, %382, %cst_159 {dimension_numbers = #tpu.dot_dimension_numbers<[2], [2], [1], [1], [0, 0, 0, 1, 1, 1], [0], [0]>} : vector<2x16x32xf32>, vector<2x4x32xf32>, vector<2x16x4xf32> -> vector<2x16x4xf32>
    "tpu.trace_stop"() : () -> ()
    %cst_160 = arith.constant 0.353553385 : f32
    %423 = vector.broadcast %cst_160 : f32 to vector<2x16x4xf32>
    %424 = arith.mulf %422, %423 : vector<2x16x4xf32>
    %425 = vector.broadcast %371 : vector<2x1x4xf32> to vector<2x16x4xf32>
    %426 = arith.addf %424, %425 : vector<2x16x4xf32>
    %cst_161 = arith.constant dense<0xFF800000> : vector<2x16xf32>
    %427 = vector.multi_reduction <maximumf>, %426, %cst_161 [2] : vector<2x16x4xf32> to vector<2x16xf32>
    %cst_162 = arith.constant 0xFF800000 : f32
    %428 = vector.broadcast %cst_162 : f32 to vector<2x16xf32>
    %429 = arith.maximumf %428, %427 : vector<2x16xf32>
    %430 = vector.shape_cast %429 : vector<2x16xf32> to vector<2x16x1xf32>
    %431 = vector.broadcast %430 : vector<2x16x1xf32> to vector<2x16x4xf32>
    %432 = arith.subf %426, %431 : vector<2x16x4xf32>
    %433 = math.exp %432 : vector<2x16x4xf32>
    %cst_163 = arith.constant dense<0.000000e+00> : vector<2x16xf32>
    %434 = vector.multi_reduction <add>, %433, %cst_163 [2] : vector<2x16x4xf32> to vector<2x16xf32>
    %435 = vector.shape_cast %434 : vector<2x16xf32> to vector<2x16x1xf32>
    %436 = vector.broadcast %435 : vector<2x16x1xf32> to vector<2x16x4xf32>
    %437 = arith.divf %433, %436 : vector<2x16x4xf32>
    "tpu.trace_start"() <{level = 10 : i32, message = "bqk,bkd->bqd"}> : () -> ()
    %cst_164 = arith.constant dense<0.000000e+00> : vector<2x16x32xf32>
    %438 = tpu.matmul %437, %383, %cst_164 {dimension_numbers = #tpu.dot_dimension_numbers<[2], [1], [1], [2], [0, 0, 0, 1, 1, 2], [0], [0]>} : vector<2x16x4xf32>, vector<2x4x32xf32>, vector<2x16x32xf32> -> vector<2x16x32xf32>
    "tpu.trace_stop"() : () -> ()
    %439 = vector.extract_strided_slice %438 {offsets = [0, 0, 0], sizes = [2, 4, 32], strides = [1, 1, 1]} : vector<2x16x32xf32> to vector<2x4x32xf32>
    %440 = vector.broadcast %391 : vector<1x1x32xf32> to vector<2x4x32xf32>
    %441 = arith.mulf %439, %440 : vector<2x4x32xf32>
    %442 = vector.extract_strided_slice %438 {offsets = [0, 4, 0], sizes = [2, 4, 32], strides = [1, 1, 1]} : vector<2x16x32xf32> to vector<2x4x32xf32>
    %443 = vector.broadcast %398 : vector<1x1x32xf32> to vector<2x4x32xf32>
    %444 = arith.mulf %442, %443 : vector<2x4x32xf32>
    %445 = arith.addf %441, %444 : vector<2x4x32xf32>
    %446 = vector.extract_strided_slice %438 {offsets = [0, 8, 0], sizes = [2, 4, 32], strides = [1, 1, 1]} : vector<2x16x32xf32> to vector<2x4x32xf32>
    %447 = vector.broadcast %405 : vector<1x1x32xf32> to vector<2x4x32xf32>
    %448 = arith.mulf %446, %447 : vector<2x4x32xf32>
    %449 = arith.addf %445, %448 : vector<2x4x32xf32>
    %450 = vector.extract_strided_slice %438 {offsets = [0, 12, 0], sizes = [2, 4, 32], strides = [1, 1, 1]} : vector<2x16x32xf32> to vector<2x4x32xf32>
    %451 = vector.broadcast %412 : vector<1x1x32xf32> to vector<2x4x32xf32>
    %452 = arith.mulf %450, %451 : vector<2x4x32xf32>
    %453 = arith.addf %449, %452 : vector<2x4x32xf32>
    %c1_165 = arith.constant 1 : index
    %c0_166 = arith.constant 0 : index
    %c0_167 = arith.constant 0 : index
    %454 = vector.load %arg15[%c1_165, %c0_166, %c0_167] : memref<3x32x32xf32, #tpu.memory_space<vmem>>, vector<1x32x32xf32>
    %455 = vector.shape_cast %454 : vector<1x32x32xf32> to vector<32x32xf32>
    %456 = vector.shape_cast %453 : vector<2x4x32xf32> to vector<8x32xf32>
    %cst_168 = arith.constant dense<0.000000e+00> : vector<8x32xf32>
    %457 = tpu.matmul %456, %455, %cst_168 {dimension_numbers = #tpu.dot_dimension_numbers<[1], [0], [0], [1], [0, 0, 1, 1], [], []>} : vector<8x32xf32>, vector<32x32xf32>, vector<8x32xf32> -> vector<8x32xf32>
    %458 = vector.shape_cast %457 : vector<8x32xf32> to vector<2x4x32xf32>
    %c1_169 = arith.constant 1 : index
    %c0_170 = arith.constant 0 : index
    %c0_171 = arith.constant 0 : index
    %c0_172 = arith.constant 0 : index
    %459 = vector.load %arg16[%c1_169, %c0_170, %c0_171, %c0_172] : memref<3x1x1x32xf32, #tpu.memory_space<vmem>>, vector<1x1x1x32xf32>
    %460 = vector.shape_cast %459 : vector<1x1x1x32xf32> to vector<1x1x32xf32>
    %461 = vector.broadcast %460 : vector<1x1x32xf32> to vector<2x4x32xf32>
    %462 = arith.addf %458, %461 : vector<2x4x32xf32>
    %463 = arith.addf %462, %366 : vector<2x4x32xf32>
    %c1_173 = arith.constant 1 : index
    %c0_174 = arith.constant 0 : index
    %c0_175 = arith.constant 0 : index
    %c0_176 = arith.constant 0 : index
    %464 = vector.load %arg17[%c1_173, %c0_174, %c0_175, %c0_176] : memref<3x1x1x32xf32, #tpu.memory_space<vmem>>, vector<1x1x1x32xf32>
    %465 = vector.shape_cast %464 : vector<1x1x1x32xf32> to vector<1x1x32xf32>
    %c1_177 = arith.constant 1 : index
    %c0_178 = arith.constant 0 : index
    %c0_179 = arith.constant 0 : index
    %c0_180 = arith.constant 0 : index
    %466 = vector.load %arg18[%c1_177, %c0_178, %c0_179, %c0_180] : memref<3x1x1x32xf32, #tpu.memory_space<vmem>>, vector<1x1x1x32xf32>
    %467 = vector.shape_cast %466 : vector<1x1x1x32xf32> to vector<1x1x32xf32>
    %cst_181 = arith.constant dense<0.000000e+00> : vector<2x4xf32>
    %468 = vector.multi_reduction <add>, %463, %cst_181 [2] : vector<2x4x32xf32> to vector<2x4xf32>
    %469 = vector.shape_cast %468 : vector<2x4xf32> to vector<2x4x1xf32>
    %cst_182 = arith.constant 3.200000e+01 : f32
    %470 = vector.broadcast %cst_182 : f32 to vector<2x4x1xf32>
    %471 = arith.divf %469, %470 : vector<2x4x1xf32>
    %472 = vector.broadcast %471 : vector<2x4x1xf32> to vector<2x4x32xf32>
    %473 = arith.subf %463, %472 : vector<2x4x32xf32>
    %474 = arith.mulf %473, %473 : vector<2x4x32xf32>
    %cst_183 = arith.constant dense<0.000000e+00> : vector<2x4xf32>
    %475 = vector.multi_reduction <add>, %474, %cst_183 [2] : vector<2x4x32xf32> to vector<2x4xf32>
    %476 = vector.shape_cast %475 : vector<2x4xf32> to vector<2x4x1xf32>
    %cst_184 = arith.constant 3.200000e+01 : f32
    %477 = vector.broadcast %cst_184 : f32 to vector<2x4x1xf32>
    %478 = arith.divf %476, %477 : vector<2x4x1xf32>
    %479 = vector.broadcast %471 : vector<2x4x1xf32> to vector<2x4x32xf32>
    %480 = arith.subf %463, %479 : vector<2x4x32xf32>
    %cst_185 = arith.constant 9.99999996E-13 : f32
    %481 = vector.broadcast %cst_185 : f32 to vector<2x4x1xf32>
    %482 = arith.addf %478, %481 : vector<2x4x1xf32>
    %483 = math.rsqrt %482 : vector<2x4x1xf32>
    %484 = vector.broadcast %483 : vector<2x4x1xf32> to vector<2x4x32xf32>
    %485 = arith.mulf %480, %484 : vector<2x4x32xf32>
    %486 = vector.broadcast %465 : vector<1x1x32xf32> to vector<2x4x32xf32>
    %487 = arith.mulf %485, %486 : vector<2x4x32xf32>
    %488 = vector.broadcast %467 : vector<1x1x32xf32> to vector<2x4x32xf32>
    %489 = arith.addf %487, %488 : vector<2x4x32xf32>
    "tpu.trace_start"() <{level = 10 : i32, message = "bqt,bth->bqh"}> : () -> ()
    %cst_186 = arith.constant dense<0.000000e+00> : vector<2x1x32xf32>
    %490 = tpu.matmul %367, %489, %cst_186 {dimension_numbers = #tpu.dot_dimension_numbers<[2], [1], [1], [2], [0, 0, 0, 1, 1, 2], [0], [0]>} : vector<2x1x4xf32>, vector<2x4x32xf32>, vector<2x1x32xf32> -> vector<2x1x32xf32>
    "tpu.trace_stop"() : () -> ()
    %cst_187 = arith.constant dense<0.000000e+00> : vector<2x1xf32>
    %491 = vector.multi_reduction <add>, %367, %cst_187 [2] : vector<2x1x4xf32> to vector<2x1xf32>
    %492 = vector.shape_cast %491 : vector<2x1xf32> to vector<2x1x1xf32>
    %cst_188 = arith.constant 9.99999971E-10 : f32
    %493 = vector.broadcast %cst_188 : f32 to vector<2x1x1xf32>
    %494 = arith.maximumf %492, %493 : vector<2x1x1xf32>
    %495 = vector.broadcast %494 : vector<2x1x1xf32> to vector<2x1x32xf32>
    %496 = arith.divf %490, %495 : vector<2x1x32xf32>
    %cst_189 = arith.constant dense<0.000000e+00> : vector<2x32xf32>
    %497 = vector.multi_reduction <add>, %496, %cst_189 [1] : vector<2x1x32xf32> to vector<2x32xf32>
    %c0_190 = arith.constant 0 : index
    %c0_191 = arith.constant 0 : index
    %c0_192 = arith.constant 0 : index
    %498 = vector.load %arg6[%c0_190, %c0_191, %c0_192] : memref<2x6x1xi32, #tpu.memory_space<vmem>>, vector<2x6x1xi32>
    %c0_193 = arith.constant 0 : index
    %c0_194 = arith.constant 0 : index
    %c0_195 = arith.constant 0 : index
    %499 = vector.load %arg7[%c0_193, %c0_194, %c0_195] : memref<2x6x1xi32, #tpu.memory_space<vmem>>, vector<2x6x1xi32>
    %500 = tpu.iota {dimensions = array<i32: 2>} : vector<2x6x16xi32>
    %c1_i32_196 = arith.constant 1 : i32
    %501 = vector.broadcast %c1_i32_196 : i32 to vector<2x6x1xi32>
    %502 = arith.addi %498, %501 : vector<2x6x1xi32>
    %503 = vector.broadcast %502 : vector<2x6x1xi32> to vector<2x6x16xi32>
    %504 = arith.cmpi sge, %500, %503 : vector<2x6x16xi32>
    %505 = vector.broadcast %499 : vector<2x6x1xi32> to vector<2x6x16xi32>
    %506 = arith.cmpi slt, %500, %505 : vector<2x6x16xi32>
    %507 = arith.andi %504, %506 : vector<2x6x16xi1>
    %508 = arith.extui %507 : vector<2x6x16xi1> to vector<2x6x16xi32>
    %509 = arith.sitofp %508 : vector<2x6x16xi32> to vector<2x6x16xf32>
    %510 = arith.subi %499, %498 : vector<2x6x1xi32>
    %c1_i32_197 = arith.constant 1 : i32
    %511 = vector.broadcast %c1_i32_197 : i32 to vector<2x6x1xi32>
    %512 = arith.subi %510, %511 : vector<2x6x1xi32>
    %513 = arith.sitofp %512 : vector<2x6x1xi32> to vector<2x6x1xf32>
    "tpu.trace_start"() <{level = 10 : i32, message = "bps,bsh->bph"}> : () -> ()
    %cst_198 = arith.constant dense<0.000000e+00> : vector<2x6x32xf32>
    %514 = tpu.matmul %509, %180, %cst_198 {dimension_numbers = #tpu.dot_dimension_numbers<[2], [1], [1], [2], [0, 0, 0, 1, 1, 2], [0], [0]>} : vector<2x6x16xf32>, vector<2x16x32xf32>, vector<2x6x32xf32> -> vector<2x6x32xf32>
    "tpu.trace_stop"() : () -> ()
    %515 = tpu.reciprocal %513 {approx = true} : vector<2x6x1xf32> -> vector<2x6x1xf32>
    %516 = vector.broadcast %515 : vector<2x6x1xf32> to vector<2x6x32xf32>
    %517 = arith.mulf %514, %516 : vector<2x6x32xf32>
    %c1_199 = arith.constant 1 : index
    %c0_200 = arith.constant 0 : index
    %c0_201 = arith.constant 0 : index
    %c0_202 = arith.constant 0 : index
    %518 = vector.load %arg19[%c1_199, %c0_200, %c0_201, %c0_202] : memref<2x1x1x32xf32, #tpu.memory_space<vmem>>, vector<1x1x1x32xf32>
    %519 = vector.shape_cast %518 : vector<1x1x1x32xf32> to vector<1x1x32xf32>
    %c1_203 = arith.constant 1 : index
    %c0_204 = arith.constant 0 : index
    %c0_205 = arith.constant 0 : index
    %c0_206 = arith.constant 0 : index
    %520 = vector.load %arg20[%c1_203, %c0_204, %c0_205, %c0_206] : memref<2x1x1x32xf32, #tpu.memory_space<vmem>>, vector<1x1x1x32xf32>
    %521 = vector.shape_cast %520 : vector<1x1x1x32xf32> to vector<1x1x32xf32>
    %cst_207 = arith.constant dense<0.000000e+00> : vector<2x6xf32>
    %522 = vector.multi_reduction <add>, %517, %cst_207 [2] : vector<2x6x32xf32> to vector<2x6xf32>
    %523 = vector.shape_cast %522 : vector<2x6xf32> to vector<2x6x1xf32>
    %cst_208 = arith.constant 3.200000e+01 : f32
    %524 = vector.broadcast %cst_208 : f32 to vector<2x6x1xf32>
    %525 = arith.divf %523, %524 : vector<2x6x1xf32>
    %526 = vector.broadcast %525 : vector<2x6x1xf32> to vector<2x6x32xf32>
    %527 = arith.subf %517, %526 : vector<2x6x32xf32>
    %528 = arith.mulf %527, %527 : vector<2x6x32xf32>
    %cst_209 = arith.constant dense<0.000000e+00> : vector<2x6xf32>
    %529 = vector.multi_reduction <add>, %528, %cst_209 [2] : vector<2x6x32xf32> to vector<2x6xf32>
    %530 = vector.shape_cast %529 : vector<2x6xf32> to vector<2x6x1xf32>
    %cst_210 = arith.constant 3.200000e+01 : f32
    %531 = vector.broadcast %cst_210 : f32 to vector<2x6x1xf32>
    %532 = arith.divf %530, %531 : vector<2x6x1xf32>
    %533 = vector.broadcast %525 : vector<2x6x1xf32> to vector<2x6x32xf32>
    %534 = arith.subf %517, %533 : vector<2x6x32xf32>
    %cst_211 = arith.constant 1.000000e-07 : f32
    %535 = vector.broadcast %cst_211 : f32 to vector<2x6x1xf32>
    %536 = arith.addf %532, %535 : vector<2x6x1xf32>
    %537 = math.rsqrt %536 : vector<2x6x1xf32>
    %538 = vector.broadcast %537 : vector<2x6x1xf32> to vector<2x6x32xf32>
    %539 = arith.mulf %534, %538 : vector<2x6x32xf32>
    %540 = vector.broadcast %519 : vector<1x1x32xf32> to vector<2x6x32xf32>
    %541 = arith.mulf %539, %540 : vector<2x6x32xf32>
    %542 = vector.broadcast %521 : vector<1x1x32xf32> to vector<2x6x32xf32>
    %543 = arith.addf %541, %542 : vector<2x6x32xf32>
    %c1_212 = arith.constant 1 : index
    %c0_213 = arith.constant 0 : index
    %c0_214 = arith.constant 0 : index
    %544 = vector.load %arg21[%c1_212, %c0_213, %c0_214] : memref<2x32x128xf32, #tpu.memory_space<vmem>>, vector<1x32x128xf32>
    %545 = vector.shape_cast %544 : vector<1x32x128xf32> to vector<32x128xf32>
    %c1_215 = arith.constant 1 : index
    %c0_216 = arith.constant 0 : index
    %c0_217 = arith.constant 0 : index
    %c0_218 = arith.constant 0 : index
    %546 = vector.load %arg22[%c1_215, %c0_216, %c0_217, %c0_218] : memref<2x1x1x128xf32, #tpu.memory_space<vmem>>, vector<1x1x1x128xf32>
    %547 = vector.shape_cast %546 : vector<1x1x1x128xf32> to vector<1x1x128xf32>
    %c1_219 = arith.constant 1 : index
    %c0_220 = arith.constant 0 : index
    %c0_221 = arith.constant 0 : index
    %548 = vector.load %arg23[%c1_219, %c0_220, %c0_221] : memref<2x32x128xf32, #tpu.memory_space<vmem>>, vector<1x32x128xf32>
    %549 = vector.shape_cast %548 : vector<1x32x128xf32> to vector<32x128xf32>
    %550 = vector.shape_cast %543 : vector<2x6x32xf32> to vector<12x32xf32>
    %cst_222 = arith.constant dense<0.000000e+00> : vector<12x128xf32>
    %551 = tpu.matmul %550, %545, %cst_222 {dimension_numbers = #tpu.dot_dimension_numbers<[1], [0], [0], [1], [0, 0, 1, 1], [], []>} : vector<12x32xf32>, vector<32x128xf32>, vector<12x128xf32> -> vector<12x128xf32>
    %552 = vector.shape_cast %551 : vector<12x128xf32> to vector<2x6x128xf32>
    %553 = vector.broadcast %547 : vector<1x1x128xf32> to vector<2x6x128xf32>
    %554 = arith.addf %552, %553 : vector<2x6x128xf32>
    %555 = tpu.iota {dimensions = array<i32: 2>} : vector<1x1x128xi32>
    %c32_i32_223 = arith.constant 32 : i32
    %c0_i32_224 = arith.constant 0 : i32
    %556 = arith.cmpi eq, %c32_i32_223, %c0_i32_224 : i32
    %c1_i32_225 = arith.constant 1 : i32
    %557 = arith.select %556, %c1_i32_225, %c32_i32_223 : i32
    %558 = vector.broadcast %557 : i32 to vector<1x1x128xi32>
    %559 = arith.remsi %555, %558 : vector<1x1x128xi32>
    %c0_i32_226 = arith.constant 0 : i32
    %560 = vector.broadcast %c0_i32_226 : i32 to vector<1x1x128xi32>
    %561 = arith.cmpi ne, %559, %560 : vector<1x1x128xi32>
    %c0_i32_227 = arith.constant 0 : i32
    %562 = vector.broadcast %c0_i32_227 : i32 to vector<1x1x128xi32>
    %563 = arith.cmpi slt, %559, %562 : vector<1x1x128xi32>
    %c0_i32_228 = arith.constant 0 : i32
    %564 = arith.cmpi slt, %557, %c0_i32_228 : i32
    %565 = vector.broadcast %564 : i1 to vector<1x1x128xi1>
    %566 = vector.broadcast %565 : vector<1x1x128xi1> to vector<1x1x128xi1>
    %567 = arith.xori %563, %566 : vector<1x1x128xi1>
    %568 = arith.andi %567, %561 : vector<1x1x128xi1>
    %569 = vector.broadcast %557 : i32 to vector<1x1x128xi32>
    %570 = arith.addi %559, %569 : vector<1x1x128xi32>
    %571 = arith.select %568, %570, %559 : vector<1x1x128xi1>, vector<1x1x128xi32>
    %c16_i32_229 = arith.constant 16 : i32
    %572 = vector.broadcast %c16_i32_229 : i32 to vector<1x1x128xi32>
    %573 = arith.cmpi slt, %571, %572 : vector<1x1x128xi32>
    %574 = vector.extract_strided_slice %554 {offsets = [0, 5, 0], sizes = [2, 1, 128], strides = [1, 1, 1]} : vector<2x6x128xf32> to vector<2x1x128xf32>
    %575 = vector.extract_strided_slice %554 {offsets = [0, 4, 0], sizes = [2, 1, 128], strides = [1, 1, 1]} : vector<2x6x128xf32> to vector<2x1x128xf32>
    %576 = vector.extract_strided_slice %554 {offsets = [0, 3, 0], sizes = [2, 1, 128], strides = [1, 1, 1]} : vector<2x6x128xf32> to vector<2x1x128xf32>
    %577 = vector.extract_strided_slice %554 {offsets = [0, 2, 0], sizes = [2, 1, 128], strides = [1, 1, 1]} : vector<2x6x128xf32> to vector<2x1x128xf32>
    %578 = vector.extract_strided_slice %554 {offsets = [0, 1, 0], sizes = [2, 1, 128], strides = [1, 1, 1]} : vector<2x6x128xf32> to vector<2x1x128xf32>
    %579 = vector.extract_strided_slice %554 {offsets = [0, 0, 0], sizes = [2, 1, 128], strides = [1, 1, 1]} : vector<2x6x128xf32> to vector<2x1x128xf32>
    %580 = tpu.concatenate %574, %575, %576, %577, %578, %579 in 1 : vector<2x1x128xf32>, vector<2x1x128xf32>, vector<2x1x128xf32>, vector<2x1x128xf32>, vector<2x1x128xf32>, vector<2x1x128xf32> -> vector<2x6x128xf32>
    %581 = vector.shape_cast %573 : vector<1x1x128xi1> to vector<1x1x128xi1>
    %582 = vector.broadcast %581 : vector<1x1x128xi1> to vector<2x6x128xi1>
    %583 = arith.select %582, %554, %580 : vector<2x6x128xi1>, vector<2x6x128xf32>
    %584 = vector.extract_strided_slice %583 {offsets = [0, 0, 0], sizes = [2, 1, 128], strides = [1, 1, 1]} : vector<2x6x128xf32> to vector<2x1x128xf32>
    %cst_230 = arith.constant dense<0.000000e+00> : vector<2x128xf32>
    %585 = vector.multi_reduction <add>, %584, %cst_230 [1] : vector<2x1x128xf32> to vector<2x128xf32>
    %586 = vector.extract_strided_slice %583 {offsets = [0, 1, 0], sizes = [2, 1, 128], strides = [1, 1, 1]} : vector<2x6x128xf32> to vector<2x1x128xf32>
    %cst_231 = arith.constant dense<0.000000e+00> : vector<2x128xf32>
    %587 = vector.multi_reduction <add>, %586, %cst_231 [1] : vector<2x1x128xf32> to vector<2x128xf32>
    %588 = vector.extract_strided_slice %583 {offsets = [0, 2, 0], sizes = [2, 1, 128], strides = [1, 1, 1]} : vector<2x6x128xf32> to vector<2x1x128xf32>
    %cst_232 = arith.constant dense<0.000000e+00> : vector<2x128xf32>
    %589 = vector.multi_reduction <add>, %588, %cst_232 [1] : vector<2x1x128xf32> to vector<2x128xf32>
    %590 = vector.extract_strided_slice %583 {offsets = [0, 3, 0], sizes = [2, 1, 128], strides = [1, 1, 1]} : vector<2x6x128xf32> to vector<2x1x128xf32>
    %cst_233 = arith.constant dense<0.000000e+00> : vector<2x128xf32>
    %591 = vector.multi_reduction <add>, %590, %cst_233 [1] : vector<2x1x128xf32> to vector<2x128xf32>
    %592 = vector.extract_strided_slice %583 {offsets = [0, 4, 0], sizes = [2, 1, 128], strides = [1, 1, 1]} : vector<2x6x128xf32> to vector<2x1x128xf32>
    %cst_234 = arith.constant dense<0.000000e+00> : vector<2x128xf32>
    %593 = vector.multi_reduction <add>, %592, %cst_234 [1] : vector<2x1x128xf32> to vector<2x128xf32>
    %594 = vector.extract_strided_slice %583 {offsets = [0, 5, 0], sizes = [2, 1, 128], strides = [1, 1, 1]} : vector<2x6x128xf32> to vector<2x1x128xf32>
    %cst_235 = arith.constant dense<0.000000e+00> : vector<2x128xf32>
    %595 = vector.multi_reduction <add>, %594, %cst_235 [1] : vector<2x1x128xf32> to vector<2x128xf32>
    %cst_236 = arith.constant 0.000000e+00 : f32
    %596 = vector.broadcast %cst_236 : f32 to vector<2x32xf32>
    %cst_237 = arith.constant 0.000000e+00 : f32
    %597 = vector.broadcast %cst_237 : f32 to vector<2x32xf32>
    %cst_238 = arith.constant dense<0.000000e+00> : vector<2x128xf32>
    %598 = tpu.matmul %596, %549, %cst_238 {dimension_numbers = #tpu.dot_dimension_numbers<[1], [0], [0], [1], [0, 0, 1, 1], [], []>} : vector<2x32xf32>, vector<32x128xf32>, vector<2x128xf32> -> vector<2x128xf32>
    %599 = arith.addf %585, %598 : vector<2x128xf32>
    %600 = arith.negf %599 : vector<2x128xf32>
    %601 = math.exp %600 : vector<2x128xf32>
    %cst_239 = arith.constant 1.000000e+00 : f32
    %602 = vector.broadcast %cst_239 : f32 to vector<2x128xf32>
    %603 = arith.addf %602, %601 : vector<2x128xf32>
    %604 = arith.divf %602, %603 : vector<2x128xf32>
    %605 = vector.extract_strided_slice %604 {offsets = [0, 0], sizes = [2, 32], strides = [1, 1]} : vector<2x128xf32> to vector<2x32xf32>
    %606 = vector.extract_strided_slice %604 {offsets = [0, 32], sizes = [2, 32], strides = [1, 1]} : vector<2x128xf32> to vector<2x32xf32>
    %607 = vector.extract_strided_slice %604 {offsets = [0, 96], sizes = [2, 32], strides = [1, 1]} : vector<2x128xf32> to vector<2x32xf32>
    %608 = vector.extract_strided_slice %599 {offsets = [0, 64], sizes = [2, 32], strides = [1, 1]} : vector<2x128xf32> to vector<2x32xf32>
    %609 = math.tanh %608 : vector<2x32xf32>
    %610 = arith.mulf %606, %597 : vector<2x32xf32>
    %611 = arith.mulf %605, %609 : vector<2x32xf32>
    %612 = arith.addf %610, %611 : vector<2x32xf32>
    %613 = math.tanh %612 : vector<2x32xf32>
    %614 = arith.mulf %607, %613 : vector<2x32xf32>
    %cst_240 = arith.constant dense<0.000000e+00> : vector<2x128xf32>
    %615 = tpu.matmul %614, %549, %cst_240 {dimension_numbers = #tpu.dot_dimension_numbers<[1], [0], [0], [1], [0, 0, 1, 1], [], []>} : vector<2x32xf32>, vector<32x128xf32>, vector<2x128xf32> -> vector<2x128xf32>
    %616 = arith.addf %587, %615 : vector<2x128xf32>
    %617 = arith.negf %616 : vector<2x128xf32>
    %618 = math.exp %617 : vector<2x128xf32>
    %cst_241 = arith.constant 1.000000e+00 : f32
    %619 = vector.broadcast %cst_241 : f32 to vector<2x128xf32>
    %620 = arith.addf %619, %618 : vector<2x128xf32>
    %621 = arith.divf %619, %620 : vector<2x128xf32>
    %622 = vector.extract_strided_slice %621 {offsets = [0, 0], sizes = [2, 32], strides = [1, 1]} : vector<2x128xf32> to vector<2x32xf32>
    %623 = vector.extract_strided_slice %621 {offsets = [0, 32], sizes = [2, 32], strides = [1, 1]} : vector<2x128xf32> to vector<2x32xf32>
    %624 = vector.extract_strided_slice %621 {offsets = [0, 96], sizes = [2, 32], strides = [1, 1]} : vector<2x128xf32> to vector<2x32xf32>
    %625 = vector.extract_strided_slice %616 {offsets = [0, 64], sizes = [2, 32], strides = [1, 1]} : vector<2x128xf32> to vector<2x32xf32>
    %626 = math.tanh %625 : vector<2x32xf32>
    %627 = arith.mulf %623, %612 : vector<2x32xf32>
    %628 = arith.mulf %622, %626 : vector<2x32xf32>
    %629 = arith.addf %627, %628 : vector<2x32xf32>
    %630 = math.tanh %629 : vector<2x32xf32>
    %631 = arith.mulf %624, %630 : vector<2x32xf32>
    %cst_242 = arith.constant dense<0.000000e+00> : vector<2x128xf32>
    %632 = tpu.matmul %631, %549, %cst_242 {dimension_numbers = #tpu.dot_dimension_numbers<[1], [0], [0], [1], [0, 0, 1, 1], [], []>} : vector<2x32xf32>, vector<32x128xf32>, vector<2x128xf32> -> vector<2x128xf32>
    %633 = arith.addf %589, %632 : vector<2x128xf32>
    %634 = arith.negf %633 : vector<2x128xf32>
    %635 = math.exp %634 : vector<2x128xf32>
    %cst_243 = arith.constant 1.000000e+00 : f32
    %636 = vector.broadcast %cst_243 : f32 to vector<2x128xf32>
    %637 = arith.addf %636, %635 : vector<2x128xf32>
    %638 = arith.divf %636, %637 : vector<2x128xf32>
    %639 = vector.extract_strided_slice %638 {offsets = [0, 0], sizes = [2, 32], strides = [1, 1]} : vector<2x128xf32> to vector<2x32xf32>
    %640 = vector.extract_strided_slice %638 {offsets = [0, 32], sizes = [2, 32], strides = [1, 1]} : vector<2x128xf32> to vector<2x32xf32>
    %641 = vector.extract_strided_slice %638 {offsets = [0, 96], sizes = [2, 32], strides = [1, 1]} : vector<2x128xf32> to vector<2x32xf32>
    %642 = vector.extract_strided_slice %633 {offsets = [0, 64], sizes = [2, 32], strides = [1, 1]} : vector<2x128xf32> to vector<2x32xf32>
    %643 = math.tanh %642 : vector<2x32xf32>
    %644 = arith.mulf %640, %629 : vector<2x32xf32>
    %645 = arith.mulf %639, %643 : vector<2x32xf32>
    %646 = arith.addf %644, %645 : vector<2x32xf32>
    %647 = math.tanh %646 : vector<2x32xf32>
    %648 = arith.mulf %641, %647 : vector<2x32xf32>
    %cst_244 = arith.constant dense<0.000000e+00> : vector<2x128xf32>
    %649 = tpu.matmul %648, %549, %cst_244 {dimension_numbers = #tpu.dot_dimension_numbers<[1], [0], [0], [1], [0, 0, 1, 1], [], []>} : vector<2x32xf32>, vector<32x128xf32>, vector<2x128xf32> -> vector<2x128xf32>
    %650 = arith.addf %591, %649 : vector<2x128xf32>
    %651 = arith.negf %650 : vector<2x128xf32>
    %652 = math.exp %651 : vector<2x128xf32>
    %cst_245 = arith.constant 1.000000e+00 : f32
    %653 = vector.broadcast %cst_245 : f32 to vector<2x128xf32>
    %654 = arith.addf %653, %652 : vector<2x128xf32>
    %655 = arith.divf %653, %654 : vector<2x128xf32>
    %656 = vector.extract_strided_slice %655 {offsets = [0, 0], sizes = [2, 32], strides = [1, 1]} : vector<2x128xf32> to vector<2x32xf32>
    %657 = vector.extract_strided_slice %655 {offsets = [0, 32], sizes = [2, 32], strides = [1, 1]} : vector<2x128xf32> to vector<2x32xf32>
    %658 = vector.extract_strided_slice %655 {offsets = [0, 96], sizes = [2, 32], strides = [1, 1]} : vector<2x128xf32> to vector<2x32xf32>
    %659 = vector.extract_strided_slice %650 {offsets = [0, 64], sizes = [2, 32], strides = [1, 1]} : vector<2x128xf32> to vector<2x32xf32>
    %660 = math.tanh %659 : vector<2x32xf32>
    %661 = arith.mulf %657, %646 : vector<2x32xf32>
    %662 = arith.mulf %656, %660 : vector<2x32xf32>
    %663 = arith.addf %661, %662 : vector<2x32xf32>
    %664 = math.tanh %663 : vector<2x32xf32>
    %665 = arith.mulf %658, %664 : vector<2x32xf32>
    %cst_246 = arith.constant dense<0.000000e+00> : vector<2x128xf32>
    %666 = tpu.matmul %665, %549, %cst_246 {dimension_numbers = #tpu.dot_dimension_numbers<[1], [0], [0], [1], [0, 0, 1, 1], [], []>} : vector<2x32xf32>, vector<32x128xf32>, vector<2x128xf32> -> vector<2x128xf32>
    %667 = arith.addf %593, %666 : vector<2x128xf32>
    %668 = arith.negf %667 : vector<2x128xf32>
    %669 = math.exp %668 : vector<2x128xf32>
    %cst_247 = arith.constant 1.000000e+00 : f32
    %670 = vector.broadcast %cst_247 : f32 to vector<2x128xf32>
    %671 = arith.addf %670, %669 : vector<2x128xf32>
    %672 = arith.divf %670, %671 : vector<2x128xf32>
    %673 = vector.extract_strided_slice %672 {offsets = [0, 0], sizes = [2, 32], strides = [1, 1]} : vector<2x128xf32> to vector<2x32xf32>
    %674 = vector.extract_strided_slice %672 {offsets = [0, 32], sizes = [2, 32], strides = [1, 1]} : vector<2x128xf32> to vector<2x32xf32>
    %675 = vector.extract_strided_slice %672 {offsets = [0, 96], sizes = [2, 32], strides = [1, 1]} : vector<2x128xf32> to vector<2x32xf32>
    %676 = vector.extract_strided_slice %667 {offsets = [0, 64], sizes = [2, 32], strides = [1, 1]} : vector<2x128xf32> to vector<2x32xf32>
    %677 = math.tanh %676 : vector<2x32xf32>
    %678 = arith.mulf %674, %663 : vector<2x32xf32>
    %679 = arith.mulf %673, %677 : vector<2x32xf32>
    %680 = arith.addf %678, %679 : vector<2x32xf32>
    %681 = math.tanh %680 : vector<2x32xf32>
    %682 = arith.mulf %675, %681 : vector<2x32xf32>
    %cst_248 = arith.constant dense<0.000000e+00> : vector<2x128xf32>
    %683 = tpu.matmul %682, %549, %cst_248 {dimension_numbers = #tpu.dot_dimension_numbers<[1], [0], [0], [1], [0, 0, 1, 1], [], []>} : vector<2x32xf32>, vector<32x128xf32>, vector<2x128xf32> -> vector<2x128xf32>
    %684 = arith.addf %595, %683 : vector<2x128xf32>
    %685 = arith.negf %684 : vector<2x128xf32>
    %686 = math.exp %685 : vector<2x128xf32>
    %cst_249 = arith.constant 1.000000e+00 : f32
    %687 = vector.broadcast %cst_249 : f32 to vector<2x128xf32>
    %688 = arith.addf %687, %686 : vector<2x128xf32>
    %689 = arith.divf %687, %688 : vector<2x128xf32>
    %690 = vector.extract_strided_slice %689 {offsets = [0, 0], sizes = [2, 32], strides = [1, 1]} : vector<2x128xf32> to vector<2x32xf32>
    %691 = vector.extract_strided_slice %689 {offsets = [0, 32], sizes = [2, 32], strides = [1, 1]} : vector<2x128xf32> to vector<2x32xf32>
    %692 = vector.extract_strided_slice %689 {offsets = [0, 96], sizes = [2, 32], strides = [1, 1]} : vector<2x128xf32> to vector<2x32xf32>
    %693 = vector.extract_strided_slice %684 {offsets = [0, 64], sizes = [2, 32], strides = [1, 1]} : vector<2x128xf32> to vector<2x32xf32>
    %694 = math.tanh %693 : vector<2x32xf32>
    %695 = arith.mulf %691, %680 : vector<2x32xf32>
    %696 = arith.mulf %690, %694 : vector<2x32xf32>
    %697 = arith.addf %695, %696 : vector<2x32xf32>
    %698 = math.tanh %697 : vector<2x32xf32>
    %699 = arith.mulf %692, %698 : vector<2x32xf32>
    %700 = tpu.iota {dimensions = array<i32: 2>} : vector<1x1x32xi32>
    %c16_i32_250 = arith.constant 16 : i32
    %701 = vector.broadcast %c16_i32_250 : i32 to vector<1x1x32xi32>
    %702 = arith.cmpi slt, %700, %701 : vector<1x1x32xi32>
    %703 = vector.shape_cast %614 : vector<2x32xf32> to vector<2x1x32xf32>
    %704 = vector.shape_cast %631 : vector<2x32xf32> to vector<2x1x32xf32>
    %705 = vector.shape_cast %648 : vector<2x32xf32> to vector<2x1x32xf32>
    %706 = vector.shape_cast %665 : vector<2x32xf32> to vector<2x1x32xf32>
    %707 = vector.shape_cast %682 : vector<2x32xf32> to vector<2x1x32xf32>
    %708 = vector.shape_cast %699 : vector<2x32xf32> to vector<2x1x32xf32>
    %709 = tpu.concatenate %703, %704, %705, %706, %707, %708 in 1 : vector<2x1x32xf32>, vector<2x1x32xf32>, vector<2x1x32xf32>, vector<2x1x32xf32>, vector<2x1x32xf32>, vector<2x1x32xf32> -> vector<2x6x32xf32>
    %710 = vector.shape_cast %699 : vector<2x32xf32> to vector<2x1x32xf32>
    %711 = vector.shape_cast %682 : vector<2x32xf32> to vector<2x1x32xf32>
    %712 = vector.shape_cast %665 : vector<2x32xf32> to vector<2x1x32xf32>
    %713 = vector.shape_cast %648 : vector<2x32xf32> to vector<2x1x32xf32>
    %714 = vector.shape_cast %631 : vector<2x32xf32> to vector<2x1x32xf32>
    %715 = vector.shape_cast %614 : vector<2x32xf32> to vector<2x1x32xf32>
    %716 = tpu.concatenate %710, %711, %712, %713, %714, %715 in 1 : vector<2x1x32xf32>, vector<2x1x32xf32>, vector<2x1x32xf32>, vector<2x1x32xf32>, vector<2x1x32xf32>, vector<2x1x32xf32> -> vector<2x6x32xf32>
    %717 = vector.shape_cast %702 : vector<1x1x32xi1> to vector<1x1x32xi1>
    %718 = vector.broadcast %717 : vector<1x1x32xi1> to vector<2x6x32xi1>
    %719 = arith.select %718, %709, %716 : vector<2x6x32xi1>, vector<2x6x32xf32>
    %c0_251 = arith.constant 0 : index
    %c0_252 = arith.constant 0 : index
    %c0_253 = arith.constant 0 : index
    %720 = vector.load %arg8[%c0_251, %c0_252, %c0_253] : memref<2x1x6xf32, #tpu.memory_space<vmem>>, vector<2x1x6xf32>
    %cst_254 = arith.constant 1.000000e+00 : f32
    %721 = vector.broadcast %cst_254 : f32 to vector<2x1x6xf32>
    %722 = arith.subf %721, %720 : vector<2x1x6xf32>
    %cst_255 = arith.constant -1.000000e+04 : f32
    %723 = vector.broadcast %cst_255 : f32 to vector<2x1x6xf32>
    %724 = arith.mulf %722, %723 : vector<2x1x6xf32>
    %c2_256 = arith.constant 2 : index
    %c0_257 = arith.constant 0 : index
    %c0_258 = arith.constant 0 : index
    %725 = vector.load %arg13[%c2_256, %c0_257, %c0_258] : memref<3x32x96xf32, #tpu.memory_space<vmem>>, vector<1x32x96xf32>
    %726 = vector.shape_cast %725 : vector<1x32x96xf32> to vector<32x96xf32>
    %727 = vector.shape_cast %719 : vector<2x6x32xf32> to vector<12x32xf32>
    %cst_259 = arith.constant dense<0.000000e+00> : vector<12x96xf32>
    %728 = tpu.matmul %727, %726, %cst_259 {dimension_numbers = #tpu.dot_dimension_numbers<[1], [0], [0], [1], [0, 0, 1, 1], [], []>} : vector<12x32xf32>, vector<32x96xf32>, vector<12x96xf32> -> vector<12x96xf32>
    %729 = vector.shape_cast %728 : vector<12x96xf32> to vector<2x6x96xf32>
    %c2_260 = arith.constant 2 : index
    %c0_261 = arith.constant 0 : index
    %c0_262 = arith.constant 0 : index
    %c0_263 = arith.constant 0 : index
    %730 = vector.load %arg14[%c2_260, %c0_261, %c0_262, %c0_263] : memref<3x1x1x96xf32, #tpu.memory_space<vmem>>, vector<1x1x1x96xf32>
    %731 = vector.shape_cast %730 : vector<1x1x1x96xf32> to vector<1x1x96xf32>
    %732 = vector.broadcast %731 : vector<1x1x96xf32> to vector<2x6x96xf32>
    %733 = arith.addf %729, %732 : vector<2x6x96xf32>
    %734 = vector.extract_strided_slice %733 {offsets = [0, 0, 0], sizes = [2, 6, 32], strides = [1, 1, 1]} : vector<2x6x96xf32> to vector<2x6x32xf32>
    %735 = vector.extract_strided_slice %733 {offsets = [0, 0, 32], sizes = [2, 6, 32], strides = [1, 1, 1]} : vector<2x6x96xf32> to vector<2x6x32xf32>
    %736 = vector.extract_strided_slice %733 {offsets = [0, 0, 64], sizes = [2, 6, 32], strides = [1, 1, 1]} : vector<2x6x96xf32> to vector<2x6x32xf32>
    %737 = tpu.iota {dimensions = array<i32: 2>} : vector<1x1x32xi32>
    %c0_i32_264 = arith.constant 0 : i32
    %738 = vector.broadcast %c0_i32_264 : i32 to vector<1x1x32xi32>
    %739 = arith.cmpi sge, %737, %738 : vector<1x1x32xi32>
    %c8_i32_265 = arith.constant 8 : i32
    %740 = vector.broadcast %c8_i32_265 : i32 to vector<1x1x32xi32>
    %741 = arith.cmpi slt, %737, %740 : vector<1x1x32xi32>
    %742 = arith.andi %739, %741 : vector<1x1x32xi1>
    %743 = arith.extui %742 : vector<1x1x32xi1> to vector<1x1x32xi32>
    %744 = arith.sitofp %743 : vector<1x1x32xi32> to vector<1x1x32xf32>
    %c8_i32_266 = arith.constant 8 : i32
    %745 = vector.broadcast %c8_i32_266 : i32 to vector<1x1x32xi32>
    %746 = arith.cmpi sge, %737, %745 : vector<1x1x32xi32>
    %c16_i32_267 = arith.constant 16 : i32
    %747 = vector.broadcast %c16_i32_267 : i32 to vector<1x1x32xi32>
    %748 = arith.cmpi slt, %737, %747 : vector<1x1x32xi32>
    %749 = arith.andi %746, %748 : vector<1x1x32xi1>
    %750 = arith.extui %749 : vector<1x1x32xi1> to vector<1x1x32xi32>
    %751 = arith.sitofp %750 : vector<1x1x32xi32> to vector<1x1x32xf32>
    %c16_i32_268 = arith.constant 16 : i32
    %752 = vector.broadcast %c16_i32_268 : i32 to vector<1x1x32xi32>
    %753 = arith.cmpi sge, %737, %752 : vector<1x1x32xi32>
    %c24_i32_269 = arith.constant 24 : i32
    %754 = vector.broadcast %c24_i32_269 : i32 to vector<1x1x32xi32>
    %755 = arith.cmpi slt, %737, %754 : vector<1x1x32xi32>
    %756 = arith.andi %753, %755 : vector<1x1x32xi1>
    %757 = arith.extui %756 : vector<1x1x32xi1> to vector<1x1x32xi32>
    %758 = arith.sitofp %757 : vector<1x1x32xi32> to vector<1x1x32xf32>
    %c24_i32_270 = arith.constant 24 : i32
    %759 = vector.broadcast %c24_i32_270 : i32 to vector<1x1x32xi32>
    %760 = arith.cmpi sge, %737, %759 : vector<1x1x32xi32>
    %c32_i32_271 = arith.constant 32 : i32
    %761 = vector.broadcast %c32_i32_271 : i32 to vector<1x1x32xi32>
    %762 = arith.cmpi slt, %737, %761 : vector<1x1x32xi32>
    %763 = arith.andi %760, %762 : vector<1x1x32xi1>
    %764 = arith.extui %763 : vector<1x1x32xi1> to vector<1x1x32xi32>
    %765 = arith.sitofp %764 : vector<1x1x32xi32> to vector<1x1x32xf32>
    %766 = vector.broadcast %744 : vector<1x1x32xf32> to vector<2x6x32xf32>
    %767 = arith.mulf %734, %766 : vector<2x6x32xf32>
    %768 = vector.broadcast %751 : vector<1x1x32xf32> to vector<2x6x32xf32>
    %769 = arith.mulf %734, %768 : vector<2x6x32xf32>
    %770 = vector.broadcast %758 : vector<1x1x32xf32> to vector<2x6x32xf32>
    %771 = arith.mulf %734, %770 : vector<2x6x32xf32>
    %772 = vector.broadcast %765 : vector<1x1x32xf32> to vector<2x6x32xf32>
    %773 = arith.mulf %734, %772 : vector<2x6x32xf32>
    %774 = tpu.concatenate %767, %769, %771, %773 in 1 : vector<2x6x32xf32>, vector<2x6x32xf32>, vector<2x6x32xf32>, vector<2x6x32xf32> -> vector<2x24x32xf32>
    "tpu.trace_start"() <{level = 10 : i32, message = "bqd,bkd->bqk"}> : () -> ()
    %cst_272 = arith.constant dense<0.000000e+00> : vector<2x24x6xf32>
    %775 = tpu.matmul %774, %735, %cst_272 {dimension_numbers = #tpu.dot_dimension_numbers<[2], [2], [1], [1], [0, 0, 0, 1, 1, 1], [0], [0]>} : vector<2x24x32xf32>, vector<2x6x32xf32>, vector<2x24x6xf32> -> vector<2x24x6xf32>
    "tpu.trace_stop"() : () -> ()
    %cst_273 = arith.constant 0.353553385 : f32
    %776 = vector.broadcast %cst_273 : f32 to vector<2x24x6xf32>
    %777 = arith.mulf %775, %776 : vector<2x24x6xf32>
    %778 = vector.broadcast %724 : vector<2x1x6xf32> to vector<2x24x6xf32>
    %779 = arith.addf %777, %778 : vector<2x24x6xf32>
    %cst_274 = arith.constant dense<0xFF800000> : vector<2x24xf32>
    %780 = vector.multi_reduction <maximumf>, %779, %cst_274 [2] : vector<2x24x6xf32> to vector<2x24xf32>
    %cst_275 = arith.constant 0xFF800000 : f32
    %781 = vector.broadcast %cst_275 : f32 to vector<2x24xf32>
    %782 = arith.maximumf %781, %780 : vector<2x24xf32>
    %783 = vector.shape_cast %782 : vector<2x24xf32> to vector<2x24x1xf32>
    %784 = vector.broadcast %783 : vector<2x24x1xf32> to vector<2x24x6xf32>
    %785 = arith.subf %779, %784 : vector<2x24x6xf32>
    %786 = math.exp %785 : vector<2x24x6xf32>
    %cst_276 = arith.constant dense<0.000000e+00> : vector<2x24xf32>
    %787 = vector.multi_reduction <add>, %786, %cst_276 [2] : vector<2x24x6xf32> to vector<2x24xf32>
    %788 = vector.shape_cast %787 : vector<2x24xf32> to vector<2x24x1xf32>
    %789 = vector.broadcast %788 : vector<2x24x1xf32> to vector<2x24x6xf32>
    %790 = arith.divf %786, %789 : vector<2x24x6xf32>
    "tpu.trace_start"() <{level = 10 : i32, message = "bqk,bkd->bqd"}> : () -> ()
    %cst_277 = arith.constant dense<0.000000e+00> : vector<2x24x32xf32>
    %791 = tpu.matmul %790, %736, %cst_277 {dimension_numbers = #tpu.dot_dimension_numbers<[2], [1], [1], [2], [0, 0, 0, 1, 1, 2], [0], [0]>} : vector<2x24x6xf32>, vector<2x6x32xf32>, vector<2x24x32xf32> -> vector<2x24x32xf32>
    "tpu.trace_stop"() : () -> ()
    %792 = vector.extract_strided_slice %791 {offsets = [0, 0, 0], sizes = [2, 6, 32], strides = [1, 1, 1]} : vector<2x24x32xf32> to vector<2x6x32xf32>
    %793 = vector.broadcast %744 : vector<1x1x32xf32> to vector<2x6x32xf32>
    %794 = arith.mulf %792, %793 : vector<2x6x32xf32>
    %795 = vector.extract_strided_slice %791 {offsets = [0, 6, 0], sizes = [2, 6, 32], strides = [1, 1, 1]} : vector<2x24x32xf32> to vector<2x6x32xf32>
    %796 = vector.broadcast %751 : vector<1x1x32xf32> to vector<2x6x32xf32>
    %797 = arith.mulf %795, %796 : vector<2x6x32xf32>
    %798 = arith.addf %794, %797 : vector<2x6x32xf32>
    %799 = vector.extract_strided_slice %791 {offsets = [0, 12, 0], sizes = [2, 6, 32], strides = [1, 1, 1]} : vector<2x24x32xf32> to vector<2x6x32xf32>
    %800 = vector.broadcast %758 : vector<1x1x32xf32> to vector<2x6x32xf32>
    %801 = arith.mulf %799, %800 : vector<2x6x32xf32>
    %802 = arith.addf %798, %801 : vector<2x6x32xf32>
    %803 = vector.extract_strided_slice %791 {offsets = [0, 18, 0], sizes = [2, 6, 32], strides = [1, 1, 1]} : vector<2x24x32xf32> to vector<2x6x32xf32>
    %804 = vector.broadcast %765 : vector<1x1x32xf32> to vector<2x6x32xf32>
    %805 = arith.mulf %803, %804 : vector<2x6x32xf32>
    %806 = arith.addf %802, %805 : vector<2x6x32xf32>
    %c2_278 = arith.constant 2 : index
    %c0_279 = arith.constant 0 : index
    %c0_280 = arith.constant 0 : index
    %807 = vector.load %arg15[%c2_278, %c0_279, %c0_280] : memref<3x32x32xf32, #tpu.memory_space<vmem>>, vector<1x32x32xf32>
    %808 = vector.shape_cast %807 : vector<1x32x32xf32> to vector<32x32xf32>
    %809 = vector.shape_cast %806 : vector<2x6x32xf32> to vector<12x32xf32>
    %cst_281 = arith.constant dense<0.000000e+00> : vector<12x32xf32>
    %810 = tpu.matmul %809, %808, %cst_281 {dimension_numbers = #tpu.dot_dimension_numbers<[1], [0], [0], [1], [0, 0, 1, 1], [], []>} : vector<12x32xf32>, vector<32x32xf32>, vector<12x32xf32> -> vector<12x32xf32>
    %811 = vector.shape_cast %810 : vector<12x32xf32> to vector<2x6x32xf32>
    %c2_282 = arith.constant 2 : index
    %c0_283 = arith.constant 0 : index
    %c0_284 = arith.constant 0 : index
    %c0_285 = arith.constant 0 : index
    %812 = vector.load %arg16[%c2_282, %c0_283, %c0_284, %c0_285] : memref<3x1x1x32xf32, #tpu.memory_space<vmem>>, vector<1x1x1x32xf32>
    %813 = vector.shape_cast %812 : vector<1x1x1x32xf32> to vector<1x1x32xf32>
    %814 = vector.broadcast %813 : vector<1x1x32xf32> to vector<2x6x32xf32>
    %815 = arith.addf %811, %814 : vector<2x6x32xf32>
    %816 = arith.addf %815, %719 : vector<2x6x32xf32>
    %c2_286 = arith.constant 2 : index
    %c0_287 = arith.constant 0 : index
    %c0_288 = arith.constant 0 : index
    %c0_289 = arith.constant 0 : index
    %817 = vector.load %arg17[%c2_286, %c0_287, %c0_288, %c0_289] : memref<3x1x1x32xf32, #tpu.memory_space<vmem>>, vector<1x1x1x32xf32>
    %818 = vector.shape_cast %817 : vector<1x1x1x32xf32> to vector<1x1x32xf32>
    %c2_290 = arith.constant 2 : index
    %c0_291 = arith.constant 0 : index
    %c0_292 = arith.constant 0 : index
    %c0_293 = arith.constant 0 : index
    %819 = vector.load %arg18[%c2_290, %c0_291, %c0_292, %c0_293] : memref<3x1x1x32xf32, #tpu.memory_space<vmem>>, vector<1x1x1x32xf32>
    %820 = vector.shape_cast %819 : vector<1x1x1x32xf32> to vector<1x1x32xf32>
    %cst_294 = arith.constant dense<0.000000e+00> : vector<2x6xf32>
    %821 = vector.multi_reduction <add>, %816, %cst_294 [2] : vector<2x6x32xf32> to vector<2x6xf32>
    %822 = vector.shape_cast %821 : vector<2x6xf32> to vector<2x6x1xf32>
    %cst_295 = arith.constant 3.200000e+01 : f32
    %823 = vector.broadcast %cst_295 : f32 to vector<2x6x1xf32>
    %824 = arith.divf %822, %823 : vector<2x6x1xf32>
    %825 = vector.broadcast %824 : vector<2x6x1xf32> to vector<2x6x32xf32>
    %826 = arith.subf %816, %825 : vector<2x6x32xf32>
    %827 = arith.mulf %826, %826 : vector<2x6x32xf32>
    %cst_296 = arith.constant dense<0.000000e+00> : vector<2x6xf32>
    %828 = vector.multi_reduction <add>, %827, %cst_296 [2] : vector<2x6x32xf32> to vector<2x6xf32>
    %829 = vector.shape_cast %828 : vector<2x6xf32> to vector<2x6x1xf32>
    %cst_297 = arith.constant 3.200000e+01 : f32
    %830 = vector.broadcast %cst_297 : f32 to vector<2x6x1xf32>
    %831 = arith.divf %829, %830 : vector<2x6x1xf32>
    %832 = vector.broadcast %824 : vector<2x6x1xf32> to vector<2x6x32xf32>
    %833 = arith.subf %816, %832 : vector<2x6x32xf32>
    %cst_298 = arith.constant 9.99999996E-13 : f32
    %834 = vector.broadcast %cst_298 : f32 to vector<2x6x1xf32>
    %835 = arith.addf %831, %834 : vector<2x6x1xf32>
    %836 = math.rsqrt %835 : vector<2x6x1xf32>
    %837 = vector.broadcast %836 : vector<2x6x1xf32> to vector<2x6x32xf32>
    %838 = arith.mulf %833, %837 : vector<2x6x32xf32>
    %839 = vector.broadcast %818 : vector<1x1x32xf32> to vector<2x6x32xf32>
    %840 = arith.mulf %838, %839 : vector<2x6x32xf32>
    %841 = vector.broadcast %820 : vector<1x1x32xf32> to vector<2x6x32xf32>
    %842 = arith.addf %840, %841 : vector<2x6x32xf32>
    "tpu.trace_start"() <{level = 10 : i32, message = "bqt,bth->bqh"}> : () -> ()
    %cst_299 = arith.constant dense<0.000000e+00> : vector<2x1x32xf32>
    %843 = tpu.matmul %720, %842, %cst_299 {dimension_numbers = #tpu.dot_dimension_numbers<[2], [1], [1], [2], [0, 0, 0, 1, 1, 2], [0], [0]>} : vector<2x1x6xf32>, vector<2x6x32xf32>, vector<2x1x32xf32> -> vector<2x1x32xf32>
    "tpu.trace_stop"() : () -> ()
    %cst_300 = arith.constant dense<0.000000e+00> : vector<2x1xf32>
    %844 = vector.multi_reduction <add>, %720, %cst_300 [2] : vector<2x1x6xf32> to vector<2x1xf32>
    %845 = vector.shape_cast %844 : vector<2x1xf32> to vector<2x1x1xf32>
    %cst_301 = arith.constant 9.99999971E-10 : f32
    %846 = vector.broadcast %cst_301 : f32 to vector<2x1x1xf32>
    %847 = arith.maximumf %845, %846 : vector<2x1x1xf32>
    %848 = vector.broadcast %847 : vector<2x1x1xf32> to vector<2x1x32xf32>
    %849 = arith.divf %843, %848 : vector<2x1x32xf32>
    %cst_302 = arith.constant dense<0.000000e+00> : vector<2x32xf32>
    %850 = vector.multi_reduction <add>, %849, %cst_302 [1] : vector<2x1x32xf32> to vector<2x32xf32>
    %851 = tpu.concatenate %10, %188, %497, %850 in 1 : vector<2x32xf32>, vector<2x32xf32>, vector<2x32xf32>, vector<2x32xf32> -> vector<2x128xf32>
    %c0_303 = arith.constant 0 : index
    %c0_304 = arith.constant 0 : index
    %852 = vector.load %arg24[%c0_303, %c0_304] : memref<128x1xf32, #tpu.memory_space<vmem>>, vector<128x1xf32>
    %cst_305 = arith.constant dense<0.000000e+00> : vector<2x1xf32>
    %853 = tpu.matmul %851, %852, %cst_305 {dimension_numbers = #tpu.dot_dimension_numbers<[1], [0], [0], [1], [0, 0, 1, 1], [], []>} : vector<2x128xf32>, vector<128x1xf32>, vector<2x1xf32> -> vector<2x1xf32>
    %c0_306 = arith.constant 0 : index
    %c0_307 = arith.constant 0 : index
    %854 = vector.load %arg25[%c0_306, %c0_307] : memref<1x1xf32, #tpu.memory_space<vmem>>, vector<1x1xf32>
    %855 = vector.broadcast %854 : vector<1x1xf32> to vector<2x1xf32>
    %856 = arith.addf %853, %855 : vector<2x1xf32>
    %c0_308 = arith.constant 0 : index
    %c0_309 = arith.constant 0 : index
    %857 = vector.load %arg26[%c0_308, %c0_309] : memref<2x1xf32, #tpu.memory_space<vmem>>, vector<2x1xf32>
    tpu.vector_store %arg26[%c0_308, %c0_309], %856 {strides = array<i32>} : memref<2x1xf32, #tpu.memory_space<vmem>>, vector<2x1xf32>,
    return
  }
}

</mosaic_0001>

<bundles_post_ra>
// kernel: multiscale_head_forward.1
= control target key start
LH: loop header
LB: loop body
LE: loop exit
PB: predicated region body
PF: predicated region fallthrough
CT: control target
= control target key end

     0   :  { %s9999_s0 = inlined_call_operand.vmem [shape: f32[4], index: 0, kind: input, shape index: {}]   ;;  %s10000_s1 = inlined_call_operand.vmem [shape: f32[4,2,16,32], index: 1, kind: input, shape index: {}]   ;;  %s10001_s2 = inlined_call_operand.vmem [shape: f32[2,1,16], index: 2, kind: input, shape index: {}]   ;;  %s10002_s3 = inlined_call_operand.vmem [shape: s32[2,4,1], index: 3, kind: input, shape index: {}]   ;;  %s10003_s4 = inlined_call_operand.vmem [shape: s32[2,4,1], index: 4, kind: input, shape index: {}]   ;;  %s10004_s5 = inlined_call_operand.vmem [shape: f32[2,1,4], index: 5, kind: input, shape index: {}]   ;;  %s10005_s6 = inlined_call_operand.vmem [shape: s32[2,6,1], index: 6, kind: input, shape index: {}]   ;;  %s10006_s7 = inlined_call_operand.vmem [shape: s32[2,6,1], index: 7, kind: input, shape index: {}]   ;;  %s10007_s8 = inlined_call_operand.vmem [shape: f32[2,1,6], index: 8, kind: input, shape index: {}]   ;;  %s10008_s9 = inlined_call_operand.vmem [shape: f32[32,32], index: 9, kind: input, shape index: {}]   ;;  %s10009_s10 = inlined_call_operand.vmem [shape: f32[1,32], index: 10, kind: input, shape index: {}]   ;;  %s10010_s11 = inlined_call_operand.vmem [shape: f32[1,1,32], index: 11, kind: input, shape index: {}]   ;;  %s10011_s12 = inlined_call_operand.vmem [shape: f32[1,1,32], index: 12, kind: input, shape index: {}]   ;;  %s10012_s13 = inlined_call_operand.vmem [shape: f32[3,32,96], index: 13, kind: input, shape index: {}]   ;;  %s10013_s14 = inlined_call_operand.vmem [shape: f32[3,1,1,96], index: 14, kind: input, shape index: {}]   ;;  %s10014_s15 = inlined_call_operand.vmem [shape: f32[3,32,32], index: 15, kind: input, shape index: {}]   ;;  %s10015_s16 = inlined_call_operand.vmem [shape: f32[3,1,1,32], index: 16, kind: input, shape index: {}]   ;;  %s10016_s17 = inlined_call_operand.vmem [shape: f32[3,1,1,32], index: 17, kind: input, shape index: {}]   ;;  %s10017_s18 = inlined_call_operand.vmem [shape: f32[3,1,1,32], index: 18, kind: input, shape index: {}]   ;;  %s10018_s19 = inlined_call_operand.vmem [shape: f32[2,1,1,32], index: 19, kind: input, shape index: {}]   ;;  %s10019_s20 = inlined_call_operand.vmem [shape: f32[2,1,1,32], index: 20, kind: input, shape index: {}]   ;;  %s10020_s21 = inlined_call_operand.vmem [shape: f32[2,32,128], index: 21, kind: input, shape index: {}]   ;;  %s10021_s22 = inlined_call_operand.vmem [shape: f32[2,1,1,128], index: 22, kind: input, shape index: {}]   ;;  %s10022_s23 = inlined_call_operand.vmem [shape: f32[2,32,128], index: 23, kind: input, shape index: {}]   ;;  %s10023_s24 = inlined_call_operand.vmem [shape: f32[128,1], index: 24, kind: input, shape index: {}]   ;;  %s10024_s25 = inlined_call_operand.<no memory space> [shape: f32[1,1], index: 25, kind: input, shape index: {}]   ;;  %s10025_s26 = inlined_call_operand.vmem [shape: f32[2,1], index: 26, kind: output, shape index: {}]  }
   0x1   :  { %10035 = sst [smem:[#allocation6_spill]] %s9999_s0  ;;  %v31_v0 = vstv %s10024_s25 }
   0x2   :  { %10036 = sst [smem:[#allocation7_spill]] %s10000_s1  ;;  %32 = vst [vmem:[#allocation2] sm:$0x1] %v31_v0 }
   0x3   :  { %10037 = sst [smem:[#allocation8_spill]] %s10001_s2 }
   0x4   :  { %10038 = sst [smem:[#allocation9_spill]] %s10002_s3 }
   0x5   :  { %10039 = sst [smem:[#allocation10_spill]] %s10003_s4 }
   0x6   :  { %10040 = sst [smem:[#allocation11_spill]] %s10004_s5 }
   0x7   :  { %10041 = sst [smem:[#allocation12_spill]] %s10005_s6 }
   0x8   :  { %10042 = sst [smem:[#allocation13_spill]] %s10006_s7 }
   0x9   :  { %10043 = sst [smem:[#allocation14_spill]] %s10007_s8 }
   0xa   :  { %10044 = sst [smem:[#allocation15_spill]] %s10008_s9 }
   0xb   :  { %10045 = sst [smem:[#allocation16_spill]] %s10009_s10 }
   0xc   :  { %33 = vsyncpa [#allocation4], 0  ;;  %s10046_s8 = sld [smem:[#allocation6_spill]] }
  0x12   :  { %s40_s4 = sshll.u32 %s10046_s8, 4  ;;  %s41_s4 = int_to_ptr.vmem [resolvable:$true] %s40_s4 }
  0x13   :  { %s8215_s29 = scalar_lea.vmem %s41_s4, 16  ;;  %p8220_p1 = scmp.lt.s32.totalorder %s41_s4, %s41_s4 }
  0x14   :  { %p8216_p0 = scmp.ne.s32.totalorder %s41_s4, %s8215_s29  ;;  %p8221_p2 = scmp.lt.s32.totalorder %s8215_s29, %s8215_s29 }
  0x16   :  { %p8222_p3 = por %p8221_p2, %p8220_p1 }
  0x18   :  { %p8223_p4 = pnand %p8222_p3, %p8216_p0 }
  0x1a   :  { %8226 = shalt.err (!%p8223_p4)
}
  0x1b   :  { %s8229_s0 = smov [#allocation3]  }
  0x1c   :  { %43 = dma.vmem_to_smem %s41_s4, 16, %s8229_s0, [#allocation4]  }
  0x1d   :  { %8227 = dma.done.wait [#allocation4], 16  }
  0x1e   :  { %8228 = vsyncadd [#allocation4], 4294967280 }
  0x1f   :  { %97 = sfence }
  0x20   :  { %s195_s25 = sld [smem:[#allocation3]]  ;;  %s6818_s9 = sld [smem:[#allocation3 + $0x1]]  ;;  %vm121_vm0 = vcmask 261120   ;;  %vm8231_vm1 = vmmov 0   ;;  %vm119_vm2 = vcmask 1041409   ;;  %vm798_vm14 = vcmask 130048  }
  0x21   :  { %s6823_s30 = sld [smem:[#allocation3 + $0x2]]  ;;  %s6828_s2 = sld [smem:[#allocation3 + $0x3]]  ;;  %vm8525_vm4 = vmpackc.low %vm121_vm0, %vm121_vm0 }
  0x22   :  { %s10047_s6 = sld [smem:[#allocation7_spill]]  ;;  %s8233_s29 = smov 96  }
  0x23   :  { %s10051_s10 = sld [smem:[#allocation8_spill]]  ;;  %s8234_s1 = smov 64  }
  0x24   :  { %s10052_s5 = sld [smem:[#allocation9_spill]]  ;;  %s10053_s27 = sld [smem:[#allocation10_spill]] }
  0x25   :  { %s10057_s3 = sld [smem:[#allocation12_spill]]  ;;  %s10058_s28 = sld [smem:[#allocation13_spill]] }
  0x26   :  { %v200_v7 = vstv %s195_s25  ;;  %v211_v12 = vstv %s6818_s9  ;;  %s10060_s7 = sld [smem:[#allocation16_spill]] }
  0x27   :  { %v226_v13 = vstv %s6823_s30  ;;  %v236_v19 = vstv %s6828_s2  ;;  %s10048_s30 = sld [smem:[#allocation15_spill]]  ;;  %s8236_s2 = smov 32  }
  0x28   :  { %v8385_v1 = vld [vmem:[%s10047_s6 + $0x60] sm:$0xff]  ;;  %v198_v3 = vld [vmem:[%s10047_s6 + $0x10] sm:$0xff]  ;;  %v197_v10 = vld [vmem:[%s10047_s6 + $0x8] sm:$0xff] }
  0x29   :  { %v196_v2 = vld [vmem:[%s10047_s6] sm:$0xff]  ;;  %v6821_v6 = vld [vmem:[%s10047_s6 + $0x30] sm:$0xff]  ;;  %v203_v14 = vmul.f32 %v200_v7, %v198_v3  ;;  %v6820_v15 = vld [vmem:[%s10047_s6 + $0x28] sm:$0xff]  ;;  %v237_v24 = vmul.f32 %v8385_v1, %v236_v19  ;;  %v202_v28 = vmul.f32 %v200_v7, %v197_v10 }
  0x2a   :  { %v6819_v4 = vld [vmem:[%s10047_s6 + $0x20] sm:$0xff]  ;;  %v8405_v8 = vld [vmem:[%s10047_s6 + $0x70] sm:$0xff]  ;;  %v201_v11 = vmul.f32 %v200_v7, %v196_v2  ;;  %v6825_v16 = vld [vmem:[%s10047_s6 + $0x48] sm:$0xff]  ;;  %v214_v20 = vmul.f32 %v6821_v6, %v211_v12  ;;  %v213_v31 = vmul.f32 %v6820_v15, %v211_v12 }
  0x2b   :  { %v6824_v5 = vld [vmem:[%s10047_s6 + $0x40] sm:$0xff]  ;;  %v6826_v9 = vld [vmem:[%s10047_s6 + $0x50] sm:$0xff]  ;;  %v212_v17 = vmul.f32 %v6819_v4, %v211_v12  ;;  %v199_v21 = vld [vmem:[%s10047_s6 + $0x18] sm:$0xff]  ;;  %v239_v26 = vmul.f32 %v8405_v8, %v236_v19  ;;  %v228_v32 = vmul.f32 %v6825_v16, %v226_v13 }
  0x2c   :  { %v227_v18 = vmul.f32 %v6824_v5, %v226_v13  ;;  %v6822_v22 = vld [vmem:[%s10047_s6 + $0x38] sm:$0xff]  ;;  %v229_v25 = vmul.f32 %v6826_v9, %v226_v13  ;;  %v6813_v27 = vld [vmem:[%s10047_s6 + $0x68] sm:$0xff]  ;;  %v218_v30 = vadd.f32 %v214_v20, %v203_v14  ;;  %v204_v34 = vmul.f32 %v200_v7, %v199_v21 }
  0x2d   :  { %v6827_v23 = vld [vmem:[%s10047_s6 + $0x58] sm:$0xff]  ;;  %v216_v29 = vadd.f32 %v212_v17, %v201_v11  ;;  %v215_v35 = vmul.f32 %v6822_v22, %v211_v12  ;;  %v217_v39 = vadd.f32 %v213_v31, %v202_v28  ;;  %v238_v40 = vmul.f32 %v6813_v27, %v236_v19  ;;  %v326_v11 = vld [vmem:[%s10012_s13] sm:$0xff]  ;;  %v327_v12 = vld [vmem:[%s10012_s13 + $0x8] sm:$0xff] }
  0x2e   :  { %v6815_v33 = vld [vmem:[%s10047_s6 + $0x78] sm:$0xff]  ;;  %v230_v36 = vmul.f32 %v6827_v23, %v226_v13  ;;  %v233_v38 = vadd.f32 %v229_v25, %v218_v30  ;;  %v328_v13 = vld [vmem:[%s10012_s13 + $0x10] sm:$0xff]  ;;  %v7681_v14 = vpack.c.bf16 %v327_v12, %v326_v11  ;;  %v105_v17 = vld [vmem:[%s10048_s30] sm:$0xff] }
  0x2f   :  { %v231_v37 = vadd.f32 %v227_v18, %v216_v29  ;;  %v219_v41 = vadd.f32 %v215_v35, %v204_v34  ;;  %v240_v42 = vmul.f32 %v6815_v33, %v236_v19  ;;  %v232_v45 = vadd.f32 %v228_v32, %v217_v39  ;;  %v329_v15 = vld [vmem:[%s10012_s13 + $0x18] sm:$0xff]  ;;  %v106_v18 = vld [vmem:[%s10048_s30 + $0x8] sm:$0xff]  ;;  %v6829_v34 = vld [vmem:[%s10010_s11] ss:$0 sm:$0xff] }
  0x30   :  { %v243_v44 = vadd.f32 %v239_v26, %v233_v38  ;;  %v7685_v16 = vpack.c.bf16 %v329_v15, %v328_v13  ;;  %7682 = vmatprep.subr.bf16.mxu1 %v7681_v14  ;;  %v8230_v19 = vmov 0.0|0.0   ;;  %v7676_v20 = vpack.c.bf16 %v106_v18, %v105_v17 }
  0x31   :  { %v241_v43 = vadd.f32 %v237_v24, %v231_v37  ;;  %v234_v46 = vadd.f32 %v230_v36, %v219_v41  ;;  %v242_v49 = vadd.f32 %v238_v40, %v232_v45  ;;  %7684 = vmatpush3.bf16.msra.mxu1 %v7681_v14  ;;  %7675 = vmatprep.subr.bf16.mxu0 %v8230_v19  ;;  %v6830_v36 = vld [vmem:[%s10011_s12] ss:$0 sm:$0xff] }
  0x32   :  { %v253_v48 = vsel %vm121_vm0, %v243_v44, 0.0  ;;  %7686 = vmatprep.subr.bf16.mxu1 %v7685_v16  ;;  %7677 = vmatpush3.bf16.msra.mxu0 %v7676_v20 }
  0x33   :  { %v247_v47 = vsel %vm121_vm0, %v241_v43, 0.0  ;;  %254 = vadd.xlane.f32.xlu1 %v253_v48  ;;  %v244_v50 = vadd.f32 %v240_v42, %v234_v46  ;;  %v250_v51 = vsel %vm121_vm0, %v242_v49, 0.0  ;;  %7678 = vmatprep.subr.bf16.mxu0 %v8230_v19 }
  0x34   :  { %248 = vadd.xlane.f32.xlu0 %v247_v47 }
  0x35   :  { %v256_v52 = vsel %vm121_vm0, %v244_v50, 0.0  ;;  %7688 = vmatpush3.bf16.msra.mxu1 %v7685_v16 }
  0x37   :  { %257 = vadd.xlane.f32.xlu1 %v256_v52  ;;  %v108_v52 = vld [vmem:[%s10048_s30 + $0x18] sm:$0xff] }
  0x38   :  { %251 = vadd.xlane.f32.xlu0 %v250_v51  ;;  %v107_v51 = vld [vmem:[%s10048_s30 + $0x10] sm:$0xff]  ;;  %s10056_s30 = sld [smem:[#allocation11_spill]] }
  0xc0   :  { %v255_v54 = vpop.xlane.xlu1 %254 }
  0xc1   :  { %v249_v53 = vpop.xlane.xlu0 %248  ;;  %v262_v56 = vmul.f32 0.03125, %v255_v54  ;;  %v7679_v54 = vpack.c.bf16 %v108_v52, %v107_v51 }
  0xc2   :  { %v260_v55 = vmul.f32 0.03125, %v249_v53  ;;  %v118_v53 = vrot.slane %v8405_v8, 7  ;;  %v6835_v8 = vld [vmem:[%s10013_s14] ss:$0 sm:$0xff] }
  0xc3   :  { %v266_v58 = vsub.f32 %v243_v44, %v262_v56  ;;  %7680 = vmatpush3.bf16.msra.mxu0 %v7679_v54 }
  0xc4   :  { %v264_v57 = vsub.f32 %v241_v43, %v260_v55  ;;  %v258_v60 = vpop.xlane.xlu1 %257  ;;  %v8232_v55 = vmov 0.0   ;;  %v120_v56 = vsel %vm119_vm2, %v118_v53, %v8385_v1 }
  0xc5   :  { %v252_v59 = vpop.xlane.xlu0 %251  ;;  %v263_v62 = vmul.f32 0.03125, %v258_v60  ;;  %v270_v0 = vmul.f32 %v266_v58, %v266_v58  ;;  %7243 = vmatprep.mubr.msk.f32.mxu0 %vm8231_vm1, %v8232_v55 }
  0xc6   :  { %v261_v61 = vmul.f32 0.03125, %v252_v59  ;;  %v268_v63 = vmul.f32 %v264_v57, %v264_v57  ;;  %7244 = vmatmul.mubr.msk.f32.vlgmr.msra.gmra.mrb[0].mxu0 %vm121_vm0, %v120_v56  ;;  %v8608_v56 = vld [vmem:[%s10051_s10 + $0x1] sm:$0x1] }
  0xc7   :  { %v267_v3 = vsub.f32 %v244_v50, %v263_v62  ;;  %v278_v5 = vsel %vm121_vm0, %v270_v0, 0.0 }
  0xc8   :  { %v265_v2 = vsub.f32 %v242_v49, %v261_v61  ;;  %v272_v4 = vsel %vm121_vm0, %v268_v63, 0.0 }
  0xc9   :  { %273 = vadd.xlane.f32.xlu0 %v272_v4  ;;  %v271_v7 = vmul.f32 %v267_v3, %v267_v3 }
  0xca   :  { %v269_v6 = vmul.f32 %v265_v2, %v265_v2 }
  0xcb   :  { %v281_v10 = vsel %vm121_vm0, %v271_v7, 0.0 }
  0xcc   :  { %v275_v9 = vsel %vm121_vm0, %v269_v6, 0.0 }
  0xcd   :  { %279 = vadd.xlane.f32.xlu0 %v278_v5  ;;  %276 = vadd.xlane.f32.xlu1 %v275_v9 }
  0xd1   :  { %282 = vadd.xlane.f32.xlu1 %v281_v10 }
 0x156   :  { %v274_v21 = vpop.xlane.xlu0 %273 }
 0x157   :  { %v284_v22 = vmul.f32 0.03125, %v274_v21 }
 0x159   :  { %v288_v23 = vadd.f32 1e-07, %v284_v22 }
 0x15a   :  { %v277_v24 = vpop.xlane.xlu1 %276  ;;  %v280_v25 = vpop.xlane.xlu0 %279 }
 0x15b   :  { %7895 = vrsqrt.f32 %v288_v23  ;;  %v285_v26 = vmul.f32 0.03125, %v277_v24  ;;  %v286_v27 = vmul.f32 0.03125, %v280_v25 }
 0x15d   :  { %v289_v28 = vadd.f32 1e-07, %v285_v26  ;;  %v290_v29 = vadd.f32 1e-07, %v286_v27 }
 0x15e   :  { %v283_v30 = vpop.xlane.xlu1 %282 }
 0x15f   :  { %7897 = vrsqrt.f32 %v289_v28  ;;  %v287_v31 = vmul.f32 0.03125, %v283_v30 }
 0x160   :  { %7899 = vrsqrt.f32 %v290_v29 }
 0x161   :  { %v291_v32 = vadd.f32 1e-07, %v287_v31 }
 0x163   :  { %7901 = vrsqrt.f32 %v291_v32 }
 0x165   :  { %v7896_v33 = vpop.eup %7895 }
 0x166   :  { %v296_v35 = vmul.f32 %v7896_v33, %v264_v57  ;;  %v438_v57 = vlaneseq }
 0x168   :  { %v306_v37 = vmul.f32 %v6829_v34, %v296_v35 }
 0x169   :  { %v7898_v38 = vpop.eup %7897 }
 0x16a   :  { %v7900_v39 = vpop.eup %7899  ;;  %v8470_v40 = vadd.f32 %v6830_v36, %v306_v37  ;;  %v297_v41 = vmul.f32 %v7898_v38, %v265_v2  ;;  %v8591_v38 = vld [vmem:[%s10051_s10] sm:$0x1] }
 0x16b   :  { %v298_v42 = vmul.f32 %v7900_v39, %v266_v58  ;;  %v8499_v58 = vand.u32 127, %v438_v57  ;;  %v322_v39 = vsub.f32 1.0, %v8591_v38 }
 0x16c   :  { %7254 = vmatprep.mubr.msk.f32.mxu1 %vm121_vm0, %v8470_v40  ;;  %v307_v43 = vmul.f32 %v6829_v34, %v297_v41  ;;  %v8595_v41 = vshrl.u32 %v438_v57, 7 }
 0x16d   :  { %v7902_v44 = vpop.eup %7901  ;;  %v308_v45 = vmul.f32 %v6829_v34, %v298_v42  ;;  %vm441_vm3 = vcmp.lt.s32.totalorder %v8499_v58, 8  ;;  %vm445_vm5 = vcmp.ge.s32.totalorder %v8499_v58, 8  ;;  %vm446_vm6 = vcmp.lt.s32.totalorder %v8499_v58, 16 }
 0x16e   :  { %v8474_v46 = vadd.f32 %v6830_v36, %v307_v43  ;;  %v299_v47 = vmul.f32 %v7902_v44, %v267_v3  ;;  %v8506_v62 = vsel %vm441_vm3, 1.0, %v8232_v55  ;;  %vm447_vm7 = vmand %vm445_vm5, %vm446_vm6  ;;  %vm450_vm8 = vcmp.ge.s32.totalorder %v8499_v58, 16 }
 0x16f   :  { %v8476_v48 = vadd.f32 %v6830_v36, %v308_v45  ;;  %vm451_vm9 = vcmp.lt.s32.totalorder %v8499_v58, 24  ;;  %v8542_v20 = vsel %vm447_vm7, 1.0, %v8232_v55  ;;  %vm455_vm11 = vcmp.ge.s32.totalorder %v8499_v58, 24 }
 0x170   :  { %7255 = vmatmul.mubr.msk.f32.vlgmr.msra.gmra.mrb[0].mxu1 %vm121_vm0, %v8474_v46  ;;  %v309_v49 = vmul.f32 %v6829_v34, %v299_v47  ;;  %vm452_vm10 = vmand %vm450_vm8, %vm451_vm9  ;;  %vm456_vm12 = vcmp.lt.s32.totalorder %v8499_v58, 32  ;;  %v324_v42 = vmul.f32 -10000.0, %v322_v39  ;;  %v8598_v43 = vsub.s32 0, %v8595_v41 }
 0x171   :  { %7257 = vmatprep.mubr.msk.f32.mxu1 %vm121_vm0, %v8476_v48  ;;  %v8550_v23 = vsel %vm452_vm10, 1.0, %v8232_v55  ;;  %vm457_vm13 = vmand %vm455_vm11, %vm456_vm12  ;;  %vm1820_vm9 = vcmask 257024   ;;  %vm2013_vm10 = vcmask 1040384   ;;  %vm2016_vm11 = vcmask 1041408  }
 0x172   :  { %v8482_v50 = vadd.f32 %v6830_v36, %v309_v49  ;;  %v8559_v26 = vsel %vm457_vm13, 1.0, %v8232_v55  ;;  %v775_v44 = vrot.slane %v324_v42, %v8598_v43  ;;  %vm2019_vm12 = vcmask 1042432  }
 0x174   :  { %7258 = vmatmul.mubr.msk.f32.gmra.mrb[2].mxu1 %vm121_vm0, %v8482_v50 }
 0x199   :  { %v8521_v7 = vpop.f32.mrb[0].mxu0 }
 0x19a   :  { %v7245_v9 = vpop.f32.mrb[1].mxu0 }
 0x243   :  { %v7256_v59 = vpop.f32.mrb[0].mxu1 }
 0x244   :  { %v435_v60 = vadd.f32 %v7256_v59, %v6835_v8  ;;  %v408_v61 = vpop.f32.mrb[1].mxu1 }
 0x245   :  { %v434_v63 = vadd.f32 %v6835_v8, %v408_v61 }
 0x246   :  { %v461_v21 = vmul.f32 %v8506_v62, %v435_v60  ;;  %v465_v24 = vmul.f32 %v8542_v20, %v435_v60  ;;  %v469_v27 = vmul.f32 %v8550_v23, %v435_v60  ;;  %v473_v29 = vmul.f32 %v8559_v26, %v435_v60 }
 0x247   :  { %v7259_v1 = vpop.f32.mrb[2].mxu1  ;;  %v8508_v0 = vpack.i.bf16 %v435_v60, %v434_v63  ;;  %v460_v2 = vmul.f32 %v8506_v62, %v434_v63  ;;  %v464_v22 = vmul.f32 %v8542_v20, %v434_v63  ;;  %v468_v25 = vmul.f32 %v8550_v23, %v434_v63 }
 0x248   :  { %v8511_v3 = vadd.f32 %v7259_v1, %v6835_v8  ;;  %v418_v4 = vpop.f32.mrb[3].mxu1  ;;  %v472_v28 = vmul.f32 %v8559_v26, %v434_v63  ;;  %v323_v1 = vsub.f32 1.0, %v8608_v56 }
 0x249   :  { %v436_v5 = vadd.f32 %v6835_v8, %v418_v4  ;;  %7874 = vrot.lane.b32.xlu0 %v8508_v0, %s8233_s29  ;;  %7264 = vmatprep.mubr.msk.f32.mxu0 %vm121_vm0, %v460_v2 }
 0x24a   :  { %v463_v31 = vmul.f32 %v8506_v62, %v8511_v3  ;;  %v467_v33 = vmul.f32 %v8542_v20, %v8511_v3  ;;  %v471_v35 = vmul.f32 %v8550_v23, %v8511_v3  ;;  %v475_v37 = vmul.f32 %v8559_v26, %v8511_v3 }
 0x24b   :  { %v8517_v6 = vpack.i.bf16 %v8511_v3, %v436_v5  ;;  %v462_v30 = vmul.f32 %v8506_v62, %v436_v5  ;;  %v466_v32 = vmul.f32 %v8542_v20, %v436_v5  ;;  %v470_v34 = vmul.f32 %v8550_v23, %v436_v5 }
 0x24c   :  { %v474_v36 = vmul.f32 %v8559_v26, %v436_v5 }
 0x24d   :  { %7879 = vrot.lane.b32.xlu1 %v8517_v6, %s8233_s29 }
 0x2bb   :  { %v7875_v10 = vpop.permute.xlu0 %7874 }
 0x2bc   :  { %v7877_v11 = vunpack.i.h.bf16 %v7875_v10  ;;  %v7876_v12 = vunpack.i.l.bf16 %v7875_v10  ;;  %v325_v10 = vmul.f32 -10000.0, %v323_v1 }
 0x2be   :  { %v7689_v14 = vpack.c.bf16 %v7877_v11, %v7876_v12 }
 0x2bf   :  { %v7880_v15 = vpop.permute.xlu1 %7879 }
 0x2c0   :  { %v7882_v16 = vunpack.i.h.bf16 %v7880_v15  ;;  %v7881_v17 = vunpack.i.l.bf16 %v7880_v15  ;;  %7691 = vmatprep.subr.msk.bf16.mxu0 %vm8525_vm4, %v7689_v14 }
 0x2c1   :  { %7694 = vmatpush3.bf16.xpose.msk.msra.mxu0 %vm8525_vm4, %v7689_v14 }
 0x2c2   :  { %v7695_v18 = vpack.c.bf16 %v7882_v16, %v7881_v17  ;;  %v779_v16 = vrot.slane %v325_v10, %v8598_v43 }
 0x2c4   :  { %7697 = vmatprep.subr.msk.bf16.mxu0 %vm8525_vm4, %v7695_v18 }
 0x2c8   :  { %7265 = vmatmul.mubr.msk.f32.vlgmr.msra.gmra.mrb[2].mxu0 %vm121_vm0, %v461_v21 }
 0x2c9   :  { %7267 = vmatprep.mubr.msk.f32.mxu0 %vm121_vm0, %v464_v22  ;;  %7700 = vmatpush3.bf16.xpose.msk.msra.mxu0 %vm8525_vm4, %v7695_v18 }
 0x2cc   :  { %7268 = vmatmul.mubr.msk.f32.gmra.mrb[4].mxu0 %vm121_vm0, %v465_v24 }
 0x2cd   :  { %7270 = vmatprep.mubr.msk.f32.mxu0 %vm121_vm0, %v468_v25 }
 0x2d0   :  { %7271 = vmatmul.mubr.msk.f32.gmra.mrb[6].mxu0 %vm121_vm0, %v469_v27 }
 0x2d1   :  { %7273 = vmatprep.mubr.msk.f32.mxu0 %vm121_vm0, %v472_v28 }
 0x2d4   :  { %7274 = vmatmul.mubr.msk.f32.gmra.mrb[8].mxu0 %vm121_vm0, %v473_v29 }
 0x2d5   :  { %7280 = vmatprep.mubr.msk.f32.mxu0 %vm121_vm0, %v462_v30 }
 0x2d8   :  { %7281 = vmatmul.mubr.msk.f32.vlgmr.msra.gmra.mrb[10].mxu0 %vm121_vm0, %v463_v31 }
 0x2d9   :  { %7283 = vmatprep.mubr.msk.f32.mxu0 %vm121_vm0, %v466_v32 }
 0x2dc   :  { %7284 = vmatmul.mubr.msk.f32.gmra.mrb[12].mxu0 %vm121_vm0, %v467_v33 }
 0x2dd   :  { %7286 = vmatprep.mubr.msk.f32.mxu0 %vm121_vm0, %v470_v34 }
 0x2e0   :  { %7287 = vmatmul.mubr.msk.f32.gmra.mrb[14].mxu0 %vm121_vm0, %v471_v35 }
 0x2e1   :  { %7289 = vmatprep.mubr.msk.f32.mxu0 %vm121_vm0, %v474_v36 }
 0x2e4   :  { %7290 = vmatmul.mubr.msk.f32.gmra.mrb[16].mxu0 %vm121_vm0, %v475_v37 }
 0x39b   :  { %v7266_v45 = vpop.f32.mrb[2].mxu0 }
 0x39c   :  { %v755_v47 = vmul.f32 0.35355338, %v7266_v45  ;;  %v576_v49 = vpop.f32.mrb[3].mxu0 }
 0x39d   :  { %v754_v51 = vmul.f32 0.35355338, %v576_v49 }
 0x39e   :  { %v8601_v52 = vadd.f32 %v775_v44, %v755_v47 }
 0x39f   :  { %v7269_v53 = vpop.f32.mrb[4].mxu0  ;;  %v8603_v54 = vadd.f32 %v775_v44, %v754_v51 }
 0x3a0   :  { %v757_v57 = vmul.f32 0.35355338, %v7269_v53  ;;  %v586_v8 = vpop.f32.mrb[5].mxu0  ;;  %v802_v59 = vsel %vm798_vm14, %v8601_v52, -inf }
 0x3a1   :  { %v756_v60 = vmul.f32 0.35355338, %v586_v8  ;;  %803 = vmax.xlane.f32.xlu0 %v802_v59  ;;  %v799_v61 = vsel %vm798_vm14, %v8603_v54, -inf }
 0x3a2   :  { %800 = vmax.xlane.f32.xlu1 %v799_v61  ;;  %v8614_v63 = vadd.f32 %v775_v44, %v757_v57 }
 0x3a3   :  { %v7272_v2 = vpop.f32.mrb[6].mxu0  ;;  %v8619_v9 = vadd.f32 %v775_v44, %v756_v60 }
 0x3a4   :  { %v759_v3 = vmul.f32 0.35355338, %v7272_v2  ;;  %v596_v4 = vpop.f32.mrb[7].mxu0  ;;  %v808_v5 = vsel %vm798_vm14, %v8614_v63, -inf }
 0x3a5   :  { %809 = vmax.xlane.f32.xlu0 %v808_v5  ;;  %v758_v11 = vmul.f32 0.35355338, %v596_v4  ;;  %v805_v14 = vsel %vm798_vm14, %v8619_v9, -inf }
 0x3a6   :  { %v8623_v15 = vadd.f32 %v775_v44, %v759_v3 }
 0x3a7   :  { %v7275_v12 = vpop.f32.mrb[8].mxu0  ;;  %v8626_v18 = vadd.f32 %v775_v44, %v758_v11 }
 0x3a8   :  { %v606_v13 = vpop.f32.mrb[9].mxu0  ;;  %v761_v21 = vmul.f32 0.35355338, %v7275_v12  ;;  %v814_v25 = vsel %vm798_vm14, %v8623_v15, -inf }
 0x3a9   :  { %806 = vmax.xlane.f32.xlu0 %v805_v14  ;;  %v760_v29 = vmul.f32 0.35355338, %v606_v13  ;;  %v811_v31 = vsel %vm798_vm14, %v8626_v18, -inf }
 0x3aa   :  { %v8636_v35 = vadd.f32 %v775_v44, %v761_v21 }
 0x3ab   :  { %v7282_v17 = vpop.f32.mrb[10].mxu0  ;;  %v8640_v39 = vadd.f32 %v775_v44, %v760_v29 }
 0x3ac   :  { %v763_v22 = vmul.f32 0.35355338, %v7282_v17  ;;  %v715_v24 = vpop.f32.mrb[11].mxu0  ;;  %v820_v47 = vsel %vm798_vm14, %v8636_v35, -inf }
 0x3ad   :  { %v762_v27 = vmul.f32 0.35355338, %v715_v24  ;;  %815 = vmax.xlane.f32.xlu0 %v814_v25  ;;  %v817_v59 = vsel %vm798_vm14, %v8640_v39, -inf }
 0x3ae   :  { %v8630_v28 = vadd.f32 %v779_v16, %v763_v22 }
 0x3af   :  { %v7285_v30 = vpop.f32.mrb[12].mxu0  ;;  %v8638_v36 = vadd.f32 %v779_v16, %v762_v27 }
 0x3b0   :  { %v765_v32 = vmul.f32 0.35355338, %v7285_v30  ;;  %v725_v33 = vpop.f32.mrb[13].mxu0  ;;  %v826_v34 = vsel %vm798_vm14, %v8630_v28, -inf }
 0x3b1   :  { %812 = vmax.xlane.f32.xlu0 %v811_v31  ;;  %827 = vmax.xlane.f32.xlu1 %v826_v34  ;;  %v764_v42 = vmul.f32 0.35355338, %v725_v33  ;;  %v823_v49 = vsel %vm798_vm14, %v8638_v36, -inf }
 0x3b2   :  { %v8646_v51 = vadd.f32 %v779_v16, %v765_v32 }
 0x3b3   :  { %v7288_v37 = vpop.f32.mrb[14].mxu0  ;;  %v8652_v60 = vadd.f32 %v779_v16, %v764_v42 }
 0x3b4   :  { %v735_v45 = vpop.f32.mrb[15].mxu0  ;;  %v832_v44 = vsel %vm798_vm14, %v8646_v51, -inf  ;;  %v767_v2 = vmul.f32 0.35355338, %v7288_v37 }
 0x3b5   :  { %821 = vmax.xlane.f32.xlu0 %v820_v47  ;;  %824 = vmax.xlane.f32.xlu1 %v823_v49  ;;  %v766_v57 = vmul.f32 0.35355338, %v735_v45  ;;  %v829_v3 = vsel %vm798_vm14, %v8652_v60, -inf }
 0x3b6   :  { %v8664_v12 = vadd.f32 %v779_v16, %v767_v2 }
 0x3b7   :  { %v7291_v53 = vpop.f32.mrb[16].mxu0  ;;  %v8658_v4 = vadd.f32 %v779_v16, %v766_v57 }
 0x3b8   :  { %v745_v8 = vpop.f32.mrb[17].mxu0  ;;  %v769_v10 = vmul.f32 0.35355338, %v7291_v53  ;;  %v838_v13 = vsel %vm798_vm14, %v8664_v12, -inf }
 0x3b9   :  { %v768_v61 = vmul.f32 0.35355338, %v745_v8  ;;  %818 = vmax.xlane.f32.xlu0 %v817_v59  ;;  %833 = vmax.xlane.f32.xlu1 %v832_v44  ;;  %v835_v11 = vsel %vm798_vm14, %v8658_v4, -inf }
 0x3ba   :  { %v8668_v14 = vadd.f32 %v779_v16, %v769_v10 }
 0x3bb   :  { %v8654_v1 = vadd.f32 %v779_v16, %v768_v61 }
 0x3bc   :  { %v844_v17 = vsel %vm798_vm14, %v8668_v14, -inf }
 0x3bd   :  { %830 = vmax.xlane.f32.xlu1 %v829_v3  ;;  %v841_v5 = vsel %vm798_vm14, %v8654_v1, -inf }
 0x3be   :  { %842 = vmax.xlane.f32.xlu0 %v841_v5 }
 0x3c1   :  { %836 = vmax.xlane.f32.xlu1 %v835_v11 }
 0x3c5   :  { %839 = vmax.xlane.f32.xlu1 %v838_v13 }
 0x3c9   :  { %845 = vmax.xlane.f32.xlu1 %v844_v17 }
 0x42e   :  { %v804_v21 = vpop.xlane.xlu0 %803 }
 0x42f   :  { %v848_v22 = vsub.f32 %v8601_v52, %v804_v21  ;;  %v801_v24 = vpop.xlane.xlu1 %800 }
 0x430   :  { %v847_v25 = vsub.f32 %v8603_v54, %v801_v24 }
 0x431   :  { %v865_v27 = vmul.f32 1.442695, %v848_v22 }
 0x432   :  { %v863_v29 = vmul.f32 1.442695, %v847_v25  ;;  %v810_v30 = vpop.xlane.xlu0 %809 }
 0x433   :  { %7903 = vpow2.f32 %v865_v27  ;;  %v850_v31 = vsub.f32 %v8614_v63, %v810_v30 }
 0x434   :  { %7905 = vpow2.f32 %v863_v29 }
 0x435   :  { %v869_v16 = vmul.f32 1.442695, %v850_v31 }
 0x436   :  { %v807_v32 = vpop.xlane.xlu0 %806 }
 0x437   :  { %7907 = vpow2.f32 %v869_v16  ;;  %v849_v33 = vsub.f32 %v8619_v9, %v807_v32 }
 0x439   :  { %v867_v34 = vmul.f32 1.442695, %v849_v33 }
 0x43a   :  { %v816_v37 = vpop.xlane.xlu0 %815 }
 0x43b   :  { %7909 = vpow2.f32 %v867_v34  ;;  %v852_v52 = vsub.f32 %v8623_v15, %v816_v37 }
 0x43d   :  { %v8677_v42 = vpop.eup %7903  ;;  %v873_v54 = vmul.f32 1.442695, %v852_v52 }
 0x43e   :  { %v8679_v45 = vpop.eup %7905  ;;  %v813_v47 = vpop.xlane.xlu0 %812  ;;  %v898_v63 = vsel %vm798_vm14, %v8677_v42, 0.0 }
 0x43f   :  { %v828_v49 = vpop.xlane.xlu1 %827  ;;  %7911 = vpow2.f32 %v873_v54  ;;  %v851_v53 = vsub.f32 %v8626_v18, %v813_v47  ;;  %899 = vadd.xlane.f32.xlu1 %v898_v63  ;;  %v895_v57 = vsel %vm798_vm14, %v8679_v45, 0.0 }
 0x440   :  { %v856_v9 = vsub.f32 %v8630_v28, %v828_v49  ;;  %896 = vadd.xlane.f32.xlu0 %v895_v57 }
 0x441   :  { %v8687_v15 = vpop.eup %7907  ;;  %v871_v8 = vmul.f32 1.442695, %v851_v53 }
 0x442   :  { %v881_v59 = vmul.f32 1.442695, %v856_v9  ;;  %v822_v44 = vpop.xlane.xlu0 %821  ;;  %v904_v2 = vsel %vm798_vm14, %v8687_v15, 0.0 }
 0x443   :  { %v825_v61 = vpop.xlane.xlu1 %824  ;;  %7913 = vpow2.f32 %v871_v8  ;;  %v854_v3 = vsub.f32 %v8636_v35, %v822_v44 }
 0x444   :  { %v855_v18 = vsub.f32 %v8638_v36, %v825_v61  ;;  %7915 = vpow2.f32 %v881_v59  ;;  %905 = vadd.xlane.f32.xlu0 %v904_v2 }
 0x445   :  { %v8693_v28 = vpop.eup %7909  ;;  %v877_v5 = vmul.f32 1.442695, %v854_v3 }
 0x446   :  { %v879_v10 = vmul.f32 1.442695, %v855_v18  ;;  %v819_v11 = vpop.xlane.xlu0 %818  ;;  %v901_v17 = vsel %vm798_vm14, %v8693_v28, 0.0 }
 0x447   :  { %v834_v13 = vpop.xlane.xlu1 %833  ;;  %7917 = vpow2.f32 %v877_v5  ;;  %v853_v21 = vsub.f32 %v8640_v39, %v819_v11 }
 0x448   :  { %v858_v22 = vsub.f32 %v8646_v51, %v834_v13  ;;  %7919 = vpow2.f32 %v879_v10  ;;  %902 = vadd.xlane.f32.xlu0 %v901_v17 }
 0x449   :  { %v8699_v35 = vpop.eup %7911  ;;  %v875_v36 = vmul.f32 1.442695, %v853_v21 }
 0x44a   :  { %v885_v24 = vmul.f32 1.442695, %v858_v22  ;;  %v910_v27 = vsel %vm798_vm14, %v8699_v35, 0.0 }
 0x44b   :  { %v831_v25 = vpop.xlane.xlu1 %830  ;;  %7921 = vpow2.f32 %v875_v36  ;;  %v843_v30 = vpop.xlane.xlu0 %842 }
 0x44c   :  { %v857_v29 = vsub.f32 %v8652_v60, %v831_v25  ;;  %7923 = vpow2.f32 %v885_v24  ;;  %v861_v31 = vsub.f32 %v8654_v1, %v843_v30  ;;  %911 = vadd.xlane.f32.xlu0 %v910_v27 }
 0x44d   :  { %v8705_v39 = vpop.eup %7913 }
 0x44e   :  { %v883_v51 = vmul.f32 1.442695, %v857_v29  ;;  %v8707_v16 = vpop.eup %7915  ;;  %v891_v32 = vmul.f32 1.442695, %v861_v31  ;;  %v907_v34 = vsel %vm798_vm14, %v8705_v39, 0.0 }
 0x44f   :  { %v837_v33 = vpop.xlane.xlu1 %836  ;;  %v922_v37 = vsel %vm798_vm14, %v8707_v16, 0.0 }
 0x450   :  { %7925 = vpow2.f32 %v883_v51  ;;  %923 = vadd.xlane.f32.xlu1 %v922_v37  ;;  %908 = vadd.xlane.f32.xlu0 %v907_v34  ;;  %v859_v1 = vsub.f32 %v8658_v4, %v837_v33 }
 0x451   :  { %7927 = vpow2.f32 %v891_v32  ;;  %v8713_v60 = vpop.eup %7917 }
 0x452   :  { %v8716_v52 = vpop.eup %7919  ;;  %v916_v47 = vsel %vm798_vm14, %v8713_v60, 0.0  ;;  %v887_v9 = vmul.f32 1.442695, %v859_v1 }
 0x453   :  { %v840_v54 = vpop.xlane.xlu1 %839  ;;  %v919_v63 = vsel %vm798_vm14, %v8716_v52, 0.0 }
 0x454   :  { %v860_v49 = vsub.f32 %v8664_v12, %v840_v54  ;;  %920 = vadd.xlane.f32.xlu1 %v919_v63  ;;  %917 = vadd.xlane.f32.xlu0 %v916_v47 }
 0x455   :  { %v8723_v53 = vpop.eup %7921 }
 0x456   :  { %v889_v57 = vmul.f32 1.442695, %v860_v49  ;;  %v8725_v8 = vpop.eup %7923  ;;  %v913_v59 = vsel %vm798_vm14, %v8723_v53, 0.0 }
 0x457   :  { %v846_v4 = vpop.xlane.xlu1 %845  ;;  %v928_v12 = vsel %vm798_vm14, %v8725_v8, 0.0 }
 0x458   :  { %7929 = vpow2.f32 %v889_v57  ;;  %v862_v44 = vsub.f32 %v8668_v14, %v846_v4  ;;  %929 = vadd.xlane.f32.xlu1 %v928_v12  ;;  %914 = vadd.xlane.f32.xlu0 %v913_v59 }
 0x459   :  { %7931 = vpow2.f32 %v887_v9 }
 0x45a   :  { %v8732_v61 = vpop.eup %7925  ;;  %v893_v2 = vmul.f32 1.442695, %v862_v44 }
 0x45b   :  { %v8734_v3 = vpop.eup %7927  ;;  %v925_v18 = vsel %vm798_vm14, %v8732_v61, 0.0 }
 0x45c   :  { %v937_v5 = vsel %vm798_vm14, %v8734_v3, 0.0  ;;  %926 = vadd.xlane.f32.xlu1 %v925_v18  ;;  %7933 = vpow2.f32 %v893_v2 }
 0x45d   :  { %938 = vadd.xlane.f32.xlu0 %v937_v5 }
 0x462   :  { %v8740_v14 = vpop.eup %7929 }
 0x463   :  { %v934_v10 = vsel %vm798_vm14, %v8740_v14, 0.0  ;;  %v8744_v11 = vpop.eup %7931 }
 0x464   :  { %935 = vadd.xlane.f32.xlu1 %v934_v10  ;;  %v931_v13 = vsel %vm798_vm14, %v8744_v11, 0.0 }
 0x466   :  { %v8748_v17 = vpop.eup %7933 }
 0x467   :  { %v940_v21 = vsel %vm798_vm14, %v8748_v17, 0.0 }
 0x468   :  { %932 = vadd.xlane.f32.xlu1 %v931_v13 }
 0x46c   :  { %941 = vadd.xlane.f32.xlu1 %v940_v21 }
 0x473   :  { %7884 = vrot.lane.b32.xlu0 %v8508_v0, %s8234_s1 }
 0x47d   :  { %7889 = vrot.lane.b32.xlu1 %v8517_v6, %s8234_s1 }
 0x4cc   :  { %v900_v27 = vpop.xlane.xlu1 %899 }
 0x4cd   :  { %v897_v22 = vpop.xlane.xlu0 %896 }
 0x4ce   :  { %7935 = vrcp.f32 %v897_v22 }
 0x4d1   :  { %v906_v36 = vpop.xlane.xlu0 %905 }
 0x4d5   :  { %v903_v24 = vpop.xlane.xlu0 %902 }
 0x4d8   :  { %v7936_v25 = vpop.eup %7935 }
 0x4d9   :  { %v912_v29 = vpop.xlane.xlu0 %911  ;;  %v944_v30 = vmul.f32 %v7936_v25, %v8679_v45 }
 0x4db   :  { %7296 = vmatprep.mubr.msk.f32.mxu0 %vm798_vm14, %v944_v30 }
 0x4dd   :  { %v924_v31 = vpop.xlane.xlu1 %923  ;;  %v909_v51 = vpop.xlane.xlu0 %908 }
 0x4e1   :  { %v921_v32 = vpop.xlane.xlu1 %920  ;;  %v918_v33 = vpop.xlane.xlu0 %917 }
 0x4e2   :  { %7937 = vrcp.f32 %v921_v32 }
 0x4e3   :  { %7939 = vrcp.f32 %v900_v27 }
 0x4e4   :  { %7941 = vrcp.f32 %v903_v24 }
 0x4e5   :  { %v915_v0 = vpop.xlane.xlu0 %914  ;;  %v930_v34 = vpop.xlane.xlu1 %929  ;;  %7943 = vrcp.f32 %v906_v36 }
 0x4e6   :  { %7945 = vrcp.f32 %v909_v51 }
 0x4e7   :  { %7947 = vrcp.f32 %v912_v29 }
 0x4e8   :  { %7949 = vrcp.f32 %v915_v0 }
 0x4e9   :  { %v927_v1 = vpop.xlane.xlu1 %926  ;;  %7951 = vrcp.f32 %v918_v33 }
 0x4ea   :  { %v939_v6 = vpop.xlane.xlu0 %938  ;;  %7953 = vrcp.f32 %v924_v31 }
 0x4eb   :  { %7955 = vrcp.f32 %v927_v1 }
 0x4ec   :  { %v7938_v37 = vpop.eup %7937  ;;  %7957 = vrcp.f32 %v930_v34 }
 0x4ed   :  { %v960_v47 = vmul.f32 %v7938_v37, %v8716_v52  ;;  %v7940_v57 = vpop.eup %7939 }
 0x4ee   :  { %v7885_v54 = vpop.permute.xlu0 %7884  ;;  %v7942_v4 = vpop.eup %7941  ;;  %v946_v59 = vmul.f32 %v7940_v57, %v8677_v42 }
 0x4ef   :  { %v7887_v45 = vunpack.i.h.bf16 %v7885_v54  ;;  %v7886_v49 = vunpack.i.l.bf16 %v7885_v54  ;;  %7312 = vmatprep.mubr.msk.f32.mxu1 %vm798_vm14, %v960_v47  ;;  %v7944_v12 = vpop.eup %7943  ;;  %v948_v2 = vmul.f32 %v7942_v4, %v8693_v28 }
 0x4f0   :  { %v7946_v52 = vpop.eup %7945  ;;  %v950_v5 = vmul.f32 %v7944_v12, %v8687_v15 }
 0x4f1   :  { %v936_v63 = vpop.xlane.xlu1 %935  ;;  %v7701_v9 = vpack.c.bf16 %v7887_v45, %v7886_v49  ;;  %v7948_v10 = vpop.eup %7947  ;;  %v952_v13 = vmul.f32 %v7946_v52, %v8705_v39 }
 0x4f2   :  { %v7950_v21 = vpop.eup %7949  ;;  %v954_v28 = vmul.f32 %v7948_v10, %v8699_v35 }
 0x4f3   :  { %7702 = vmatprep.subr.bf16.mxu0 %v7701_v9  ;;  %v7952_v22 = vpop.eup %7951  ;;  %v956_v25 = vmul.f32 %v7950_v21, %v8723_v53 }
 0x4f4   :  { %7704 = vmatpush3.bf16.msra.mxu0 %v7701_v9  ;;  %v7954_v39 = vpop.eup %7953  ;;  %v958_v27 = vmul.f32 %v7952_v22, %v8713_v60 }
 0x4f5   :  { %v933_v44 = vpop.xlane.xlu1 %932  ;;  %v7956_v29 = vpop.eup %7955  ;;  %v962_v35 = vmul.f32 %v7954_v39, %v8707_v16 }
 0x4f6   :  { %7959 = vrcp.f32 %v933_v44  ;;  %v7958_v53 = vpop.eup %7957  ;;  %v964_v30 = vmul.f32 %v7956_v29, %v8732_v61 }
 0x4f7   :  { %7297 = vmatmul.mubr.msk.f32.vlgmr.msra.gmra.mrb[18].mxu0 %vm798_vm14, %v946_v59  ;;  %7961 = vrcp.f32 %v936_v63  ;;  %v966_v60 = vmul.f32 %v7958_v53, %v8725_v8  ;;  %v1273_v8 = vld [vmem:[%s10014_s15] sm:$0xff] }
 0x4f8   :  { %7299 = vmatprep.mubr.msk.f32.mxu0 %vm798_vm14, %v948_v2  ;;  %7963 = vrcp.f32 %v939_v6 }
 0x4f9   :  { %v942_v18 = vpop.xlane.xlu1 %941 }
 0x4fa   :  { %7965 = vrcp.f32 %v942_v18 }
 0x4fb   :  { %7300 = vmatmul.mubr.msk.f32.gmra.mrb[20].mxu0 %vm798_vm14, %v950_v5 }
 0x4fc   :  { %7302 = vmatprep.mubr.msk.f32.mxu0 %vm798_vm14, %v952_v13 }
 0x4fd   :  { %v7890_v42 = vpop.permute.xlu1 %7889 }
 0x4fe   :  { %v7892_v36 = vunpack.i.h.bf16 %v7890_v42  ;;  %v7891_v24 = vunpack.i.l.bf16 %v7890_v42 }
 0x4ff   :  { %7303 = vmatmul.mubr.msk.f32.gmra.mrb[22].mxu0 %vm798_vm14, %v954_v28 }
 0x500   :  { %7305 = vmatprep.mubr.msk.f32.mxu0 %vm798_vm14, %v956_v25  ;;  %v7705_v15 = vpack.c.bf16 %v7892_v36, %v7891_v24  ;;  %v7960_v31 = vpop.eup %7959 }
 0x501   :  { %v7962_v51 = vpop.eup %7961  ;;  %v968_v32 = vmul.f32 %v7960_v31, %v8744_v11  ;;  %v1275_v11 = vld [vmem:[%s10014_s15 + $0x10] sm:$0xff] }
 0x502   :  { %7706 = vmatprep.subr.bf16.mxu1 %v7705_v15  ;;  %v7964_v33 = vpop.eup %7963  ;;  %v970_v16 = vmul.f32 %v7962_v51, %v8740_v14  ;;  %v1274_v14 = vld [vmem:[%s10014_s15 + $0x8] sm:$0xff] }
 0x503   :  { %7306 = vmatmul.mubr.msk.f32.gmra.mrb[24].mxu0 %vm798_vm14, %v958_v27  ;;  %7708 = vmatpush3.bf16.msra.mxu1 %v7705_v15  ;;  %v972_v61 = vmul.f32 %v7964_v33, %v8734_v3  ;;  %v7709_v3 = vpack.c.bf16 %v1274_v14, %v1273_v8 }
 0x504   :  { %7717 = vmatprep.subr.bf16.mxu1 %v8230_v19  ;;  %v7966_v0 = vpop.eup %7965 }
 0x505   :  { %v974_v34 = vmul.f32 %v7966_v0, %v8748_v17  ;;  %7710 = vmatprep.subr.bf16.mxu0 %v7709_v3  ;;  %v1276_v17 = vld [vmem:[%s10014_s15 + $0x18] sm:$0xff] }
 0x506   :  { %7313 = vmatmul.mubr.msk.f32.vlgmr.msra.gmra.mrb[4].mxu1 %vm798_vm14, %v962_v35  ;;  %7712 = vmatpush3.bf16.msra.mxu0 %v7709_v3  ;;  %v7713_v6 = vpack.c.bf16 %v1276_v17, %v1275_v11  ;;  %v6880_v3 = vld [vmem:[%s10015_s16] ss:$0 sm:$0xff] }
 0x507   :  { %7315 = vmatprep.mubr.msk.f32.mxu1 %vm798_vm14, %v964_v30 }
 0x508   :  { %7714 = vmatprep.subr.bf16.mxu0 %v7713_v6 }
 0x50a   :  { %7316 = vmatmul.mubr.msk.f32.gmra.mrb[6].mxu1 %vm798_vm14, %v966_v60  ;;  %7716 = vmatpush3.bf16.msra.mxu0 %v7713_v6 }
 0x50b   :  { %7318 = vmatprep.mubr.msk.f32.mxu1 %vm798_vm14, %v968_v32  ;;  %7723 = vmatprep.subr.bf16.mxu0 %v8230_v19 }
 0x50e   :  { %7319 = vmatmul.mubr.msk.f32.gmra.mrb[8].mxu1 %vm798_vm14, %v970_v16 }
 0x50f   :  { %7321 = vmatprep.mubr.msk.f32.mxu1 %vm798_vm14, %v972_v61 }
 0x512   :  { %7322 = vmatmul.mubr.msk.f32.gmra.mrb[10].mxu1 %vm798_vm14, %v974_v34 }
 0x513   :  { %7342 = vmatprep.mubr.msk.f32.mxu1 %vm8231_vm1, %v8232_v55 }
 0x5ca   :  { %v7298_v37 = vpop.f32.mrb[18].mxu0 }
 0x5cb   :  { %v1071_v1 = vpop.f32.mrb[19].mxu0  ;;  %v1246_v47 = vmul.f32 %v7298_v37, %v8506_v62 }
 0x5cc   :  { %v1245_v63 = vmul.f32 %v8506_v62, %v1071_v1 }
 0x5ce   :  { %v7301_v54 = vpop.f32.mrb[20].mxu0 }
 0x5cf   :  { %v1250_v45 = vmul.f32 %v7301_v54, %v8542_v20  ;;  %v1081_v49 = vpop.f32.mrb[21].mxu0 }
 0x5d0   :  { %v1249_v9 = vmul.f32 %v8542_v20, %v1081_v49 }
 0x5d1   :  { %v1254_v57 = vadd.f32 %v1250_v45, %v1246_v47 }
 0x5d2   :  { %v1253_v4 = vadd.f32 %v1249_v9, %v1245_v63  ;;  %v7304_v59 = vpop.f32.mrb[22].mxu0 }
 0x5d3   :  { %v1258_v44 = vmul.f32 %v7304_v59, %v8550_v23  ;;  %v1091_v12 = vpop.f32.mrb[23].mxu0 }
 0x5d4   :  { %v1257_v2 = vmul.f32 %v8550_v23, %v1091_v12 }
 0x5d5   :  { %v1262_v52 = vadd.f32 %v1258_v44, %v1254_v57 }
 0x5d6   :  { %v1261_v18 = vadd.f32 %v1257_v2, %v1253_v4  ;;  %v7307_v5 = vpop.f32.mrb[24].mxu0 }
 0x5d7   :  { %v1266_v10 = vmul.f32 %v7307_v5, %v8559_v26  ;;  %v1101_v13 = vpop.f32.mrb[25].mxu0 }
 0x5d8   :  { %v1265_v21 = vmul.f32 %v8559_v26, %v1101_v13 }
 0x5d9   :  { %v1270_v42 = vadd.f32 %v1266_v10, %v1262_v52  ;;  %v7314_v28 = vpop.f32.mrb[4].mxu1 }
 0x5da   :  { %v1269_v22 = vadd.f32 %v1265_v21, %v1261_v18  ;;  %v1206_v36 = vpop.f32.mrb[5].mxu1  ;;  %v1248_v25 = vmul.f32 %v7314_v28, %v8506_v62 }
 0x5db   :  { %v1247_v27 = vmul.f32 %v8506_v62, %v1206_v36 }
 0x5dc   :  { %7332 = vmatprep.mubr.msk.f32.mxu0 %vm121_vm0, %v1269_v22 }
 0x5dd   :  { %v7317_v24 = vpop.f32.mrb[6].mxu1  ;;  %7333 = vmatmul.mubr.msk.f32.vlgmr.msra.gmra.mrb[26].mxu0 %vm121_vm0, %v1270_v42 }
 0x5de   :  { %v1252_v15 = vmul.f32 %v7317_v24, %v8542_v20  ;;  %v1216_v39 = vpop.f32.mrb[7].mxu1 }
 0x5df   :  { %v1251_v29 = vmul.f32 %v8542_v20, %v1216_v39 }
 0x5e0   :  { %v1256_v35 = vadd.f32 %v1252_v15, %v1248_v25 }
 0x5e1   :  { %v1255_v53 = vadd.f32 %v1251_v29, %v1247_v27  ;;  %v7320_v30 = vpop.f32.mrb[8].mxu1 }
 0x5e2   :  { %v1260_v31 = vmul.f32 %v7320_v30, %v8550_v23  ;;  %v1226_v60 = vpop.f32.mrb[9].mxu1 }
 0x5e3   :  { %v1259_v51 = vmul.f32 %v8550_v23, %v1226_v60  ;;  %v1627_v60 = vld [vmem:[%s10053_s27 + $0x4] sm:$0xf] }
 0x5e4   :  { %v1264_v32 = vadd.f32 %v1260_v31, %v1256_v35  ;;  %v1624_v35 = vld [vmem:[%s10052_s5] sm:$0xf]  ;;  %v1625_v31 = vld [vmem:[%s10052_s5 + $0x4] sm:$0xf] }
 0x5e5   :  { %v1263_v33 = vadd.f32 %v1259_v51, %v1255_v53  ;;  %v7323_v16 = vpop.f32.mrb[10].mxu1  ;;  %v1626_v53 = vld [vmem:[%s10053_s27] sm:$0xf] }
 0x5e6   :  { %v1268_v0 = vmul.f32 %v7323_v16, %v8559_v26  ;;  %v1236_v61 = vpop.f32.mrb[11].mxu1  ;;  %v1652_v30 = vsub.s32 %v1626_v53, %v1624_v35 }
 0x5e7   :  { %v1267_v34 = vmul.f32 %v8559_v26, %v1236_v61 }
 0x5e8   :  { %v1272_v8 = vadd.f32 %v1268_v0, %v1264_v32  ;;  %v6887_v51 = vadd.s32 4294967295, %v1652_v30  ;;  %v1653_v32 = vsub.s32 %v1627_v60, %v1625_v31  ;;  %v1629_v0 = vadd.s32 1, %v1625_v31 }
 0x5e9   :  { %v1271_v14 = vadd.f32 %v1267_v34, %v1263_v33  ;;  %v1628_v34 = vadd.s32 1, %v1624_v35 }
 0x5ea   :  { %v1656_v33 = vcvt.s32.f32 %v6887_v51  ;;  %v6888_v16 = vadd.s32 4294967295, %v1653_v32 }
 0x5eb   :  { %7335 = vmatprep.mubr.msk.f32.mxu0 %vm121_vm0, %v1271_v14 }
 0x5ec   :  { %7336 = vmatmul.mubr.msk.f32.gmra.mrb[28].mxu0 %vm121_vm0, %v1272_v8  ;;  %7967 = vrcp.f32 %v1656_v33  ;;  %v1657_v61 = vcvt.s32.f32 %v6888_v16 }
 0x5ed   :  { %7356 = vmatprep.mubr.msk.f32.mxu0 %vm8231_vm1, %v8232_v55 }
 0x5ee   :  { %7969 = vrcp.f32 %v1657_v61 }
 0x5f6   :  { %v7968_v8 = vpop.eup %7967 }
 0x5f8   :  { %v7970_v14 = vpop.eup %7969 }
 0x6b0   :  { %v7334_v11 = vpop.f32.mrb[26].mxu0 }
 0x6b1   :  { %v1382_v17 = vadd.f32 %v7334_v11, %v6880_v3  ;;  %v1355_v6 = vpop.f32.mrb[27].mxu0 }
 0x6b2   :  { %v1381_v37 = vadd.f32 %v6880_v3, %v1355_v6 }
 0x6b3   :  { %v1386_v1 = vadd.f32 %v1382_v17, %v8474_v46 }
 0x6b4   :  { %v1385_v54 = vadd.f32 %v1381_v37, %v8470_v40  ;;  %v8235_v40 = vmov 0  }
 0x6b5   :  { %v1394_v47 = vsel %vm121_vm0, %v1386_v1, 0.0  ;;  %7894 = vset.pattern.permute.xlu1 %v8235_v40  ;;  %7893 = vset.pattern.permute.xlu0 %v8235_v40 }
 0x6b6   :  { %1395 = vadd.xlane.f32.xlu0 %v1394_v47  ;;  %v1391_v45 = vsel %vm121_vm0, %v1385_v54, 0.0 }
 0x6b7   :  { %1392 = vadd.xlane.f32.xlu1 %v1391_v45  ;;  %v6881_v45 = vld [vmem:[%s10016_s17] ss:$0 sm:$0xff] }
 0x6bf   :  { %v7337_v49 = vpop.f32.mrb[28].mxu0 }
 0x6c0   :  { %v1384_v63 = vadd.f32 %v7337_v49, %v6880_v3  ;;  %v1365_v9 = vpop.f32.mrb[29].mxu0 }
 0x6c1   :  { %v1383_v57 = vadd.f32 %v6880_v3, %v1365_v9 }
 0x6c2   :  { %v1388_v4 = vadd.f32 %v1384_v63, %v8482_v50 }
 0x6c3   :  { %v1387_v59 = vadd.f32 %v1383_v57, %v8476_v48 }
 0x6c4   :  { %v1400_v44 = vsel %vm121_vm0, %v1388_v4, 0.0 }
 0x6c5   :  { %1401 = vadd.xlane.f32.xlu1 %v1400_v44  ;;  %v1397_v46 = vsel %vm121_vm0, %v1387_v59, 0.0 }
 0x6c6   :  { %1398 = vadd.xlane.f32.xlu0 %v1397_v46 }
 0x743   :  { %v1396_v12 = vpop.xlane.xlu0 %1395 }
 0x744   :  { %v1404_v2 = vmul.f32 0.03125, %v1396_v12  ;;  %v1393_v52 = vpop.xlane.xlu1 %1392 }
 0x745   :  { %v1403_v18 = vmul.f32 0.03125, %v1393_v52 }
 0x746   :  { %v1408_v5 = vsub.f32 %v1386_v1, %v1404_v2 }
 0x747   :  { %v1407_v10 = vsub.f32 %v1385_v54, %v1403_v18 }
 0x748   :  { %v1412_v13 = vmul.f32 %v1408_v5, %v1408_v5 }
 0x749   :  { %v1411_v21 = vmul.f32 %v1407_v10, %v1407_v10 }
 0x74a   :  { %v1418_v50 = vsel %vm121_vm0, %v1412_v13, 0.0 }
 0x74b   :  { %1419 = vadd.xlane.f32.xlu1 %v1418_v50  ;;  %v1415_v48 = vsel %vm121_vm0, %v1411_v21, 0.0 }
 0x74c   :  { %1416 = vadd.xlane.f32.xlu0 %v1415_v48 }
 0x752   :  { %v1402_v42 = vpop.xlane.xlu1 %1401 }
 0x753   :  { %v1406_v28 = vmul.f32 0.03125, %v1402_v42  ;;  %v1399_v22 = vpop.xlane.xlu0 %1398 }
 0x754   :  { %v1405_v36 = vmul.f32 0.03125, %v1399_v22 }
 0x755   :  { %v8839_v24 = vsub.f32 %v1388_v4, %v1406_v28 }
 0x756   :  { %v8841_v25 = vsub.f32 %v1387_v59, %v1405_v36  ;;  %v6882_v59 = vld [vmem:[%s10017_s18] ss:$0 sm:$0xff] }
 0x757   :  { %v1414_v15 = vmul.f32 %v8839_v24, %v8839_v24 }
 0x758   :  { %v1413_v39 = vmul.f32 %v8841_v25, %v8841_v25 }
 0x759   :  { %v1424_v27 = vsel %vm121_vm0, %v1414_v15, 0.0 }
 0x75a   :  { %1425 = vadd.xlane.f32.xlu1 %v1424_v27  ;;  %v1421_v29 = vsel %vm121_vm0, %v1413_v39, 0.0 }
 0x75b   :  { %1422 = vadd.xlane.f32.xlu0 %v1421_v29 }
 0x76b   :  { %1634 = vperm.xlu1 %7894, %v1629_v0  }
 0x76f   :  { %1639 = vperm.xlu1 %7894, %v1626_v53  }
 0x771   :  { %1631 = vperm.xlu0 %7893, %v1628_v34  }
 0x773   :  { %1642 = vperm.xlu1 %7894, %v1627_v60  }
 0x777   :  { %1808 = vperm.xlu1 %7894, %v7968_v8  }
 0x77b   :  { %1813 = vperm.xlu1 %7894, %v7970_v14  }
 0x7d8   :  { %v1420_v3 = vpop.xlane.xlu1 %1419 }
 0x7d9   :  { %v1428_v11 = vmul.f32 0.03125, %v1420_v3  ;;  %v1417_v17 = vpop.xlane.xlu0 %1416 }
 0x7da   :  { %v1427_v6 = vmul.f32 0.03125, %v1417_v17 }
 0x7db   :  { %v1432_v37 = vadd.f32 1e-12, %v1428_v11 }
 0x7dc   :  { %v1431_v1 = vadd.f32 1e-12, %v1427_v6 }
 0x7dd   :  { %7971 = vrsqrt.f32 %v1432_v37 }
 0x7de   :  { %7973 = vrsqrt.f32 %v1431_v1 }
 0x7e7   :  { %v7972_v54 = vpop.eup %7971  ;;  %v1426_v47 = vpop.xlane.xlu1 %1425 }
 0x7e8   :  { %v7974_v49 = vpop.eup %7973  ;;  %v1430_v63 = vmul.f32 0.03125, %v1426_v47  ;;  %v1423_v9 = vpop.xlane.xlu0 %1422  ;;  %v1440_v57 = vmul.f32 %v7972_v54, %v1408_v5 }
 0x7e9   :  { %v1429_v4 = vmul.f32 0.03125, %v1423_v9  ;;  %v1439_v44 = vmul.f32 %v7974_v49, %v1407_v10  ;;  %v1864_v49 = vld [vmem:[%s10020_s21 + $0x8] sm:$0xff]  ;;  %v1865_v9 = vld [vmem:[%s10020_s21 + $0x10] sm:$0xff] }
 0x7ea   :  { %v1434_v46 = vadd.f32 1e-12, %v1430_v63  ;;  %v1450_v40 = vmul.f32 %v6881_v45, %v1440_v57  ;;  %v1866_v57 = vld [vmem:[%s10020_s21 + $0x18] sm:$0xff] }
 0x7eb   :  { %v1433_v12 = vadd.f32 1e-12, %v1429_v4  ;;  %v1635_v2 = vpop.permute.xlu1 %1634  ;;  %v1449_v52 = vmul.f32 %v6881_v45, %v1439_v44  ;;  %v7733_v4 = vpack.c.bf16 %v1866_v57, %v1865_v9  ;;  %v1869_v44 = vld [vmem:[%s10022_s23 + $0x8] sm:$0xff] }
 0x7ec   :  { %7975 = vrsqrt.f32 %v1434_v46  ;;  %v1460_v18 = vadd.f32 %v6882_v59, %v1450_v40  ;;  %vm1637_vm5 = vcmp.ge.s32.totalorder %v8499_v58, %v1635_v2  ;;  %v1870_v40 = vld [vmem:[%s10022_s23 + $0x10] sm:$0xff] }
 0x7ed   :  { %7977 = vrsqrt.f32 %v1433_v12  ;;  %v1459_v13 = vadd.f32 %v6882_v59, %v1449_v52  ;;  %v1871_v12 = vld [vmem:[%s10022_s23 + $0x18] sm:$0xff] }
 0x7ee   :  { %v8938_v2 = vpack.c.bf16 %v1871_v12, %v1870_v40 }
 0x7ef   :  { %v1640_v21 = vpop.permute.xlu1 %1639  ;;  %v8867_v50 = vpack.c.bf16 %v1460_v18, %v1459_v13 }
 0x7f0   :  { %vm1644_vm15 = vcmp.lt.s32.totalorder %v8499_v58, %v1640_v21  ;;  %v1632_v5 = vpop.permute.xlu0 %1631 }
 0x7f1   :  { %vm1636_vm3 = vcmp.ge.s32.totalorder %v8499_v58, %v1632_v5  ;;  %7719 = vmatpush3.bf16.msra.mxu1 %v8867_v50  ;;  %7725 = vmatpush3.bf16.msra.mxu0 %v8867_v50 }
 0x7f2   :  { %vm1646_vm4 = vmand %vm1636_vm3, %vm1644_vm15  ;;  %7720 = vmatprep.subr.bf16.mxu1 %v8230_v19  ;;  %7729 = vmatprep.subr.bf16.mxu0 %v8230_v19  ;;  %vm2740_vm15 = vcmask 1043456   ;;  %vm2937_vm3 = vcmask 31744  }
 0x7f3   :  { %v6885_v10 = vsel %vm1646_vm4, 1.0, %v8232_v55  ;;  %v1643_v35 = vpop.permute.xlu1 %1642 }
 0x7f4   :  { %7357 = vmatmul.mubr.msk.f32.vlgmr.msra.gmra.mrb[30].mxu0 %vm798_vm14, %v6885_v10  ;;  %7343 = vmatmul.mubr.msk.f32.vlgmr.msra.gmra.mrb[12].mxu1 %vm798_vm14, %v8591_v38  ;;  %vm1645_vm7 = vcmp.lt.s32.totalorder %v8499_v58, %v1643_v35 }
 0x7f5   :  { %7349 = vmatprep.mubr.msk.f32.mxu1 %vm8231_vm1, %v8232_v55  ;;  %7374 = vmatprep.mubr.msk.f32.mxu0 %vm8231_vm1, %v8232_v55  ;;  %vm1647_vm8 = vmand %vm1637_vm5, %vm1645_vm7 }
 0x7f6   :  { %v7976_v48 = vpop.eup %7975  ;;  %v6886_v38 = vsel %vm1647_vm8, 1.0, %v8232_v55 }
 0x7f7   :  { %v7978_v42 = vpop.eup %7977  ;;  %v1442_v28 = vmul.f32 %v7976_v48, %v8839_v24  ;;  %v1809_v24 = vpop.permute.xlu1 %1808 }
 0x7f8   :  { %v1441_v22 = vmul.f32 %v7978_v42, %v8841_v25 }
 0x7f9   :  { %v1452_v36 = vmul.f32 %v6881_v45, %v1442_v28  ;;  %v6891_v28 = vld [vmem:[%s10018_s19] ss:$0 sm:$0xff] }
 0x7fa   :  { %v1451_v15 = vmul.f32 %v6881_v45, %v1441_v22  ;;  %v1863_v45 = vld [vmem:[%s10020_s21] sm:$0xff] }
 0x7fb   :  { %v1462_v39 = vadd.f32 %v6882_v59, %v1452_v36  ;;  %v1814_v33 = vpop.permute.xlu1 %1813  ;;  %v7730_v63 = vpack.c.bf16 %v1864_v49, %v1863_v45 }
 0x7fc   :  { %v1461_v27 = vadd.f32 %v6882_v59, %v1451_v15  ;;  %v1868_v59 = vld [vmem:[%s10022_s23] sm:$0xff] }
 0x7fd   :  { %7731 = vmatpush3.bf16.msra.mxu0 %v7730_v63  ;;  %v8928_v46 = vpack.c.bf16 %v1869_v44, %v1868_v59 }
 0x7fe   :  { %v8885_v29 = vpack.c.bf16 %v1462_v39, %v1461_v27  ;;  %7732 = vmatprep.subr.bf16.mxu0 %v8230_v19  ;;  %v6892_v39 = vld [vmem:[%s10019_s20] ss:$0 sm:$0xff] }
 0x800   :  { %7722 = vmatpush3.bf16.msra.mxu1 %v8885_v29 }
 0x801   :  { %7726 = vmatprep.subr.bf16.mxu1 %v8230_v19  ;;  %7734 = vmatpush3.bf16.msra.mxu0 %v7733_v4 }
 0x802   :  { %7741 = vmatprep.subr.bf16.mxu0 %v8230_v19 }
 0x803   :  { %7350 = vmatmul.mubr.msk.f32.vlgmr.msra.gmra.mrb[14].mxu1 %vm798_vm14, %v8608_v56 }
 0x804   :  { %7728 = vmatpush3.bf16.msra.mxu1 %v8885_v29  ;;  %7363 = vmatprep.mubr.msk.f32.mxu1 %vm8231_vm1, %v8232_v55 }
 0x805   :  { %7735 = vmatprep.subr.bf16.mxu1 %v8230_v19 }
 0x807   :  { %7364 = vmatmul.mubr.msk.f32.vlgmr.msra.gmra.mrb[16].mxu1 %vm798_vm14, %v6886_v38 }
 0x808   :  { %7385 = vmatprep.mubr.msk.f32.mxu1 %vm8231_vm1, %v8232_v55  ;;  %7737 = vmatpush3.bf16.msra.mxu1 %v8928_v46 }
 0x809   :  { %7738 = vmatprep.subr.bf16.mxu1 %v8230_v19 }
 0x80c   :  { %7740 = vmatpush3.bf16.msra.mxu1 %v8938_v2 }
 0x80d   :  { %7747 = vmatprep.subr.bf16.mxu1 %v8230_v19 }
 0x80f   :  { %7386 = vmatmul.mubr.f32.vlgmr.msra.gmra.mrb[18].mxu1 %v8232_v55 }
 0x810   :  { %7749 = vmatpush3.bf16.msra.mxu1 %v8928_v46  ;;  %7407 = vmatprep.mubr.msk.f32.mxu1 %vm8231_vm1, %v8232_v55 }
 0x811   :  { %7750 = vmatprep.subr.bf16.mxu1 %v8230_v19 }
 0x814   :  { %7752 = vmatpush3.bf16.msra.mxu1 %v8938_v2 }
 0x815   :  { %7759 = vmatprep.subr.bf16.mxu1 %v8230_v19 }
 0x8c7   :  { %v1727_v25 = vpop.f32.mrb[30].mxu0  ;;  %v8901_v53 = vpop.f32.mrb[12].mxu1 }
 0x8c8   :  { %v1816_v56 = vmul.f32 %v1809_v24, %v1727_v25  ;;  %v7344_v30 = vpop.f32.mrb[13].mxu1  ;;  %v7358_v31 = vpop.f32.mrb[31].mxu0 }
 0x8c9   :  { %v6894_v30 = vld [vmem:[%s10021_s22] ss:$0 sm:$0xff]  ;;  %v1975_v31 = vsub.s32 3, %v8595_v41 }
 0x8ca   :  { %v1821_v60 = vsel %vm1820_vm9, %v1816_v56, 0.0 }
 0x8cb   :  { %1822 = vadd.xlane.f32.xlu1 %v1821_v60  ;;  %v1985_v60 = vsub.s32 2, %v8595_v41 }
 0x8d6   :  { %v8904_v51 = vpop.f32.mrb[14].mxu1 }
 0x8d7   :  { %v7351_v32 = vpop.f32.mrb[15].mxu1 }
 0x8d8   :  { %v8969_v32 = vsub.s32 1, %v8595_v41 }
 0x8da   :  { %v1800_v16 = vpop.f32.mrb[16].mxu1 }
 0x8db   :  { %v1817_v0 = vmul.f32 %v1814_v33, %v1800_v16  ;;  %v7365_v61 = vpop.f32.mrb[17].mxu1 }
 0x8dd   :  { %v1824_v34 = vsel %vm1820_vm9, %v1817_v0, 0.0 }
 0x8de   :  { %1825 = vadd.xlane.f32.xlu0 %v1824_v34  ;;  %v1962_v34 = vand.u32 31, %v8499_v58 }
 0x8e0   :  { %vm8974_vm13 = vcmp.lt.s32.totalorder %v1962_v34, 16 }
 0x8e2   :  { %v2097_v25 = vpop.f32.mrb[18].mxu1 }
 0x8e3   :  { %v2102_v9 = vrot.slane %v2097_v25, 1 }
 0x958   :  { %v1823_v8 = vpop.xlane.xlu1 %1822 }
 0x959   :  { %v1827_v14 = vmul.f32 0.03125, %v1823_v8 }
 0x95b   :  { %v1829_v3 = vsub.f32 %v1816_v56, %v1827_v14  ;;  %v7387_v56 = vpop.f32.mrb[19].mxu1 }
 0x95d   :  { %v1831_v11 = vmul.f32 %v1829_v3, %v1829_v3 }
 0x95f   :  { %v1833_v17 = vsel %vm1820_vm9, %v1831_v11, 0.0 }
 0x960   :  { %1834 = vadd.xlane.f32.xlu1 %v1833_v17 }
 0x96b   :  { %v1826_v6 = vpop.xlane.xlu0 %1825 }
 0x96c   :  { %v1828_v37 = vmul.f32 0.03125, %v1826_v6 }
 0x96e   :  { %v1830_v1 = vsub.f32 %v1817_v0, %v1828_v37 }
 0x970   :  { %v1832_v54 = vmul.f32 %v1830_v1, %v1830_v1 }
 0x972   :  { %v1836_v47 = vsel %vm1820_vm9, %v1832_v54, 0.0 }
 0x973   :  { %1837 = vadd.xlane.f32.xlu1 %v1836_v47 }
 0x9ed   :  { %v1835_v52 = vpop.xlane.xlu1 %1834 }
 0x9ee   :  { %v1839_v18 = vmul.f32 0.03125, %v1835_v52 }
 0x9f0   :  { %v1841_v13 = vadd.f32 1e-07, %v1839_v18 }
 0x9f2   :  { %7979 = vrsqrt.f32 %v1841_v13 }
 0x9fc   :  { %v7980_v48 = vpop.eup %7979 }
 0x9fd   :  { %v1845_v42 = vmul.f32 %v7980_v48, %v1829_v3 }
 0x9ff   :  { %v1853_v36 = vmul.f32 %v6891_v28, %v1845_v42 }
 0xa00   :  { %v1838_v21 = vpop.xlane.xlu1 %1837 }
 0xa01   :  { %v1840_v5 = vmul.f32 0.03125, %v1838_v21  ;;  %v1861_v35 = vadd.f32 %v6892_v39, %v1853_v36 }
 0xa03   :  { %v1842_v10 = vadd.f32 1e-07, %v1840_v5 }
 0xa05   :  { %7981 = vrsqrt.f32 %v1842_v10 }
 0xa0f   :  { %v7982_v22 = vpop.eup %7981 }
 0xa10   :  { %v1846_v15 = vmul.f32 %v7982_v22, %v1830_v1 }
 0xa12   :  { %v1854_v27 = vmul.f32 %v6891_v28, %v1846_v15 }
 0xa14   :  { %v1862_v38 = vadd.f32 %v6892_v39, %v1854_v27 }
 0xa16   :  { %v1874_v24 = vcombine.low %v1861_v35, %v1862_v38 }
 0xa18   :  { %7375 = vmatmul.mubr.msk.f32.vlgmr.msra.gmra.mrb[32].mxu0 %vm121_vm0, %v1874_v24 }
 0xa19   :  { %7743 = vmatpush3.bf16.msra.mxu0 %v8928_v46  ;;  %7396 = vmatprep.mubr.msk.f32.mxu0 %vm8231_vm1, %v8232_v55 }
 0xa1a   :  { %7744 = vmatprep.subr.bf16.mxu0 %v8230_v19 }
 0xa1d   :  { %7746 = vmatpush3.bf16.msra.mxu0 %v8938_v2 }
 0xa1e   :  { %7753 = vmatprep.subr.bf16.mxu0 %v8230_v19 }
 0xaeb   :  { %v1943_v33 = vpop.f32.mrb[32].mxu0 }
 0xaec   :  { %v1948_v16 = vcombine.high %v1943_v33, %v1943_v33  ;;  %v1956_v0 = vadd.f32 %v6894_v30, %v1943_v33  ;;  %v7376_v61 = vpop.f32.mrb[33].mxu0 }
 0xaee   :  { %v1957_v8 = vadd.f32 %v6894_v30, %v1948_v16  ;;  %v1976_v14 = vrot.slane %v1956_v0, %v1975_v31  ;;  %v1986_v3 = vrot.slane %v1956_v0, %v1985_v60  ;;  %v1996_v11 = vrot.slane %v1956_v0, %v8969_v32 }
 0xaef   :  { %v2006_v54 = vrot.slane %v1956_v0, %v8598_v43 }
 0xaf0   :  { %v1980_v17 = vrot.slane %v1957_v8, %v1975_v31  ;;  %v1990_v6 = vrot.slane %v1957_v8, %v1985_v60  ;;  %v2000_v37 = vrot.slane %v1957_v8, %v8969_v32  ;;  %v2014_v47 = vsel %vm2013_vm10, %v1976_v14, %v1986_v3 }
 0xaf1   :  { %v2010_v45 = vrot.slane %v1957_v8, %v8598_v43  ;;  %v2017_v63 = vsel %vm2016_vm11, %v2014_v47, %v1996_v11 }
 0xaf2   :  { %v2015_v49 = vsel %vm2013_vm10, %v1980_v17, %v1990_v6  ;;  %v2020_v4 = vsel %vm2019_vm12, %v2017_v63, %v2006_v54 }
 0xaf3   :  { %v2018_v57 = vsel %vm2016_vm11, %v2015_v49, %v2000_v37  ;;  %v8988_v44 = vsel %vm8974_vm13, %v1956_v0, %v2020_v4 }
 0xaf4   :  { %v2021_v59 = vsel %vm2019_vm12, %v2018_v57, %v2010_v45  ;;  %v2105_v12 = vadd.f32 %v2097_v25, %v8988_v44 }
 0xaf5   :  { %v8992_v40 = vsel %vm8974_vm13, %v1957_v8, %v2021_v59 }
 0xaf6   :  { %v2106_v52 = vadd.f32 %v2102_v9, %v8992_v40  ;;  %7983 = vtanh.f32 %v2105_v12  ;;  %v6895_v21 = vmul.f32 -1.442695, %v2105_v12 }
 0xaf8   :  { %7985 = vtanh.f32 %v2106_v52  ;;  %v6896_v5 = vmul.f32 -1.442695, %v2106_v52 }
 0xaf9   :  { %7987 = vpow2.f32 %v6895_v21 }
 0xafa   :  { %7989 = vpow2.f32 %v6896_v5 }
 0xb00   :  { %v7984_v18 = vpop.eup %7983 }
 0xb01   :  { %2125 = vrot.lane.b32.xlu1 %v7984_v18, %s8234_s1 }
 0xb02   :  { %v7986_v13 = vpop.eup %7985 }
 0xb03   :  { %2127 = vrot.lane.b32.xlu0 %v7986_v13, %s8234_s1  ;;  %v7988_v10 = vpop.eup %7987 }
 0xb04   :  { %v7990_v48 = vpop.eup %7989  ;;  %v2113_v42 = vadd.f32 1.0, %v7988_v10 }
 0xb05   :  { %v2114_v28 = vadd.f32 1.0, %v7990_v48 }
 0xb06   :  { %7991 = vrcp.f32 %v2113_v42 }
 0xb07   :  { %7993 = vrcp.f32 %v2114_v28 }
 0xb10   :  { %v7992_v22 = vpop.eup %7991 }
 0xb11   :  { %v7994_v15 = vpop.eup %7993  ;;  %v2121_v38 = vmul.f32 0.0, %v7992_v22 }
 0xb12   :  { %v2122_v25 = vmul.f32 0.0, %v7994_v15 }
 0xb73   :  { %v2126_v36 = vpop.permute.xlu1 %2125 }
 0xb74   :  { %v2131_v39 = vmul.f32 %v7992_v22, %v2126_v36 }
 0xb75   :  { %v2128_v27 = vpop.permute.xlu0 %2127 }
 0xb76   :  { %v2132_v35 = vmul.f32 %v7994_v15, %v2128_v27  ;;  %2135 = vrot.lane.b32.xlu0 %v2131_v39, %s8236_s2 }
 0xb78   :  { %2137 = vrot.lane.b32.xlu1 %v2132_v35, %s8236_s2 }
 0xbe8   :  { %v2136_v24 = vpop.permute.xlu0 %2135 }
 0xbe9   :  { %v2141_v56 = vadd.f32 %v2136_v24, %v2121_v38 }
 0xbea   :  { %v2138_v30 = vpop.permute.xlu1 %2137 }
 0xbeb   :  { %v2142_v31 = vadd.f32 %v2138_v30, %v2122_v25  ;;  %7995 = vtanh.f32 %v2141_v56  ;;  %v2255_v10 = vrot.slane %v2141_v56, 7 }
 0xbed   :  { %7997 = vtanh.f32 %v2142_v31  ;;  %v2256_v21 = vrot.slane %v2142_v31, 7 }
 0xbf5   :  { %v7996_v60 = vpop.eup %7995 }
 0xbf6   :  { %2147 = vrot.lane.b32.xlu0 %v7996_v60, %s8234_s1 }
 0xbf7   :  { %v7998_v33 = vpop.eup %7997 }
 0xbf8   :  { %2149 = vrot.lane.b32.xlu1 %v7998_v33, %s8234_s1 }
 0xc68   :  { %v2148_v16 = vpop.permute.xlu0 %2147 }
 0xc69   :  { %v9004_v34 = vmul.f32 %v7992_v22, %v2148_v16 }
 0xc6a   :  { %v2150_v0 = vpop.permute.xlu1 %2149 }
 0xc6b   :  { %v9002_v61 = vmul.f32 %v7994_v15, %v2150_v0 }
 0xc6d   :  { %v2157_v8 = vrot.slane %v9002_v61, 7 }
 0xc6f   :  { %v2158_v14 = vsel %vm119_vm2, %v2157_v8, %v9004_v34 }
 0xc70   :  { %2159 = vrot.lane.b32.xlu1 %v2158_v14, %s8236_s2 }
 0xce2   :  { %v2160_v3 = vpop.permute.xlu1 %2159 }
 0xce3   :  { %7397 = vmatmul.mubr.msk.f32.vlgmr.msra.gmra.mrb[34].mxu0 %vm121_vm0, %v2160_v3 }
 0xce4   :  { %7755 = vmatpush3.bf16.msra.mxu0 %v8928_v46  ;;  %7418 = vmatprep.mubr.msk.f32.mxu0 %vm8231_vm1, %v8232_v55 }
 0xce5   :  { %7756 = vmatprep.subr.bf16.mxu0 %v8230_v19 }
 0xce8   :  { %7758 = vmatpush3.bf16.msra.mxu0 %v8938_v2 }
 0xdb6   :  { %v2229_v11 = vpop.f32.mrb[34].mxu0 }
 0xdb7   :  { %v2234_v17 = vrot.slane %v2229_v11, 7  ;;  %v2238_v6 = vadd.f32 %v2229_v11, %v8992_v40  ;;  %v7398_v37 = vpop.f32.mrb[35].mxu0 }
 0xdb9   :  { %v2237_v54 = vadd.f32 %v2234_v17, %v8988_v44  ;;  %7999 = vtanh.f32 %v2238_v6  ;;  %v6899_v45 = vmul.f32 -1.442695, %v2238_v6 }
 0xdbb   :  { %8001 = vtanh.f32 %v2237_v54  ;;  %v6898_v49 = vmul.f32 -1.442695, %v2237_v54 }
 0xdbc   :  { %8003 = vpow2.f32 %v6899_v45 }
 0xdbd   :  { %8005 = vpow2.f32 %v6898_v49 }
 0xdc3   :  { %v8000_v47 = vpop.eup %7999 }
 0xdc4   :  { %2265 = vrot.lane.b32.xlu1 %v8000_v47, %s8234_s1 }
 0xdc5   :  { %v8002_v46 = vpop.eup %8001 }
 0xdc6   :  { %2263 = vrot.lane.b32.xlu0 %v8002_v46, %s8234_s1  ;;  %v8004_v2 = vpop.eup %8003 }
 0xdc7   :  { %v8006_v63 = vpop.eup %8005  ;;  %v2246_v9 = vadd.f32 1.0, %v8004_v2 }
 0xdc8   :  { %v2245_v57 = vadd.f32 1.0, %v8006_v63 }
 0xdc9   :  { %8007 = vrcp.f32 %v2246_v9 }
 0xdca   :  { %8009 = vrcp.f32 %v2245_v57 }
 0xdd3   :  { %v8008_v4 = vpop.eup %8007 }
 0xdd4   :  { %v8010_v52 = vpop.eup %8009  ;;  %v2260_v5 = vmul.f32 %v8008_v4, %v2256_v21 }
 0xdd5   :  { %v2259_v28 = vmul.f32 %v8010_v52, %v2255_v10 }
 0xe36   :  { %v2266_v59 = vpop.permute.xlu1 %2265 }
 0xe37   :  { %v2270_v12 = vmul.f32 %v8008_v4, %v2266_v59 }
 0xe38   :  { %v2264_v18 = vpop.permute.xlu0 %2263 }
 0xe39   :  { %2275 = vrot.lane.b32.xlu1 %v2270_v12, %s8236_s2  ;;  %v2269_v13 = vmul.f32 %v8010_v52, %v2264_v18 }
 0xe3b   :  { %2273 = vrot.lane.b32.xlu0 %v2269_v13, %s8236_s2 }
 0xeab   :  { %v2276_v48 = vpop.permute.xlu1 %2275 }
 0xeac   :  { %v2280_v42 = vadd.f32 %v2276_v48, %v2260_v5 }
 0xead   :  { %v2274_v22 = vpop.permute.xlu0 %2273 }
 0xeae   :  { %8011 = vtanh.f32 %v2280_v42  ;;  %v2279_v36 = vadd.f32 %v2274_v22, %v2259_v28 }
 0xeb0   :  { %8013 = vtanh.f32 %v2279_v36  ;;  %v2394_v57 = vrot.slane %v2279_v36, 7 }
 0xeb8   :  { %v8012_v15 = vpop.eup %8011 }
 0xeb9   :  { %2287 = vrot.lane.b32.xlu1 %v8012_v15, %s8234_s1 }
 0xeba   :  { %v8014_v39 = vpop.eup %8013 }
 0xebb   :  { %2285 = vrot.lane.b32.xlu0 %v8014_v39, %s8234_s1 }
 0xf2b   :  { %v2288_v27 = vpop.permute.xlu1 %2287 }
 0xf2c   :  { %v9026_v24 = vmul.f32 %v8008_v4, %v2288_v27  ;;  %v2395_v4 = vrot.slane %v2280_v42, 7 }
 0xf2d   :  { %v2286_v35 = vpop.permute.xlu0 %2285 }
 0xf2e   :  { %v9024_v38 = vmul.f32 %v8010_v52, %v2286_v35  ;;  %v2573_v39 = vsel %vm2013_vm10, %v9002_v61, %v9026_v24 }
 0xf30   :  { %v2295_v25 = vrot.slane %v9024_v38, 1  ;;  %v2572_v42 = vsel %vm2013_vm10, %v9004_v34, %v9024_v38 }
 0xf32   :  { %v2296_v56 = vsel %vm119_vm2, %v9026_v24, %v2295_v25 }
 0xf33   :  { %2297 = vrot.lane.b32.xlu0 %v2296_v56, %s8236_s2 }
 0xfa5   :  { %v2298_v30 = vpop.permute.xlu0 %2297 }
 0xfa6   :  { %7408 = vmatmul.mubr.msk.f32.vlgmr.msra.gmra.mrb[20].mxu1 %vm121_vm0, %v2298_v30 }
 0xfa7   :  { %7429 = vmatprep.mubr.msk.f32.mxu1 %vm8231_vm1, %v8232_v55 }
0x1079   :  { %v2367_v31 = vpop.f32.mrb[20].mxu1 }
0x107a   :  { %v2372_v60 = vrot.slane %v2367_v31, 6  ;;  %v2373_v33 = vrot.slane %v2367_v31, 7  ;;  %v7409_v16 = vpop.f32.mrb[21].mxu1 }
0x107c   :  { %v2376_v0 = vadd.f32 %v2372_v60, %v8988_v44  ;;  %v2377_v8 = vadd.f32 %v2373_v33, %v8992_v40 }
0x107e   :  { %8015 = vtanh.f32 %v2376_v0  ;;  %v6901_v11 = vmul.f32 -1.442695, %v2376_v0  ;;  %v6902_v17 = vmul.f32 -1.442695, %v2377_v8 }
0x107f   :  { %8017 = vtanh.f32 %v2377_v8 }
0x1080   :  { %8019 = vpow2.f32 %v6901_v11 }
0x1081   :  { %8021 = vpow2.f32 %v6902_v17 }
0x1088   :  { %v8016_v14 = vpop.eup %8015 }
0x1089   :  { %v8018_v3 = vpop.eup %8017  ;;  %2402 = vrot.lane.b32.xlu1 %v8016_v14, %s8234_s1 }
0x108a   :  { %2404 = vrot.lane.b32.xlu0 %v8018_v3, %s8234_s1  ;;  %v8020_v6 = vpop.eup %8019 }
0x108b   :  { %v8022_v37 = vpop.eup %8021  ;;  %v2384_v54 = vadd.f32 1.0, %v8020_v6 }
0x108c   :  { %v2385_v47 = vadd.f32 1.0, %v8022_v37 }
0x108d   :  { %8023 = vrcp.f32 %v2384_v54 }
0x108e   :  { %8025 = vrcp.f32 %v2385_v47 }
0x1097   :  { %v8024_v46 = vpop.eup %8023 }
0x1098   :  { %v8026_v49 = vpop.eup %8025  ;;  %v2398_v59 = vmul.f32 %v8024_v46, %v2394_v57 }
0x1099   :  { %v2399_v12 = vmul.f32 %v8026_v49, %v2395_v4 }
0x10fb   :  { %v2403_v45 = vpop.permute.xlu1 %2402 }
0x10fc   :  { %v2405_v2 = vpop.permute.xlu0 %2404  ;;  %v2408_v63 = vmul.f32 %v8024_v46, %v2403_v45 }
0x10fd   :  { %v2409_v9 = vmul.f32 %v8026_v49, %v2405_v2 }
0x10fe   :  { %2412 = vrot.lane.b32.xlu1 %v2408_v63, %s8236_s2 }
0x10ff   :  { %2414 = vrot.lane.b32.xlu0 %v2409_v9, %s8236_s2 }
0x1170   :  { %v2413_v52 = vpop.permute.xlu1 %2412 }
0x1171   :  { %v2415_v18 = vpop.permute.xlu0 %2414  ;;  %v2418_v13 = vadd.f32 %v2413_v52, %v2398_v59 }
0x1172   :  { %v2419_v21 = vadd.f32 %v2415_v18, %v2399_v12 }
0x1173   :  { %8027 = vtanh.f32 %v2418_v13  ;;  %v2534_v63 = vrot.slane %v2418_v13, 7  ;;  %v6907_v13 = vld [vmem:[%s10012_s13 + $0x28] sm:$0xff] }
0x1174   :  { %8029 = vtanh.f32 %v2419_v21  ;;  %v2535_v9 = vrot.slane %v2419_v21, 7 }
0x117d   :  { %v8028_v5 = vpop.eup %8027 }
0x117e   :  { %v8030_v10 = vpop.eup %8029  ;;  %2424 = vrot.lane.b32.xlu1 %v8028_v5, %s8234_s1 }
0x117f   :  { %2426 = vrot.lane.b32.xlu0 %v8030_v10, %s8234_s1 }
0x11f0   :  { %v2425_v48 = vpop.permute.xlu1 %2424 }
0x11f1   :  { %v2427_v28 = vpop.permute.xlu0 %2426  ;;  %v9043_v22 = vmul.f32 %v8024_v46, %v2425_v48  ;;  %v6906_v48 = vld [vmem:[%s10012_s13 + $0x20] sm:$0xff] }
0x11f2   :  { %v9045_v36 = vmul.f32 %v8026_v49, %v2427_v28  ;;  %v7760_v21 = vpack.c.bf16 %v6907_v13, %v6906_v48  ;;  %v6908_v28 = vld [vmem:[%s10012_s13 + $0x30] sm:$0xff] }
0x11f3   :  { %v2434_v15 = vrot.slane %v9043_v22, 2  ;;  %v9056_v27 = vsel %vm2016_vm11, %v2572_v42, %v9043_v22  ;;  %v6909_v42 = vld [vmem:[%s10012_s13 + $0x38] sm:$0xff] }
0x11f4   :  { %v2435_v35 = vrot.slane %v9045_v36, 1  ;;  %v9061_v25 = vsel %vm2016_vm11, %v2573_v39, %v9045_v36  ;;  %7761 = vmatpush3.bf16.msra.mxu1 %v7760_v21 }
0x11f5   :  { %7762 = vmatprep.subr.bf16.mxu1 %v8230_v19 }
0x11f6   :  { %v2436_v56 = vsel %vm119_vm2, %v2435_v35, %v2434_v15  ;;  %v7763_v15 = vpack.c.bf16 %v6909_v42, %v6908_v28 }
0x11f7   :  { %2437 = vrot.lane.b32.xlu1 %v2436_v56, %s8236_s2 }
0x11f8   :  { %7764 = vmatpush3.bf16.msra.mxu1 %v7763_v15 }
0x1269   :  { %v2438_v30 = vpop.permute.xlu1 %2437 }
0x126a   :  { %7419 = vmatmul.mubr.msk.f32.vlgmr.msra.gmra.mrb[36].mxu0 %vm121_vm0, %v2438_v30 }
0x133d   :  { %v2507_v31 = vpop.f32.mrb[36].mxu0 }
0x133e   :  { %v2512_v60 = vrot.slane %v2507_v31, 5  ;;  %v2513_v33 = vrot.slane %v2507_v31, 6  ;;  %v7420_v16 = vpop.f32.mrb[37].mxu0 }
0x1340   :  { %v2516_v0 = vadd.f32 %v2512_v60, %v8988_v44  ;;  %v2517_v8 = vadd.f32 %v2513_v33, %v8992_v40  ;;  %v2584_v60 = vrot.slane %v9043_v22, 1 }
0x1342   :  { %8031 = vtanh.f32 %v2516_v0  ;;  %v6904_v11 = vmul.f32 -1.442695, %v2516_v0  ;;  %v6905_v17 = vmul.f32 -1.442695, %v2517_v8  ;;  %v2587_v0 = vrot.slane %v9024_v38, 7 }
0x1343   :  { %8033 = vtanh.f32 %v2517_v8 }
0x1344   :  { %8035 = vpow2.f32 %v6904_v11  ;;  %v2591_v11 = vrot.slane %v9004_v34, 5 }
0x1345   :  { %8037 = vpow2.f32 %v6905_v17  ;;  %v2592_v17 = vrot.slane %v9002_v61, 5 }
0x134c   :  { %v8032_v14 = vpop.eup %8031 }
0x134d   :  { %v8034_v3 = vpop.eup %8033  ;;  %2542 = vrot.lane.b32.xlu0 %v8032_v14, %s8234_s1 }
0x134e   :  { %2544 = vrot.lane.b32.xlu1 %v8034_v3, %s8234_s1  ;;  %v8036_v6 = vpop.eup %8035  ;;  %v2588_v3 = vrot.slane %v9026_v24, 7 }
0x134f   :  { %v8038_v37 = vpop.eup %8037  ;;  %v2524_v54 = vadd.f32 1.0, %v8036_v6 }
0x1350   :  { %v2525_v47 = vadd.f32 1.0, %v8038_v37 }
0x1351   :  { %8039 = vrcp.f32 %v2524_v54 }
0x1352   :  { %8041 = vrcp.f32 %v2525_v47 }
0x135b   :  { %v8040_v44 = vpop.eup %8039 }
0x135c   :  { %v8042_v46 = vpop.eup %8041  ;;  %v2538_v57 = vmul.f32 %v8040_v44, %v2534_v63 }
0x135d   :  { %v2539_v4 = vmul.f32 %v8042_v46, %v2535_v9 }
0x13bf   :  { %v2543_v40 = vpop.permute.xlu0 %2542 }
0x13c0   :  { %v2545_v45 = vpop.permute.xlu1 %2544  ;;  %v2548_v49 = vmul.f32 %v8040_v44, %v2543_v40 }
0x13c1   :  { %v2549_v2 = vmul.f32 %v8042_v46, %v2545_v45 }
0x13c2   :  { %2552 = vrot.lane.b32.xlu0 %v2548_v49, %s8236_s2 }
0x13c3   :  { %2554 = vrot.lane.b32.xlu1 %v2549_v2, %s8236_s2 }
0x1434   :  { %v2553_v59 = vpop.permute.xlu0 %2552 }
0x1435   :  { %v2555_v12 = vpop.permute.xlu1 %2554  ;;  %v2558_v52 = vadd.f32 %v2553_v59, %v2538_v57 }
0x1436   :  { %v2559_v18 = vadd.f32 %v2555_v12, %v2539_v4 }
0x1437   :  { %8043 = vtanh.f32 %v2558_v52 }
0x1438   :  { %8045 = vtanh.f32 %v2559_v18 }
0x1441   :  { %v8044_v5 = vpop.eup %8043 }
0x1442   :  { %v8046_v10 = vpop.eup %8045  ;;  %2564 = vrot.lane.b32.xlu0 %v8044_v5, %s8234_s1 }
0x1443   :  { %2566 = vrot.lane.b32.xlu1 %v8046_v10, %s8234_s1 }
0x14b4   :  { %v2565_v39 = vpop.permute.xlu0 %2564 }
0x14b5   :  { %v2567_v56 = vpop.permute.xlu1 %2566  ;;  %v2570_v30 = vmul.f32 %v8040_v44, %v2565_v39  ;;  %v6912_v44 = vld [vmem:[%s10013_s14 + $0x1] ss:$0 sm:$0xff] }
0x14b6   :  { %v2571_v31 = vmul.f32 %v8042_v46, %v2567_v56 }
0x14b7   :  { %v2580_v33 = vrot.slane %v2570_v30, 3  ;;  %v2576_v16 = vsel %vm2019_vm12, %v9056_v27, %v2570_v30  ;;  %v9163_v30 = vld [vmem:[%s10056_s30] sm:$0x1] }
0x14b8   :  { %v2581_v8 = vrot.slane %v2571_v31, 3  ;;  %v2577_v14 = vsel %vm2019_vm12, %v9061_v25, %v2571_v31  ;;  %2605 = vrot.lane.b32.xlu0 %v2576_v16, %s8236_s2  ;;  %v9168_v31 = vld [vmem:[%s10056_s30 + $0x1] sm:$0x1] }
0x14b9   :  { %2607 = vrot.lane.b32.xlu1 %v2577_v14, %s8236_s2  ;;  %v2595_v22 = vsel %vm2013_vm10, %v2580_v33, %v2584_v60  ;;  %v2623_v60 = vsub.f32 1.0, %v9163_v30  ;;  %v2624_v33 = vsub.f32 1.0, %v9168_v31 }
0x14ba   :  { %v2596_v38 = vsel %vm2013_vm10, %v2581_v8, %v2435_v35  ;;  %v2597_v27 = vsel %vm2016_vm11, %v2595_v22, %v2587_v0 }
0x14bb   :  { %v2598_v25 = vsel %vm2016_vm11, %v2596_v38, %v2588_v3  ;;  %v2599_v6 = vsel %vm2019_vm12, %v2597_v27, %v2591_v11  ;;  %v2625_v16 = vmul.f32 -10000.0, %v2623_v60  ;;  %v2626_v0 = vmul.f32 -10000.0, %v2624_v33 }
0x14bc   :  { %v2600_v24 = vsel %vm2019_vm12, %v2598_v25, %v2592_v17  ;;  %2613 = vrot.lane.b32.xlu0 %v2599_v6, %s8236_s2 }
0x14bd   :  { %2615 = vrot.lane.b32.xlu1 %v2600_v24, %s8236_s2  ;;  %v2926_v14 = vrot.slane %v2625_v16, %v8598_v43  ;;  %v2930_v38 = vrot.slane %v2626_v0, %v8598_v43 }
0x152a   :  { %v2606_v34 = vpop.permute.xlu0 %2605 }
0x152b   :  { %v2608_v37 = vpop.permute.xlu1 %2607 }
0x152e   :  { %v2614_v54 = vpop.permute.xlu0 %2613 }
0x152f   :  { %v2616_v61 = vpop.permute.xlu1 %2615  ;;  %v9112_v36 = vsel %vm446_vm6, %v2606_v34, %v2614_v54 }
0x1530   :  { %v9116_v35 = vsel %vm446_vm6, %v2608_v37, %v2616_v61 }
0x1531   :  { %v2634_v47 = vcombine.low %v9112_v36, %v9116_v35 }
0x1533   :  { %7430 = vmatmul.mubr.msk.f32.vlgmr.msra.gmra.mrb[22].mxu1 %vm121_vm0, %v2634_v47 }
0x1606   :  { %v2703_v40 = vpop.f32.mrb[22].mxu1 }
0x1607   :  { %v2708_v46 = vcombine.high %v2703_v40, %v2703_v40  ;;  %v9124_v45 = vadd.f32 %v6912_v44, %v2703_v40  ;;  %v7431_v49 = vpop.f32.mrb[23].mxu1 }
0x1609   :  { %v9126_v2 = vadd.f32 %v6912_v44, %v2708_v46  ;;  %2746 = vrot.lane.b32.xlu0 %v9124_v45, %s8233_s29  ;;  %v2722_v63 = vmul.f32 %v8542_v20, %v9124_v45  ;;  %v2720_v9 = vmul.f32 %v8506_v62, %v9124_v45  ;;  %v2726_v5 = vmul.f32 %v8559_v26, %v9124_v45 }
0x160a   :  { %v2724_v28 = vmul.f32 %v8550_v23, %v9124_v45 }
0x160b   :  { %2832 = vrot.lane.b32.xlu1 %v9126_v2, %s8233_s29  ;;  %v2730_v57 = vcombine.low %v2722_v63, %v2722_v63  ;;  %v2723_v4 = vmul.f32 %v8542_v20, %v9126_v2  ;;  %v2721_v12 = vmul.f32 %v8506_v62, %v9126_v2  ;;  %v2727_v10 = vmul.f32 %v8559_v26, %v9126_v2 }
0x160c   :  { %v2736_v13 = vcombine.low %v2726_v5, %v2726_v5  ;;  %v2725_v39 = vmul.f32 %v8550_v23, %v9126_v2 }
0x160d   :  { %v2741_v59 = vsel %vm2740_vm15, %v2720_v9, %v2730_v57  ;;  %v2731_v52 = vcombine.low %v2723_v4, %v2723_v4  ;;  %v2737_v42 = vcombine.low %v2727_v10, %v2727_v10 }
0x160e   :  { %7434 = vmatprep.mubr.msk.f32.mxu0 %vm121_vm0, %v2741_v59  ;;  %v2743_v15 = vsel %vm2740_vm15, %v2724_v28, %v2736_v13 }
0x160f   :  { %v2742_v18 = vsel %vm2740_vm15, %v2721_v12, %v2731_v52  ;;  %v2744_v56 = vsel %vm2740_vm15, %v2725_v39, %v2737_v42 }
0x1610   :  { %7439 = vmatprep.mubr.msk.f32.mxu1 %vm121_vm0, %v2742_v18 }
0x167b   :  { %v2747_v48 = vpop.permute.xlu0 %2746 }
0x167c   :  { %7432 = vmatprep.subr.msk.mxu0 %vm121_vm0, %v2747_v48 }
0x167d   :  { %7433 = vmatpush3.xpose.msk.msra.mxu0 %vm121_vm0, %v2747_v48  ;;  %v2833_v21 = vpop.permute.xlu1 %2832 }
0x167e   :  { %7437 = vmatprep.subr.msk.mxu1 %vm121_vm0, %v2833_v21 }
0x167f   :  { %7438 = vmatpush3.xpose.msk.msra.mxu1 %vm121_vm0, %v2833_v21 }
0x1680   :  { %7435 = vmatmul.mubr.msk.f32.vlgmr.msra.gmra.mrb[38].mxu0 %vm121_vm0, %v2743_v15 }
0x1682   :  { %7440 = vmatmul.mubr.msk.f32.vlgmr.msra.gmra.mrb[24].mxu1 %vm121_vm0, %v2744_v56 }
0x1753   :  { %v7436_v8 = vpop.f32.mrb[38].mxu0 }
0x1754   :  { %v2822_v3 = vpop.f32.mrb[39].mxu0  ;;  %v2918_v11 = vmul.f32 0.35355338, %v7436_v8 }
0x1755   :  { %v2917_v22 = vmul.f32 0.35355338, %v2822_v3  ;;  %v7441_v17 = vpop.f32.mrb[24].mxu1 }
0x1756   :  { %v2908_v27 = vpop.f32.mrb[25].mxu1  ;;  %v2920_v24 = vmul.f32 0.35355338, %v7441_v17  ;;  %v2934_v54 = vadd.f32 %v2926_v14, %v2918_v11 }
0x1757   :  { %v2919_v25 = vmul.f32 0.35355338, %v2908_v27  ;;  %v2933_v6 = vadd.f32 %v2926_v14, %v2917_v22 }
0x1758   :  { %v2941_v47 = vsel %vm2937_vm3, %v2934_v54, -inf  ;;  %v2936_v44 = vadd.f32 %v2930_v38, %v2920_v24 }
0x1759   :  { %v2935_v34 = vadd.f32 %v2930_v38, %v2919_v25  ;;  %v2938_v37 = vsel %vm2937_vm3, %v2933_v6, -inf  ;;  %v6925_v25 = vld [vmem:[%s10014_s15 + $0x20] sm:$0xff] }
0x175a   :  { %2939 = vmax.xlane.f32.xlu0 %v2938_v37  ;;  %v2947_v40 = vsel %vm2937_vm3, %v2936_v44, -inf  ;;  %v6928_v37 = vld [vmem:[%s10014_s15 + $0x38] sm:$0xff] }
0x175b   :  { %v2944_v61 = vsel %vm2937_vm3, %v2935_v34, -inf }
0x175c   :  { %2945 = vmax.xlane.f32.xlu1 %v2944_v61 }
0x175e   :  { %2942 = vmax.xlane.f32.xlu0 %v2941_v47 }
0x1762   :  { %2948 = vmax.xlane.f32.xlu0 %v2947_v40 }
0x17e7   :  { %v2940_v46 = vpop.xlane.xlu0 %2939 }
0x17e8   :  { %v2950_v49 = vsub.f32 %v2933_v6, %v2940_v46  ;;  %v6926_v6 = vld [vmem:[%s10014_s15 + $0x28] sm:$0xff] }
0x17e9   :  { %v2946_v63 = vpop.xlane.xlu1 %2945  ;;  %v7766_v24 = vpack.c.bf16 %v6926_v6, %v6925_v25 }
0x17ea   :  { %v2954_v4 = vmul.f32 1.442695, %v2950_v49  ;;  %v2952_v59 = vsub.f32 %v2935_v34, %v2946_v63  ;;  %v6927_v34 = vld [vmem:[%s10014_s15 + $0x30] sm:$0xff] }
0x17eb   :  { %v2943_v9 = vpop.xlane.xlu0 %2942 }
0x17ec   :  { %v2951_v57 = vsub.f32 %v2934_v54, %v2943_v9  ;;  %v2958_v5 = vmul.f32 1.442695, %v2952_v59  ;;  %v7769_v54 = vpack.c.bf16 %v6928_v37, %v6927_v34 }
0x17ee   :  { %v2956_v12 = vmul.f32 1.442695, %v2951_v57 }
0x17ef   :  { %v2949_v52 = vpop.xlane.xlu0 %2948 }
0x17f0   :  { %8047 = vpow2.f32 %v2956_v12  ;;  %v2953_v18 = vsub.f32 %v2936_v44, %v2949_v52 }
0x17f1   :  { %8049 = vpow2.f32 %v2954_v4 }
0x17f2   :  { %v2960_v10 = vmul.f32 1.442695, %v2953_v18 }
0x17f4   :  { %8051 = vpow2.f32 %v2960_v10 }
0x17f5   :  { %8053 = vpow2.f32 %v2958_v5 }
0x17fa   :  { %v8048_v48 = vpop.eup %8047 }
0x17fb   :  { %v2965_v13 = vsel %vm2937_vm3, %v8048_v48, 0.0  ;;  %v8050_v21 = vpop.eup %8049 }
0x17fc   :  { %2966 = vadd.xlane.f32.xlu1 %v2965_v13  ;;  %v2962_v42 = vsel %vm2937_vm3, %v8050_v21, 0.0 }
0x17fe   :  { %v8052_v28 = vpop.eup %8051 }
0x17ff   :  { %v2971_v15 = vsel %vm2937_vm3, %v8052_v28, 0.0  ;;  %v8054_v39 = vpop.eup %8053 }
0x1800   :  { %2963 = vadd.xlane.f32.xlu1 %v2962_v42  ;;  %2972 = vadd.xlane.f32.xlu0 %v2971_v15  ;;  %v2968_v56 = vsel %vm2937_vm3, %v8054_v39, 0.0 }
0x1804   :  { %2969 = vadd.xlane.f32.xlu0 %v2968_v56  ;;  %v6931_v56 = vld [vmem:[%s10015_s16 + $0x1] ss:$0 sm:$0xff] }
0x1811   :  { %2982 = vrot.lane.b32.xlu1 %v9124_v45, %s8234_s1 }
0x181a   :  { %3067 = vrot.lane.b32.xlu0 %v9126_v2, %s8234_s1 }
0x1889   :  { %v2967_v60 = vpop.xlane.xlu1 %2966 }
0x188a   :  { %8055 = vrcp.f32 %v2967_v60 }
0x188d   :  { %v2964_v33 = vpop.xlane.xlu1 %2963  ;;  %v2973_v16 = vpop.xlane.xlu0 %2972 }
0x188e   :  { %8057 = vrcp.f32 %v2964_v33 }
0x188f   :  { %8059 = vrcp.f32 %v2973_v16 }
0x1891   :  { %v2983_v0 = vpop.permute.xlu1 %2982  ;;  %v2970_v8 = vpop.xlane.xlu0 %2969 }
0x1892   :  { %8061 = vrcp.f32 %v2970_v8  ;;  %7442 = vmatprep.subr.msk.mxu0 %vm2740_vm15, %v2983_v0 }
0x1893   :  { %7443 = vmatpush3.msk.msra.mxu0 %vm2740_vm15, %v2983_v0 }
0x1894   :  { %7765 = vmatprep.subr.bf16.mxu0 %v8230_v19  ;;  %v8056_v45 = vpop.eup %8055 }
0x1895   :  { %v3068_v14 = vpop.permute.xlu0 %3067  ;;  %v2977_v11 = vmul.f32 %v8056_v45, %v8048_v48 }
0x1896   :  { %7447 = vmatprep.subr.msk.mxu1 %vm2740_vm15, %v3068_v14 }
0x1897   :  { %7448 = vmatpush3.msk.msra.mxu1 %vm2740_vm15, %v3068_v14 }
0x1898   :  { %v8058_v2 = vpop.eup %8057  ;;  %7463 = vmatprep.subr.mxu1 %v8232_v55 }
0x1899   :  { %v2975_v3 = vmul.f32 %v8058_v2, %v8050_v21  ;;  %v8060_v22 = vpop.eup %8059 }
0x189a   :  { %v2981_v27 = vmul.f32 %v8060_v22, %v8052_v28 }
0x189b   :  { %7444 = vmatprep.mubr.msk.f32.mxu0 %vm2937_vm3, %v2975_v3  ;;  %v3486_v3 = vld [vmem:[%s10057_s3] sm:$0x3f] }
0x189c   :  { %v8062_v17 = vpop.eup %8061  ;;  %7445 = vmatmul.mubr.msk.f32.vlgmr.msra.gmra.mrb[40].mxu0 %vm2937_vm3, %v2977_v11  ;;  %v3490_v11 = vadd.s32 1, %v3486_v3 }
0x189d   :  { %v2979_v38 = vmul.f32 %v8062_v17, %v8054_v39  ;;  %7460 = vmatprep.mubr.msk.f32.mxu0 %vm8231_vm1, %v8232_v55  ;;  %7767 = vmatpush3.bf16.msra.mxu0 %v7766_v24  ;;  %v3489_v24 = vld [vmem:[%s10058_s28 + $0x8] sm:$0x3f] }
0x189e   :  { %7768 = vmatprep.subr.bf16.mxu0 %v8230_v19 }
0x189f   :  { %7449 = vmatprep.mubr.msk.f32.mxu1 %vm2937_vm3, %v2979_v38 }
0x18a0   :  { %7450 = vmatmul.mubr.msk.f32.vlgmr.msra.gmra.mrb[26].mxu1 %vm2937_vm3, %v2981_v27 }
0x18a1   :  { %7465 = vmatprep.mubr.msk.f32.mxu1 %vm8231_vm1, %v8232_v55  ;;  %7770 = vmatpush3.bf16.msra.mxu0 %v7769_v54 }
0x18a2   :  { %7771 = vmatprep.subr.bf16.mxu0 %v8230_v19 }
0x196f   :  { %v7446_v61 = vpop.f32.mrb[40].mxu0 }
0x1970   :  { %v3058_v47 = vpop.f32.mrb[41].mxu0  ;;  %v3168_v40 = vmul.f32 %v7446_v61, %v8559_v26  ;;  %v3164_v57 = vmul.f32 %v7446_v61, %v8550_v23  ;;  %v3488_v61 = vld [vmem:[%s10058_s28] sm:$0x3f] }
0x1971   :  { %v3154_v44 = vmul.f32 %v8542_v20, %v3058_v47  ;;  %v3152_v46 = vmul.f32 %v8506_v62, %v3058_v47 }
0x1972   :  { %v3172_v12 = vrot.slane %v3168_v40, 4 }
0x1973   :  { %v3158_v49 = vrot.slane %v3154_v44, 4  ;;  %v7451_v63 = vpop.f32.mrb[26].mxu1  ;;  %v3514_v44 = vsub.s32 %v3488_v61, %v3486_v3 }
0x1974   :  { %v3143_v9 = vpop.f32.mrb[27].mxu1  ;;  %v3169_v18 = vmul.f32 %v7451_v63, %v8559_v26  ;;  %v3165_v13 = vmul.f32 %v7451_v63, %v8550_v23 }
0x1975   :  { %v3162_v4 = vadd.f32 %v3158_v49, %v3152_v46  ;;  %v3155_v59 = vmul.f32 %v8542_v20, %v3143_v9  ;;  %v3153_v5 = vmul.f32 %v8506_v62, %v3143_v9  ;;  %v6942_v46 = vadd.s32 4294967295, %v3514_v44 }
0x1976   :  { %v3173_v28 = vrot.slane %v3169_v18, 4 }
0x1977   :  { %v3166_v52 = vadd.f32 %v3164_v57, %v3162_v4  ;;  %v3159_v10 = vrot.slane %v3155_v59, 4  ;;  %v3518_v63 = vcvt.s32.f32 %v6942_v46 }
0x1979   :  { %v3176_v48 = vadd.f32 %v3172_v12, %v3166_v52  ;;  %v3163_v21 = vadd.f32 %v3159_v10, %v3153_v5 }
0x197b   :  { %v3167_v42 = vadd.f32 %v3165_v13, %v3163_v21 }
0x197d   :  { %v3177_v15 = vadd.f32 %v3173_v28, %v3167_v42 }
0x197f   :  { %v3185_v39 = vcombine.low %v3176_v48, %v3177_v15  ;;  %v6934_v15 = vld [vmem:[%s10016_s17 + $0x1] ss:$0 sm:$0xff] }
0x1981   :  { %7461 = vmatmul.mubr.msk.f32.vlgmr.msra.gmra.mrb[42].mxu0 %vm121_vm0, %v3185_v39 }
0x1982   :  { %7773 = vmatpush3.bf16.msra.mxu0 %v8867_v50  ;;  %7477 = vmatprep.mubr.msk.f32.mxu0 %vm8231_vm1, %v8232_v55 }
0x1a54   :  { %v3254_v60 = vpop.f32.mrb[42].mxu0 }
0x1a55   :  { %v3259_v33 = vcombine.high %v3254_v60, %v3254_v60  ;;  %v3269_v16 = vadd.f32 %v6931_v56, %v3254_v60  ;;  %v7462_v0 = vpop.f32.mrb[43].mxu0  ;;  %v6935_v60 = vld [vmem:[%s10017_s18 + $0x1] ss:$0 sm:$0xff] }
0x1a57   :  { %v3270_v8 = vadd.f32 %v6931_v56, %v3259_v33  ;;  %v3271_v14 = vadd.f32 %v3269_v16, %v9112_v36 }
0x1a59   :  { %v3277_v45 = vsel %vm1820_vm9, %v3271_v14, 0.0  ;;  %v3272_v2 = vadd.f32 %v3270_v8, %v9116_v35  ;;  %v3487_v35 = vld [vmem:[%s10057_s3 + $0x8] sm:$0x3f] }
0x1a5a   :  { %3278 = vadd.xlane.f32.xlu1 %v3277_v45  ;;  %v3515_v54 = vsub.s32 %v3489_v24, %v3487_v35  ;;  %v3491_v9 = vadd.s32 1, %v3487_v35 }
0x1a5b   :  { %v3280_v50 = vsel %vm1820_vm9, %v3272_v2, 0.0 }
0x1a5c   :  { %3281 = vadd.xlane.f32.xlu0 %v3280_v50  ;;  %v6943_v40 = vadd.s32 4294967295, %v3515_v54 }
0x1a5e   :  { %v3519_v49 = vcvt.s32.f32 %v6943_v40 }
0x1a60   :  { %8063 = vrcp.f32 %v3519_v49 }
0x1a61   :  { %8065 = vrcp.f32 %v3518_v63  ;;  %v6950_v63 = vld [vmem:[%s10020_s21 + $0x20] sm:$0xff] }
0x1a6a   :  { %v8064_v57 = vpop.eup %8063 }
0x1a6b   :  { %3493 = vperm.xlu1 %7894, %v3490_v11   ;;  %v8066_v4 = vpop.eup %8065 }
0x1ae7   :  { %v3279_v22 = vpop.xlane.xlu1 %3278 }
0x1ae8   :  { %v3283_v17 = vmul.f32 0.03125, %v3279_v22 }
0x1ae9   :  { %v3282_v38 = vpop.xlane.xlu0 %3281 }
0x1aea   :  { %v3285_v27 = vsub.f32 %v3271_v14, %v3283_v17  ;;  %v3284_v25 = vmul.f32 0.03125, %v3282_v38 }
0x1aeb   :  { %v3494_v59 = vpop.permute.xlu1 %3493 }
0x1aec   :  { %v3286_v36 = vsub.f32 %v3272_v2, %v3284_v25  ;;  %v3287_v6 = vmul.f32 %v3285_v27, %v3285_v27  ;;  %vm3498_vm4 = vcmp.ge.s32.totalorder %v8499_v58, %v3494_v59  ;;  %v6953_v59 = vld [vmem:[%s10020_s21 + $0x38] sm:$0xff] }
0x1aee   :  { %v3289_v34 = vsel %vm1820_vm9, %v3287_v6, 0.0  ;;  %v3288_v37 = vmul.f32 %v3286_v36, %v3286_v36 }
0x1aef   :  { %3290 = vadd.xlane.f32.xlu1 %v3289_v34 }
0x1af0   :  { %v3292_v47 = vsel %vm1820_vm9, %v3288_v37, 0.0 }
0x1af1   :  { %3293 = vadd.xlane.f32.xlu0 %v3292_v47 }
0x1b00   :  { %3496 = vperm.xlu1 %7894, %v3491_v9   ;;  %v6951_v9 = vld [vmem:[%s10020_s21 + $0x28] sm:$0xff] }
0x1b04   :  { %3504 = vperm.xlu1 %7894, %v3489_v24  }
0x1b07   :  { %3501 = vperm.xlu0 %7893, %v3488_v61  }
0x1b08   :  { %3675 = vperm.xlu1 %7894, %v8064_v57   ;;  %v6952_v57 = vld [vmem:[%s10020_s21 + $0x30] sm:$0xff]  ;;  %s10059_s21 = sld [smem:[#allocation14_spill]] }
0x1b0b   :  { %3670 = vperm.xlu0 %7893, %v8066_v4   ;;  %v7777_v4 = vpack.c.bf16 %v6951_v9, %v6950_v63  ;;  %v6961_v9 = vld [vmem:[%s10021_s22 + $0x1] ss:$0 sm:$0xff] }
0x1b0d   :  { %7778 = vmatprep.subr.bf16.mxu0 %v7777_v4 }
0x1b7c   :  { %v3291_v12 = vpop.xlane.xlu1 %3290 }
0x1b7d   :  { %v3295_v52 = vmul.f32 0.03125, %v3291_v12  ;;  %v7781_v12 = vpack.c.bf16 %v6953_v59, %v6952_v57 }
0x1b7e   :  { %v3294_v18 = vpop.xlane.xlu0 %3293 }
0x1b7f   :  { %v3297_v5 = vadd.f32 1e-12, %v3295_v52  ;;  %v3296_v10 = vmul.f32 0.03125, %v3294_v18  ;;  %v6955_v52 = vld [vmem:[%s10022_s23 + $0x20] sm:$0xff]  ;;  %v6956_v18 = vld [vmem:[%s10022_s23 + $0x28] sm:$0xff] }
0x1b80   :  { %v3497_v42 = vpop.permute.xlu1 %3496 }
0x1b81   :  { %8067 = vrsqrt.f32 %v3297_v5  ;;  %v3298_v48 = vadd.f32 1e-12, %v3296_v10  ;;  %vm3499_vm9 = vcmp.ge.s32.totalorder %v8499_v58, %v3497_v42  ;;  %v6957_v5 = vld [vmem:[%s10022_s23 + $0x30] sm:$0xff]  ;;  %v9307_v10 = vpack.c.bf16 %v6956_v18, %v6955_v52 }
0x1b83   :  { %8069 = vrsqrt.f32 %v3298_v48  ;;  %v6958_v48 = vld [vmem:[%s10022_s23 + $0x38] sm:$0xff] }
0x1b84   :  { %v3505_v14 = vpop.permute.xlu1 %3504 }
0x1b85   :  { %vm3507_vm8 = vcmp.lt.s32.totalorder %v8499_v58, %v3505_v14 }
0x1b86   :  { %v3502_v13 = vpop.permute.xlu0 %3501 }
0x1b87   :  { %vm3506_vm5 = vcmp.lt.s32.totalorder %v8499_v58, %v3502_v13  ;;  %v9313_v13 = vpack.c.bf16 %v6958_v48, %v6957_v5 }
0x1b88   :  { %vm3508_vm7 = vmand %vm3498_vm4, %vm3506_vm5  ;;  %vm3684_vm5 = vcmask 259072  }
0x1b89   :  { %v6940_v21 = vsel %vm3508_vm7, 1.0, %v8232_v55  ;;  %vm3509_vm4 = vmand %vm3499_vm9, %vm3507_vm8 }
0x1b8a   :  { %7478 = vmatmul.mubr.msk.f32.vlgmr.msra.gmra.mrb[44].mxu0 %vm798_vm14, %v6940_v21  ;;  %v3671_v2 = vpop.permute.xlu0 %3670 }
0x1b8b   :  { %v8068_v28 = vpop.eup %8067  ;;  %7780 = vmatpush3.bf16.msra.mxu0 %v7777_v4  ;;  %v3915_v4 = vcombine.high %v6961_v9, %v6961_v9 }
0x1b8c   :  { %v3301_v39 = vmul.f32 %v8068_v28, %v3285_v27  ;;  %v3676_v27 = vpop.permute.xlu1 %3675  ;;  %7782 = vmatprep.subr.bf16.mxu0 %v7781_v12 }
0x1b8d   :  { %v8070_v56 = vpop.eup %8069 }
0x1b8e   :  { %v3302_v33 = vmul.f32 %v8070_v56, %v3286_v36  ;;  %v3309_v16 = vmul.f32 %v6934_v15, %v3301_v39 }
0x1b8f   :  { %7784 = vmatpush3.bf16.msra.mxu0 %v7781_v12 }
0x1b90   :  { %v3317_v0 = vadd.f32 %v6935_v60, %v3309_v16  ;;  %v3310_v8 = vmul.f32 %v6934_v15, %v3302_v33  ;;  %7791 = vmatprep.subr.bf16.mxu0 %v8230_v19 }
0x1b92   :  { %7464 = vmatpush3.msk.msra.mxu1 %vm2740_vm15, %v3317_v0  ;;  %v3318_v45 = vadd.f32 %v6935_v60, %v3310_v8  ;;  %v8237_v60 = vmov 1983009808   ;;  %v6948_v0 = vld [vmem:[%s10018_s19 + $0x1] ss:$0 sm:$0xff] }
0x1b93   :  { %7466 = vmatmul.mubr.msk.f32.vlgmr.msra.gmra.mrb[28].mxu1 %vm2937_vm3, %v9163_v30  ;;  %7468 = vmatprep.subr.mxu1 %v8232_v55  ;;  %v6941_v30 = vsel %vm3509_vm4, 1.0, %v8232_v55  ;;  %v3743_v33 = vunpack.c.l.s4 %v8237_v60 }
0x1b94   :  { %7469 = vmatpush3.msk.msra.mxu1 %vm2740_vm15, %v3318_v45  ;;  %7470 = vmatprep.mubr.msk.f32.mxu1 %vm8231_vm1, %v8232_v55 }
0x1b95   :  { %7774 = vmatprep.subr.bf16.mxu1 %v8230_v19  ;;  %v3744_v14 = vunpack.c.0.s8 %v3743_v33 }
0x1b97   :  { %7471 = vmatmul.mubr.msk.f32.vlgmr.msra.gmra.mrb[30].mxu1 %vm2937_vm3, %v9168_v31 }
0x1b98   :  { %7776 = vmatpush3.bf16.msra.mxu1 %v8885_v29  ;;  %7484 = vmatprep.mubr.msk.f32.mxu1 %vm8231_vm1, %v8232_v55 }
0x1b99   :  { %7785 = vmatprep.subr.bf16.mxu1 %v8230_v19 }
0x1b9b   :  { %7485 = vmatmul.mubr.msk.f32.vlgmr.msra.gmra.mrb[32].mxu1 %vm798_vm14, %v6941_v30  ;;  %v6949_v30 = vld [vmem:[%s10019_s20 + $0x1] ss:$0 sm:$0xff]  ;;  %vm4014_vm14 = vcmask 1044480  }
0x1b9c   :  { %7506 = vmatprep.mubr.msk.f32.mxu1 %vm8231_vm1, %v8232_v55  ;;  %7787 = vmatpush3.bf16.msra.mxu1 %v9307_v10 }
0x1b9d   :  { %7788 = vmatprep.subr.bf16.mxu1 %v8230_v19 }
0x1ba0   :  { %7790 = vmatpush3.bf16.msra.mxu1 %v9313_v13 }
0x1ba1   :  { %7797 = vmatprep.subr.bf16.mxu1 %v8230_v19 }
0x1ba3   :  { %7507 = vmatmul.mubr.f32.vlgmr.msra.gmra.mrb[34].mxu1 %v8232_v55 }
0x1ba4   :  { %7799 = vmatpush3.bf16.msra.mxu1 %v9307_v10  ;;  %7528 = vmatprep.mubr.msk.f32.mxu1 %vm8231_vm1, %v8232_v55 }
0x1ba5   :  { %7800 = vmatprep.subr.bf16.mxu1 %v8230_v19 }
0x1ba8   :  { %7802 = vmatpush3.bf16.msra.mxu1 %v9313_v13 }
0x1ba9   :  { %7809 = vmatprep.subr.bf16.mxu1 %v8230_v19 }
0x1c5d   :  { %v3589_v50 = vpop.f32.mrb[44].mxu0 }
0x1c5e   :  { %v3678_v3 = vmul.f32 %v3671_v2, %v3589_v50  ;;  %v7479_v11 = vpop.f32.mrb[45].mxu0  ;;  %v9332_v2 = vsub.s32 %v3744_v14, %v8595_v41 }
0x1c60   :  { %v3685_v31 = vsel %vm3684_vm5, %v3678_v3, 0.0  ;;  %v3922_v57 = vrot.slane %v6961_v9, %v9332_v2  ;;  %v3929_v18 = vrot.slane %v3915_v4, %v9332_v2 }
0x1c61   :  { %3686 = vadd.xlane.f32.xlu0 %v3685_v31 }
0x1c62   :  { %v3930_v59 = vcombine.high %v3922_v57, %v3922_v57 }
0x1c66   :  { %v9278_v29 = vpop.f32.mrb[28].mxu1 }
0x1c67   :  { %v7467_v22 = vpop.f32.mrb[29].mxu1 }
0x1c6a   :  { %v9280_v17 = vpop.f32.mrb[30].mxu1 }
0x1c6b   :  { %v7472_v38 = vpop.f32.mrb[31].mxu1 }
0x1c6e   :  { %v3662_v25 = vpop.f32.mrb[32].mxu1 }
0x1c6f   :  { %v3679_v36 = vmul.f32 %v3676_v27, %v3662_v25  ;;  %v7486_v6 = vpop.f32.mrb[33].mxu1 }
0x1c71   :  { %v3688_v35 = vsel %vm3684_vm5, %v3679_v36, 0.0 }
0x1c72   :  { %3689 = vadd.xlane.f32.xlu1 %v3688_v35 }
0x1cee   :  { %v3687_v24 = vpop.xlane.xlu0 %3686 }
0x1cef   :  { %v3691_v34 = vmul.f32 0.03125, %v3687_v24 }
0x1cf1   :  { %v3693_v37 = vsub.f32 %v3678_v3, %v3691_v34 }
0x1cf3   :  { %v3695_v54 = vmul.f32 %v3693_v37, %v3693_v37 }
0x1cf5   :  { %v3697_v61 = vsel %vm3684_vm5, %v3695_v54, 0.0 }
0x1cf6   :  { %3698 = vadd.xlane.f32.xlu0 %v3697_v61 }
0x1cff   :  { %v3690_v47 = vpop.xlane.xlu1 %3689 }
0x1d00   :  { %v3692_v44 = vmul.f32 0.03125, %v3690_v47 }
0x1d02   :  { %v3694_v40 = vsub.f32 %v3679_v36, %v3692_v44 }
0x1d04   :  { %v3696_v46 = vmul.f32 %v3694_v40, %v3694_v40 }
0x1d06   :  { %v3700_v49 = vsel %vm3684_vm5, %v3696_v46, 0.0 }
0x1d07   :  { %3701 = vadd.xlane.f32.xlu0 %v3700_v49  ;;  %v4121_v49 = vpop.f32.mrb[34].mxu1 }
0x1d08   :  { %v7508_v63 = vpop.f32.mrb[35].mxu1 }
0x1d83   :  { %v3699_v21 = vpop.xlane.xlu0 %3698 }
0x1d84   :  { %v3703_v28 = vmul.f32 0.03125, %v3699_v21 }
0x1d86   :  { %v3705_v42 = vadd.f32 1e-07, %v3703_v28 }
0x1d88   :  { %8071 = vrsqrt.f32 %v3705_v42 }
0x1d92   :  { %v8072_v15 = vpop.eup %8071 }
0x1d93   :  { %v3709_v16 = vmul.f32 %v8072_v15, %v3693_v37 }
0x1d94   :  { %v3702_v39 = vpop.xlane.xlu0 %3701 }
0x1d95   :  { %v3704_v56 = vmul.f32 0.03125, %v3702_v39  ;;  %v3717_v45 = vmul.f32 %v6948_v0, %v3709_v16 }
0x1d97   :  { %v3706_v8 = vadd.f32 1e-07, %v3704_v56  ;;  %v3725_v50 = vadd.f32 %v6949_v30, %v3717_v45 }
0x1d99   :  { %8073 = vrsqrt.f32 %v3706_v8  ;;  %v3748_v3 = vrot.slane %v3725_v50, %v9332_v2  ;;  %v3741_v38 = vcombine.high %v3725_v50, %v3725_v50 }
0x1d9b   :  { %v3756_v27 = vcombine.high %v3748_v3, %v3748_v3  ;;  %v3755_v36 = vrot.slane %v3741_v38, %v9332_v2 }
0x1d9d   :  { %v3773_v24 = vcombine.low %v3748_v3, %v3756_v27 }
0x1d9f   :  { %v3781_v61 = vrot.slane %v3773_v24, %v9332_v2 }
0x1da3   :  { %v8074_v11 = vpop.eup %8073 }
0x1da4   :  { %v3710_v31 = vmul.f32 %v8074_v11, %v3694_v40 }
0x1da6   :  { %v3718_v22 = vmul.f32 %v6948_v0, %v3710_v31 }
0x1da8   :  { %v3726_v25 = vadd.f32 %v6949_v30, %v3718_v22 }
0x1daa   :  { %v3757_v6 = vcombine.high %v3726_v25, %v3726_v25  ;;  %v3764_v35 = vrot.slane %v3726_v25, %v9332_v2 }
0x1dac   :  { %v3772_v34 = vcombine.high %v3764_v35, %v3764_v35  ;;  %v3774_v37 = vcombine.low %v3755_v36, %v3764_v35  ;;  %v3771_v54 = vrot.slane %v3757_v6, %v9332_v2 }
0x1dae   :  { %v3788_v47 = vrot.slane %v3774_v37, %v9332_v2  ;;  %v3790_v44 = vcombine.low %v3772_v34, %v3771_v54 }
0x1db0   :  { %v3789_v40 = vcombine.low %v3781_v61, %v3788_v47  ;;  %v3797_v46 = vrot.slane %v3790_v44, %v9332_v2 }
0x1db2   :  { %7495 = vmatprep.mubr.msk.f32.mxu0 %vm121_vm0, %v3789_v40 }
0x1db3   :  { %7496 = vmatmul.mubr.msk.f32.vlgmr.msra.gmra.mrb[46].mxu0 %vm121_vm0, %v3797_v46 }
0x1db4   :  { %7793 = vmatpush3.bf16.msra.mxu0 %v9307_v10  ;;  %7517 = vmatprep.mubr.msk.f32.mxu0 %vm8231_vm1, %v8232_v55 }
0x1db5   :  { %7794 = vmatprep.subr.bf16.mxu0 %v8230_v19 }
0x1db8   :  { %7796 = vmatpush3.bf16.msra.mxu0 %v9313_v13 }
0x1db9   :  { %7803 = vmatprep.subr.bf16.mxu0 %v8230_v19 }
0x1e86   :  { %v7497_v12 = vpop.f32.mrb[46].mxu0 }
0x1e87   :  { %v3902_v52 = vrot.slane %v7497_v12, %v9332_v2  ;;  %v3868_v5 = vpop.f32.mrb[47].mxu0  ;;  %v4126_v12 = vrot.slane %v4121_v49, 1 }
0x1e88   :  { %v3879_v48 = vcombine.high %v3868_v5, %v3868_v5  ;;  %v3886_v21 = vrot.slane %v3868_v5, %v9332_v2 }
0x1e89   :  { %v3903_v28 = vcombine.high %v3902_v52, %v3902_v52  ;;  %v3938_v42 = vadd.f32 %v3930_v59, %v3902_v52 }
0x1e8a   :  { %v3893_v15 = vrot.slane %v3879_v48, %v9332_v2  ;;  %v3894_v39 = vcombine.high %v3886_v21, %v3886_v21  ;;  %v3934_v56 = vadd.f32 %v3922_v57, %v3886_v21 }
0x1e8b   :  { %v3939_v60 = vadd.f32 %v3929_v18, %v3903_v28  ;;  %v3971_v33 = vrot.slane %v3938_v42, %v8969_v32  ;;  %v3981_v30 = vrot.slane %v3938_v42, %v8598_v43 }
0x1e8c   :  { %v3895_v16 = vcombine.high %v3893_v15, %v3893_v15  ;;  %v3935_v0 = vadd.f32 %v3930_v59, %v3894_v39  ;;  %v3936_v8 = vadd.f32 %v3929_v18, %v3893_v15  ;;  %v3989_v50 = vrot.slane %v3934_v56, %v8969_v32 }
0x1e8d   :  { %v3949_v14 = vrot.slane %v3939_v60, %v8969_v32  ;;  %v3959_v45 = vrot.slane %v3939_v60, %v8598_v43  ;;  %v4047_v44 = vrot.slane %v3939_v60, %v9332_v2  ;;  %v3999_v40 = vrot.slane %v3934_v56, %v8598_v43 }
0x1e8e   :  { %v3937_v3 = vadd.f32 %v3922_v57, %v3895_v16  ;;  %v3945_v11 = vrot.slane %v3936_v8, %v8969_v32  ;;  %v3955_v31 = vrot.slane %v3936_v8, %v8598_v43  ;;  %v3967_v22 = vrot.slane %v3935_v0, %v8969_v32 }
0x1e8f   :  { %v4007_v38 = vsel %vm2013_vm10, %v3949_v14, %v3959_v45  ;;  %v3977_v27 = vrot.slane %v3935_v0, %v8598_v43  ;;  %v4017_v25 = vcombine.low %v3934_v56, %v3935_v0  ;;  %v4031_v36 = vrot.slane %v3936_v8, %v9332_v2 }
0x1e90   :  { %v4009_v6 = vsel %vm2016_vm11, %v4007_v38, %v3971_v33  ;;  %v3993_v35 = vrot.slane %v3937_v3, %v8969_v32  ;;  %v4003_v24 = vrot.slane %v3937_v3, %v8598_v43  ;;  %v4006_v34 = vsel %vm2013_vm10, %v3945_v11, %v3955_v31 }
0x1e91   :  { %v4011_v37 = vsel %vm2019_vm12, %v4009_v6, %v3981_v30  ;;  %v4008_v54 = vsel %vm2016_vm11, %v4006_v34, %v3967_v22  ;;  %v4024_v61 = vrot.slane %v4017_v25, %v9332_v2  ;;  %v4033_v47 = vcombine.low %v3937_v3, %v3938_v42 }
0x1e92   :  { %v4010_v46 = vsel %vm2019_vm12, %v4008_v54, %v3977_v27  ;;  %v4013_v63 = vsel %vm2740_vm15, %v4011_v37, %v3993_v35 }
0x1e93   :  { %v4012_v32 = vsel %vm2740_vm15, %v4010_v46, %v3989_v50  ;;  %v4032_v9 = vcombine.low %v4024_v61, %v4031_v36  ;;  %v4040_v57 = vrot.slane %v4033_v47, %v9332_v2  ;;  %v4016_v4 = vsel %vm4014_vm14, %v4013_v63, %v4003_v24 }
0x1e94   :  { %v4015_v59 = vsel %vm4014_vm14, %v4012_v32, %v3999_v40 }
0x1e95   :  { %v4048_v52 = vcombine.low %v4040_v57, %v4047_v44  ;;  %v9385_v18 = vsel %vm8974_vm13, %v4032_v9, %v4015_v59 }
0x1e96   :  { %v4129_v5 = vadd.f32 %v4121_v49, %v9385_v18 }
0x1e97   :  { %v9390_v48 = vsel %vm8974_vm13, %v4048_v52, %v4016_v4  ;;  %vm6671_vm13 = vcmask 40960  }
0x1e98   :  { %v4130_v21 = vadd.f32 %v4126_v12, %v9390_v48  ;;  %8075 = vtanh.f32 %v4129_v5  ;;  %v6962_v39 = vmul.f32 -1.442695, %v4129_v5 }
0x1e9a   :  { %8077 = vtanh.f32 %v4130_v21  ;;  %v6963_v15 = vmul.f32 -1.442695, %v4130_v21 }
0x1e9c   :  { %8079 = vpow2.f32 %v6963_v15 }
0x1e9d   :  { %8081 = vpow2.f32 %v6962_v39 }
0x1ea2   :  { %v8076_v28 = vpop.eup %8075 }
0x1ea3   :  { %4149 = vrot.lane.b32.xlu0 %v8076_v28, %s8234_s1 }
0x1ea4   :  { %v8078_v42 = vpop.eup %8077 }
0x1ea5   :  { %4151 = vrot.lane.b32.xlu1 %v8078_v42, %s8234_s1 }
0x1ea6   :  { %v8080_v56 = vpop.eup %8079 }
0x1ea7   :  { %v4138_v49 = vadd.f32 1.0, %v8080_v56  ;;  %v8082_v60 = vpop.eup %8081 }
0x1ea8   :  { %v4137_v1 = vadd.f32 1.0, %v8082_v60 }
0x1ea9   :  { %8083 = vrcp.f32 %v4138_v49 }
0x1eaa   :  { %8085 = vrcp.f32 %v4137_v1 }
0x1eb3   :  { %v8084_v33 = vpop.eup %8083 }
0x1eb4   :  { %v8086_v14 = vpop.eup %8085  ;;  %v4146_v30 = vmul.f32 0.0, %v8084_v33 }
0x1eb5   :  { %v4145_v11 = vmul.f32 0.0, %v8086_v14 }
0x1f15   :  { %v4150_v8 = vpop.permute.xlu0 %4149 }
0x1f16   :  { %v4155_v45 = vmul.f32 %v8086_v14, %v4150_v8 }
0x1f17   :  { %v4152_v16 = vpop.permute.xlu1 %4151 }
0x1f18   :  { %v4156_v0 = vmul.f32 %v8084_v33, %v4152_v16 }
0x1f1a   :  { %4161 = vrot.lane.b32.xlu1 %v4156_v0, %s8236_s2 }
0x1f1e   :  { %4159 = vrot.lane.b32.xlu1 %v4155_v45, %s8236_s2 }
0x1f8c   :  { %v4162_v50 = vpop.permute.xlu1 %4161 }
0x1f8d   :  { %v4166_v3 = vadd.f32 %v4162_v50, %v4146_v30 }
0x1f8f   :  { %8087 = vtanh.f32 %v4166_v3  ;;  %v4280_v39 = vrot.slane %v4166_v3, 7 }
0x1f90   :  { %v4160_v31 = vpop.permute.xlu1 %4159 }
0x1f91   :  { %v4165_v22 = vadd.f32 %v4160_v31, %v4145_v11 }
0x1f93   :  { %8089 = vtanh.f32 %v4165_v22  ;;  %v4279_v49 = vrot.slane %v4165_v22, 7 }
0x1f99   :  { %v8088_v38 = vpop.eup %8087 }
0x1f9a   :  { %4173 = vrot.lane.b32.xlu0 %v8088_v38, %s8234_s1 }
0x1f9d   :  { %v8090_v27 = vpop.eup %8089 }
0x1f9e   :  { %4171 = vrot.lane.b32.xlu1 %v8090_v27, %s8234_s1 }
0x200c   :  { %v4174_v25 = vpop.permute.xlu0 %4173 }
0x200d   :  { %v9399_v36 = vmul.f32 %v8084_v33, %v4174_v25 }
0x200f   :  { %v4181_v35 = vrot.slane %v9399_v36, 7 }
0x2010   :  { %v4172_v6 = vpop.permute.xlu1 %4171 }
0x2011   :  { %v9402_v24 = vmul.f32 %v8086_v14, %v4172_v6 }
0x2013   :  { %v4182_v34 = vsel %vm119_vm2, %v4181_v35, %v9402_v24 }
0x2014   :  { %4183 = vrot.lane.b32.xlu0 %v4182_v34, %s8236_s2 }
0x2086   :  { %v4184_v37 = vpop.permute.xlu0 %4183 }
0x2087   :  { %7518 = vmatmul.mubr.msk.f32.vlgmr.msra.gmra.mrb[48].mxu0 %vm121_vm0, %v4184_v37 }
0x2088   :  { %7805 = vmatpush3.bf16.msra.mxu0 %v9307_v10  ;;  %7539 = vmatprep.mubr.msk.f32.mxu0 %vm8231_vm1, %v8232_v55 }
0x2089   :  { %7806 = vmatprep.subr.bf16.mxu0 %v8230_v19 }
0x208c   :  { %7808 = vmatpush3.bf16.msra.mxu0 %v9313_v13 }
0x208d   :  { %7815 = vmatprep.subr.bf16.mxu0 %v8230_v19 }
0x215a   :  { %v4253_v54 = vpop.f32.mrb[48].mxu0 }
0x215b   :  { %v4258_v61 = vrot.slane %v4253_v54, 7  ;;  %v4262_v47 = vadd.f32 %v4253_v54, %v9390_v48  ;;  %v7519_v44 = vpop.f32.mrb[49].mxu0 }
0x215d   :  { %v4261_v40 = vadd.f32 %v4258_v61, %v9385_v18  ;;  %8091 = vtanh.f32 %v4262_v47  ;;  %v6966_v32 = vmul.f32 -1.442695, %v4262_v47 }
0x215f   :  { %8093 = vtanh.f32 %v4261_v40  ;;  %v6965_v9 = vmul.f32 -1.442695, %v4261_v40 }
0x2160   :  { %8095 = vpow2.f32 %v6966_v32 }
0x2161   :  { %8097 = vpow2.f32 %v6965_v9 }
0x2167   :  { %v8092_v46 = vpop.eup %8091 }
0x2168   :  { %4289 = vrot.lane.b32.xlu0 %v8092_v46, %s8234_s1 }
0x2169   :  { %v8094_v63 = vpop.eup %8093 }
0x216a   :  { %4287 = vrot.lane.b32.xlu1 %v8094_v63, %s8234_s1  ;;  %v8096_v57 = vpop.eup %8095 }
0x216b   :  { %v8098_v4 = vpop.eup %8097  ;;  %v4270_v59 = vadd.f32 1.0, %v8096_v57 }
0x216c   :  { %v4269_v12 = vadd.f32 1.0, %v8098_v4 }
0x216d   :  { %8099 = vrcp.f32 %v4270_v59 }
0x216e   :  { %8101 = vrcp.f32 %v4269_v12 }
0x2177   :  { %v8100_v52 = vpop.eup %8099 }
0x2178   :  { %v8102_v28 = vpop.eup %8101  ;;  %v4284_v56 = vmul.f32 %v8100_v52, %v4280_v39 }
0x2179   :  { %v4283_v33 = vmul.f32 %v8102_v28, %v4279_v49 }
0x21da   :  { %v4290_v5 = vpop.permute.xlu0 %4289 }
0x21db   :  { %v4294_v21 = vmul.f32 %v8100_v52, %v4290_v5 }
0x21dc   :  { %v4288_v42 = vpop.permute.xlu1 %4287 }
0x21dd   :  { %4299 = vrot.lane.b32.xlu0 %v4294_v21, %s8236_s2  ;;  %v4293_v15 = vmul.f32 %v8102_v28, %v4288_v42 }
0x21df   :  { %4297 = vrot.lane.b32.xlu1 %v4293_v15, %s8236_s2 }
0x224f   :  { %v4300_v60 = vpop.permute.xlu0 %4299 }
0x2250   :  { %v4304_v1 = vadd.f32 %v4300_v60, %v4284_v56 }
0x2251   :  { %v4298_v16 = vpop.permute.xlu1 %4297 }
0x2252   :  { %8103 = vtanh.f32 %v4304_v1  ;;  %v4303_v0 = vadd.f32 %v4298_v16, %v4283_v33  ;;  %v4419_v5 = vrot.slane %v4304_v1, 7 }
0x2254   :  { %8105 = vtanh.f32 %v4303_v0 }
0x225c   :  { %v8104_v8 = vpop.eup %8103 }
0x225d   :  { %4311 = vrot.lane.b32.xlu0 %v8104_v8, %s8234_s1 }
0x225e   :  { %v8106_v14 = vpop.eup %8105 }
0x225f   :  { %4309 = vrot.lane.b32.xlu1 %v8106_v14, %s8234_s1 }
0x22cf   :  { %v4312_v45 = vpop.permute.xlu0 %4311 }
0x22d0   :  { %v9424_v3 = vmul.f32 %v8100_v52, %v4312_v45  ;;  %v4418_v52 = vrot.slane %v4303_v0, 7 }
0x22d1   :  { %v4310_v30 = vpop.permute.xlu1 %4309 }
0x22d2   :  { %v9422_v50 = vmul.f32 %v8102_v28, %v4310_v30  ;;  %v4877_v14 = vsel %vm2013_vm10, %v9399_v36, %v9424_v3 }
0x22d4   :  { %v4319_v11 = vrot.slane %v9422_v50, 1  ;;  %v4876_v1 = vsel %vm2013_vm10, %v9402_v24, %v9422_v50 }
0x22d6   :  { %v4320_v31 = vsel %vm119_vm2, %v9424_v3, %v4319_v11 }
0x22d7   :  { %4321 = vrot.lane.b32.xlu1 %v4320_v31, %s8236_s2 }
0x2349   :  { %v4322_v22 = vpop.permute.xlu1 %4321 }
0x234a   :  { %7529 = vmatmul.mubr.msk.f32.vlgmr.msra.gmra.mrb[36].mxu1 %vm121_vm0, %v4322_v22 }
0x234b   :  { %7811 = vmatpush3.bf16.msra.mxu1 %v9307_v10  ;;  %7550 = vmatprep.mubr.msk.f32.mxu1 %vm8231_vm1, %v8232_v55 }
0x234c   :  { %7812 = vmatprep.subr.bf16.mxu1 %v8230_v19 }
0x234f   :  { %7814 = vmatpush3.bf16.msra.mxu1 %v9313_v13 }
0x241d   :  { %v4391_v38 = vpop.f32.mrb[36].mxu1 }
0x241e   :  { %v4396_v27 = vrot.slane %v4391_v38, 6  ;;  %v4397_v25 = vrot.slane %v4391_v38, 7  ;;  %v7530_v6 = vpop.f32.mrb[37].mxu1 }
0x2420   :  { %v4400_v35 = vadd.f32 %v4396_v27, %v9385_v18  ;;  %v4401_v34 = vadd.f32 %v4397_v25, %v9390_v48 }
0x2422   :  { %8107 = vtanh.f32 %v4400_v35  ;;  %v6968_v61 = vmul.f32 -1.442695, %v4400_v35  ;;  %v6969_v47 = vmul.f32 -1.442695, %v4401_v34 }
0x2423   :  { %8109 = vtanh.f32 %v4401_v34 }
0x2424   :  { %8111 = vpow2.f32 %v6968_v61 }
0x2425   :  { %8113 = vpow2.f32 %v6969_v47 }
0x242c   :  { %v8108_v37 = vpop.eup %8107 }
0x242d   :  { %v8110_v54 = vpop.eup %8109  ;;  %4426 = vrot.lane.b32.xlu0 %v8108_v37, %s8234_s1 }
0x242e   :  { %4428 = vrot.lane.b32.xlu1 %v8110_v54, %s8234_s1  ;;  %v8112_v44 = vpop.eup %8111 }
0x242f   :  { %v8114_v40 = vpop.eup %8113  ;;  %v4408_v46 = vadd.f32 1.0, %v8112_v44 }
0x2430   :  { %v4409_v63 = vadd.f32 1.0, %v8114_v40 }
0x2431   :  { %8115 = vrcp.f32 %v4408_v46 }
0x2432   :  { %8117 = vrcp.f32 %v4409_v63 }
0x243b   :  { %v8116_v32 = vpop.eup %8115 }
0x243c   :  { %v8118_v57 = vpop.eup %8117  ;;  %v4422_v21 = vmul.f32 %v8116_v32, %v4418_v52 }
0x243d   :  { %v4423_v28 = vmul.f32 %v8118_v57, %v4419_v5 }
0x249f   :  { %v4427_v9 = vpop.permute.xlu0 %4426 }
0x24a0   :  { %v4429_v4 = vpop.permute.xlu1 %4428  ;;  %v4432_v59 = vmul.f32 %v8116_v32, %v4427_v9 }
0x24a1   :  { %v4433_v12 = vmul.f32 %v8118_v57, %v4429_v4 }
0x24a2   :  { %4436 = vrot.lane.b32.xlu0 %v4432_v59, %s8236_s2 }
0x24a3   :  { %4438 = vrot.lane.b32.xlu1 %v4433_v12, %s8236_s2 }
0x2514   :  { %v4437_v42 = vpop.permute.xlu0 %4436 }
0x2515   :  { %v4439_v15 = vpop.permute.xlu1 %4438  ;;  %v4442_v39 = vadd.f32 %v4437_v42, %v4422_v21 }
0x2516   :  { %v4443_v56 = vadd.f32 %v4439_v15, %v4423_v28 }
0x2517   :  { %8119 = vtanh.f32 %v4442_v39  ;;  %v4558_v12 = vrot.slane %v4442_v39, 7 }
0x2518   :  { %8121 = vtanh.f32 %v4443_v56  ;;  %v4559_v52 = vrot.slane %v4443_v56, 7 }
0x2521   :  { %v8120_v49 = vpop.eup %8119 }
0x2522   :  { %v8122_v60 = vpop.eup %8121  ;;  %4448 = vrot.lane.b32.xlu0 %v8120_v49, %s8234_s1 }
0x2523   :  { %4450 = vrot.lane.b32.xlu1 %v8122_v60, %s8234_s1 }
0x2594   :  { %v4449_v33 = vpop.permute.xlu0 %4448 }
0x2595   :  { %v4451_v16 = vpop.permute.xlu1 %4450  ;;  %v9444_v8 = vmul.f32 %v8116_v32, %v4449_v33 }
0x2596   :  { %v9449_v0 = vmul.f32 %v8118_v57, %v4451_v16 }
0x2597   :  { %v4458_v45 = vrot.slane %v9444_v8, 2  ;;  %v4878_v30 = vsel %vm2016_vm11, %v4876_v1, %v9444_v8 }
0x2598   :  { %v4459_v11 = vrot.slane %v9449_v0, 1  ;;  %v4879_v31 = vsel %vm2016_vm11, %v4877_v14, %v9449_v0 }
0x259a   :  { %v4460_v22 = vsel %vm119_vm2, %v4459_v11, %v4458_v45 }
0x259b   :  { %4461 = vrot.lane.b32.xlu0 %v4460_v22, %s8236_s2 }
0x260d   :  { %v4462_v38 = vpop.permute.xlu0 %4461 }
0x260e   :  { %7540 = vmatmul.mubr.msk.f32.vlgmr.msra.gmra.mrb[50].mxu0 %vm121_vm0, %v4462_v38 }
0x260f   :  { %7817 = vmatpush3.bf16.msra.mxu0 %v9307_v10  ;;  %7561 = vmatprep.mubr.msk.f32.mxu0 %vm8231_vm1, %v8232_v55 }
0x2610   :  { %7818 = vmatprep.subr.bf16.mxu0 %v8230_v19 }
0x2613   :  { %7820 = vmatpush3.bf16.msra.mxu0 %v9313_v13 }
0x2614   :  { %7575 = vmatprep.subr.mxu0 %v8232_v55 }
0x26e1   :  { %v4531_v27 = vpop.f32.mrb[50].mxu0 }
0x26e2   :  { %v4536_v25 = vrot.slane %v4531_v27, 5  ;;  %v4537_v6 = vrot.slane %v4531_v27, 6  ;;  %v7541_v35 = vpop.f32.mrb[51].mxu0 }
0x26e4   :  { %v4540_v34 = vadd.f32 %v4536_v25, %v9385_v18  ;;  %v4541_v37 = vadd.f32 %v4537_v6, %v9390_v48 }
0x26e6   :  { %8123 = vtanh.f32 %v4540_v34  ;;  %v6971_v61 = vmul.f32 -1.442695, %v4540_v34  ;;  %v6972_v13 = vmul.f32 -1.442695, %v4541_v37 }
0x26e7   :  { %8125 = vtanh.f32 %v4541_v37 }
0x26e8   :  { %8127 = vpow2.f32 %v6971_v61 }
0x26e9   :  { %8129 = vpow2.f32 %v6972_v13 }
0x26f0   :  { %v8124_v10 = vpop.eup %8123 }
0x26f1   :  { %v8126_v54 = vpop.eup %8125  ;;  %4566 = vrot.lane.b32.xlu1 %v8124_v10, %s8234_s1 }
0x26f2   :  { %4568 = vrot.lane.b32.xlu0 %v8126_v54, %s8234_s1  ;;  %v8128_v47 = vpop.eup %8127 }
0x26f3   :  { %v8130_v44 = vpop.eup %8129  ;;  %v4548_v40 = vadd.f32 1.0, %v8128_v47 }
0x26f4   :  { %v4549_v46 = vadd.f32 1.0, %v8130_v44 }
0x26f5   :  { %8131 = vrcp.f32 %v4548_v40 }
0x26f6   :  { %8133 = vrcp.f32 %v4549_v46 }
0x26ff   :  { %v8132_v63 = vpop.eup %8131 }
0x2700   :  { %v8134_v9 = vpop.eup %8133  ;;  %v4562_v5 = vmul.f32 %v8132_v63, %v4558_v12 }
0x2701   :  { %v4563_v21 = vmul.f32 %v8134_v9, %v4559_v52 }
0x2763   :  { %v4567_v32 = vpop.permute.xlu1 %4566 }
0x2764   :  { %v4569_v57 = vpop.permute.xlu0 %4568  ;;  %v4572_v4 = vmul.f32 %v8132_v63, %v4567_v32 }
0x2765   :  { %v4573_v59 = vmul.f32 %v8134_v9, %v4569_v57 }
0x2766   :  { %4576 = vrot.lane.b32.xlu1 %v4572_v4, %s8236_s2 }
0x2767   :  { %4578 = vrot.lane.b32.xlu0 %v4573_v59, %s8236_s2 }
0x27d8   :  { %v4577_v28 = vpop.permute.xlu1 %4576 }
0x27d9   :  { %v4579_v42 = vpop.permute.xlu0 %4578  ;;  %v4582_v15 = vadd.f32 %v4577_v28, %v4562_v5 }
0x27da   :  { %v4583_v49 = vadd.f32 %v4579_v42, %v4563_v21 }
0x27db   :  { %8135 = vtanh.f32 %v4582_v15  ;;  %v4698_v59 = vrot.slane %v4582_v15, 7 }
0x27dc   :  { %8137 = vtanh.f32 %v4583_v49  ;;  %v4699_v12 = vrot.slane %v4583_v49, 7 }
0x27e5   :  { %v8136_v60 = vpop.eup %8135 }
0x27e6   :  { %v8138_v33 = vpop.eup %8137  ;;  %4588 = vrot.lane.b32.xlu1 %v8136_v60, %s8234_s1 }
0x27e7   :  { %4590 = vrot.lane.b32.xlu0 %v8138_v33, %s8234_s1 }
0x2858   :  { %v4589_v16 = vpop.permute.xlu1 %4588 }
0x2859   :  { %v4591_v1 = vpop.permute.xlu0 %4590  ;;  %v9477_v14 = vmul.f32 %v8132_v63, %v4589_v16 }
0x285a   :  { %v9479_v39 = vmul.f32 %v8134_v9, %v4591_v1 }
0x285b   :  { %v4598_v56 = vrot.slane %v9477_v14, 3  ;;  %v4880_v45 = vsel %vm2019_vm12, %v4878_v30, %v9477_v14 }
0x285c   :  { %v4599_v11 = vrot.slane %v9479_v39, 2  ;;  %v4881_v22 = vsel %vm2019_vm12, %v4879_v31, %v9479_v39 }
0x285e   :  { %v4600_v38 = vsel %vm119_vm2, %v4599_v11, %v4598_v56 }
0x285f   :  { %4601 = vrot.lane.b32.xlu1 %v4600_v38, %s8236_s2 }
0x28d1   :  { %v4602_v27 = vpop.permute.xlu1 %4601 }
0x28d2   :  { %7551 = vmatmul.mubr.msk.f32.vlgmr.msra.gmra.mrb[38].mxu1 %vm121_vm0, %v4602_v27 }
0x29a5   :  { %v4671_v25 = vpop.f32.mrb[38].mxu1 }
0x29a6   :  { %v4676_v6 = vrot.slane %v4671_v25, 4  ;;  %v4677_v35 = vrot.slane %v4671_v25, 5  ;;  %v7552_v34 = vpop.f32.mrb[39].mxu1 }
0x29a8   :  { %v4680_v37 = vadd.f32 %v4676_v6, %v9385_v18  ;;  %v4681_v30 = vadd.f32 %v4677_v35, %v9390_v48 }
0x29aa   :  { %8139 = vtanh.f32 %v4680_v37  ;;  %v6974_v31 = vmul.f32 -1.442695, %v4680_v37  ;;  %v6975_v61 = vmul.f32 -1.442695, %v4681_v30 }
0x29ab   :  { %8141 = vtanh.f32 %v4681_v30 }
0x29ac   :  { %8143 = vpow2.f32 %v6974_v31 }
0x29ad   :  { %8145 = vpow2.f32 %v6975_v61 }
0x29b4   :  { %v8140_v10 = vpop.eup %8139 }
0x29b5   :  { %v8142_v54 = vpop.eup %8141  ;;  %4706 = vrot.lane.b32.xlu0 %v8140_v10, %s8234_s1 }
0x29b6   :  { %4708 = vrot.lane.b32.xlu1 %v8142_v54, %s8234_s1  ;;  %v8144_v13 = vpop.eup %8143 }
0x29b7   :  { %v8146_v47 = vpop.eup %8145  ;;  %v4688_v44 = vadd.f32 1.0, %v8144_v13 }
0x29b8   :  { %v4689_v40 = vadd.f32 1.0, %v8146_v47 }
0x29b9   :  { %8147 = vrcp.f32 %v4688_v44 }
0x29ba   :  { %8149 = vrcp.f32 %v4689_v40 }
0x29c3   :  { %v8148_v46 = vpop.eup %8147 }
0x29c4   :  { %v8150_v32 = vpop.eup %8149  ;;  %v4702_v52 = vmul.f32 %v8148_v46, %v4698_v59 }
0x29c5   :  { %v4703_v5 = vmul.f32 %v8150_v32, %v4699_v12 }
0x2a27   :  { %v4707_v63 = vpop.permute.xlu0 %4706 }
0x2a28   :  { %v4709_v9 = vpop.permute.xlu1 %4708  ;;  %v4712_v57 = vmul.f32 %v8148_v46, %v4707_v63 }
0x2a29   :  { %v4713_v4 = vmul.f32 %v8150_v32, %v4709_v9 }
0x2a2a   :  { %4716 = vrot.lane.b32.xlu0 %v4712_v57, %s8236_s2 }
0x2a2b   :  { %4718 = vrot.lane.b32.xlu1 %v4713_v4, %s8236_s2 }
0x2a9c   :  { %v4717_v21 = vpop.permute.xlu0 %4716 }
0x2a9d   :  { %v4719_v28 = vpop.permute.xlu1 %4718  ;;  %v4722_v42 = vadd.f32 %v4717_v21, %v4702_v52 }
0x2a9e   :  { %v4723_v60 = vadd.f32 %v4719_v28, %v4703_v5 }
0x2a9f   :  { %8151 = vtanh.f32 %v4722_v42  ;;  %v4838_v4 = vrot.slane %v4722_v42, 7  ;;  %v6979_v42 = vld [vmem:[%s10012_s13 + $0x40] sm:$0xff] }
0x2aa0   :  { %8153 = vtanh.f32 %v4723_v60  ;;  %v4839_v59 = vrot.slane %v4723_v60, 7  ;;  %v6980_v60 = vld [vmem:[%s10012_s13 + $0x48] sm:$0xff] }
0x2aa9   :  { %v8152_v33 = vpop.eup %8151 }
0x2aaa   :  { %v8154_v16 = vpop.eup %8153  ;;  %4728 = vrot.lane.b32.xlu0 %v8152_v33, %s8234_s1 }
0x2aab   :  { %4730 = vrot.lane.b32.xlu1 %v8154_v16, %s8234_s1 }
0x2b1c   :  { %v4729_v1 = vpop.permute.xlu0 %4728 }
0x2b1d   :  { %v4731_v56 = vpop.permute.xlu1 %4730  ;;  %v9498_v11 = vmul.f32 %v8148_v46, %v4729_v1 }
0x2b1e   :  { %v9500_v15 = vmul.f32 %v8150_v32, %v4731_v56 }
0x2b1f   :  { %v4738_v49 = vrot.slane %v9498_v11, 4  ;;  %v4882_v38 = vsel %vm2740_vm15, %v4880_v45, %v9498_v11 }
0x2b20   :  { %v4739_v27 = vrot.slane %v9500_v15, 3  ;;  %v9508_v25 = vsel %vm2740_vm15, %v4881_v22, %v9500_v15 }
0x2b22   :  { %v4740_v6 = vsel %vm119_vm2, %v4739_v27, %v4738_v49 }
0x2b23   :  { %4741 = vrot.lane.b32.xlu0 %v4740_v6, %s8236_s2 }
0x2b95   :  { %v4742_v35 = vpop.permute.xlu0 %4741 }
0x2b96   :  { %7562 = vmatmul.mubr.msk.f32.vlgmr.msra.gmra.mrb[52].mxu0 %vm121_vm0, %v4742_v35 }
0x2b97   :  { %7577 = vmatprep.mubr.msk.f32.mxu0 %vm8231_vm1, %v8232_v55 }
0x2c69   :  { %v4811_v34 = vpop.f32.mrb[52].mxu0 }
0x2c6a   :  { %v4816_v45 = vrot.slane %v4811_v34, 3  ;;  %v4817_v37 = vrot.slane %v4811_v34, 4  ;;  %v7563_v30 = vpop.f32.mrb[53].mxu0  ;;  %v7821_v34 = vpack.c.bf16 %v6980_v60, %v6979_v42  ;;  %v6986_v60 = vld [vmem:[%s10013_s14 + $0x2] ss:$0 sm:$0xff] }
0x2c6c   :  { %v4820_v10 = vadd.f32 %v4816_v45, %v9385_v18  ;;  %v4821_v22 = vadd.f32 %v4817_v37, %v9390_v48  ;;  %v4892_v45 = vrot.slane %v9498_v11, 3  ;;  %7822 = vmatprep.subr.bf16.mxu1 %v7821_v34  ;;  %v6981_v11 = vld [vmem:[%s10012_s13 + $0x50] sm:$0xff] }
0x2c6d   :  { %7824 = vmatpush3.bf16.msra.mxu1 %v7821_v34  ;;  %v5128_v34 = vcombine.high %v6986_v60, %v6986_v60 }
0x2c6e   :  { %8155 = vtanh.f32 %v4820_v10  ;;  %v6977_v61 = vmul.f32 -1.442695, %v4820_v10  ;;  %v6978_v13 = vmul.f32 -1.442695, %v4821_v22  ;;  %v4907_v10 = vrot.slane %v9402_v24, 3  ;;  %v6982_v24 = vld [vmem:[%s10012_s13 + $0x58] sm:$0xff] }
0x2c6f   :  { %8157 = vtanh.f32 %v4821_v22  ;;  %v4895_v22 = vrot.slane %v9477_v14, 1  ;;  %v4900_v14 = vrot.slane %v9449_v0, 7 }
0x2c70   :  { %8159 = vpow2.f32 %v6977_v61  ;;  %v4899_v61 = vrot.slane %v9444_v8, 7 }
0x2c71   :  { %8161 = vpow2.f32 %v6978_v13  ;;  %v4896_v13 = vrot.slane %v9479_v39, 1  ;;  %v7825_v39 = vpack.c.bf16 %v6982_v24, %v6981_v11 }
0x2c73   :  { %7826 = vmatprep.subr.bf16.mxu1 %v7825_v39 }
0x2c74   :  { %7828 = vmatpush3.bf16.msra.mxu1 %v7825_v39 }
0x2c75   :  { %7586 = vmatprep.subr.mxu1 %v8232_v55 }
0x2c78   :  { %v8156_v54 = vpop.eup %8155 }
0x2c79   :  { %v8158_v31 = vpop.eup %8157  ;;  %4846 = vrot.lane.b32.xlu1 %v8156_v54, %s8234_s1 }
0x2c7a   :  { %4848 = vrot.lane.b32.xlu0 %v8158_v31, %s8234_s1  ;;  %v8160_v47 = vpop.eup %8159  ;;  %v4903_v31 = vrot.slane %v9422_v50, 5 }
0x2c7b   :  { %v8162_v44 = vpop.eup %8161  ;;  %v4828_v40 = vadd.f32 1.0, %v8160_v47 }
0x2c7c   :  { %v4829_v46 = vadd.f32 1.0, %v8162_v44 }
0x2c7d   :  { %8163 = vrcp.f32 %v4828_v40 }
0x2c7e   :  { %8165 = vrcp.f32 %v4829_v46 }
0x2c87   :  { %v8164_v18 = vpop.eup %8163 }
0x2c88   :  { %v8166_v63 = vpop.eup %8165  ;;  %v4842_v12 = vmul.f32 %v8164_v18, %v4838_v4 }
0x2c89   :  { %v4843_v52 = vmul.f32 %v8166_v63, %v4839_v59 }
0x2ceb   :  { %v4847_v48 = vpop.permute.xlu1 %4846 }
0x2cec   :  { %v4849_v32 = vpop.permute.xlu0 %4848  ;;  %v4852_v9 = vmul.f32 %v8164_v18, %v4847_v48 }
0x2ced   :  { %v4853_v57 = vmul.f32 %v8166_v63, %v4849_v32 }
0x2cee   :  { %4856 = vrot.lane.b32.xlu1 %v4852_v9, %s8236_s2 }
0x2cef   :  { %4858 = vrot.lane.b32.xlu0 %v4853_v57, %s8236_s2 }
0x2d60   :  { %v4857_v5 = vpop.permute.xlu1 %4856 }
0x2d61   :  { %v4859_v21 = vpop.permute.xlu0 %4858  ;;  %v4862_v28 = vadd.f32 %v4857_v5, %v4842_v12 }
0x2d62   :  { %v4863_v33 = vadd.f32 %v4859_v21, %v4843_v52 }
0x2d63   :  { %8167 = vtanh.f32 %v4862_v28 }
0x2d64   :  { %8169 = vtanh.f32 %v4863_v33 }
0x2d6d   :  { %v8168_v16 = vpop.eup %8167 }
0x2d6e   :  { %v8170_v1 = vpop.eup %8169  ;;  %4868 = vrot.lane.b32.xlu1 %v8168_v16, %s8234_s1 }
0x2d6f   :  { %4870 = vrot.lane.b32.xlu0 %v8170_v1, %s8234_s1 }
0x2de0   :  { %v4869_v56 = vpop.permute.xlu1 %4868 }
0x2de1   :  { %v4871_v49 = vpop.permute.xlu0 %4870  ;;  %v4874_v6 = vmul.f32 %v8164_v18, %v4869_v56 }
0x2de2   :  { %v4875_v35 = vmul.f32 %v8166_v63, %v4871_v49 }
0x2de3   :  { %v4888_v37 = vrot.slane %v4874_v6, 5  ;;  %v4884_v30 = vsel %vm4014_vm14, %v4882_v38, %v4874_v6  ;;  %v4904_v38 = vrot.slane %v9424_v3, 5  ;;  %v4908_v3 = vrot.slane %v9399_v36, 3 }
0x2de4   :  { %v4889_v54 = vrot.slane %v4875_v35, 5  ;;  %4923 = vrot.lane.b32.xlu1 %v4884_v30, %s8236_s2  ;;  %v4885_v40 = vsel %vm4014_vm14, %v9508_v25, %v4875_v35  ;;  %v5135_v35 = vrot.slane %v6986_v60, %v9332_v2  ;;  %v5187_v30 = vrot.slane %v8542_v20, %v9332_v2 }
0x2de5   :  { %v4911_v47 = vsel %vm2013_vm10, %v4888_v37, %v4892_v45  ;;  %v5161_v45 = vrot.slane %v8506_v62, %v9332_v2  ;;  %v5154_v37 = vcombine.high %v8506_v62, %v8506_v62 }
0x2de6   :  { %v4912_v50 = vsel %vm2013_vm10, %v4889_v54, %v4739_v27  ;;  %v4913_v8 = vsel %vm2016_vm11, %v4911_v47, %v4895_v22  ;;  %v9617_v22 = vrot.slane %v8550_v23, %v9332_v2  ;;  %v5143_v54 = vcombine.high %v5135_v35, %v5135_v35 }
0x2de7   :  { %v4914_v44 = vsel %vm2016_vm11, %v4912_v50, %v4896_v13  ;;  %v4915_v46 = vsel %vm2019_vm12, %v4913_v8, %v4899_v61  ;;  %v5142_v13 = vrot.slane %v5128_v34, %v9332_v2  ;;  %v5232_v47 = vcombine.high %v8559_v26, %v8559_v26 }
0x2de8   :  { %4925 = vrot.lane.b32.xlu1 %v4885_v40, %s8236_s2  ;;  %v4917_v0 = vsel %vm2740_vm15, %v4915_v46, %v4903_v31  ;;  %v4916_v15 = vsel %vm2019_vm12, %v4914_v44, %v4900_v14  ;;  %v9621_v31 = vrot.slane %v8559_v26, %v9332_v2  ;;  %v5169_v24 = vcombine.high %v5161_v45, %v5161_v45 }
0x2de9   :  { %v4919_v27 = vsel %vm4014_vm14, %v4917_v0, %v4907_v10  ;;  %v4918_v18 = vsel %vm2740_vm15, %v4916_v15, %v4904_v38  ;;  %v5180_v10 = vcombine.high %v8542_v20, %v8542_v20  ;;  %v5168_v50 = vrot.slane %v5154_v37, %v9332_v2 }
0x2dea   :  { %4931 = vrot.lane.b32.xlu0 %v4919_v27, %s8236_s2  ;;  %v4920_v25 = vsel %vm4014_vm14, %v4918_v18, %v4908_v3  ;;  %v5195_v8 = vcombine.high %v5187_v30, %v5187_v30  ;;  %v5221_v40 = vcombine.high %v9617_v22, %v9617_v22  ;;  %v5206_v15 = vcombine.high %v8550_v23, %v8550_v23 }
0x2deb   :  { %v5194_v44 = vrot.slane %v5180_v10, %v9332_v2  ;;  %v9638_v27 = vcombine.high %v9621_v31, %v9621_v31  ;;  %vm5680_vm10 = vcmask 48128   ;;  %vm1609_vm12 = vcmask 122880  }
0x2dee   :  { %4933 = vrot.lane.b32.xlu0 %v4920_v25, %s8236_s2 }
0x2e56   :  { %v4924_v48 = vpop.permute.xlu1 %4923 }
0x2e5a   :  { %v4926_v4 = vpop.permute.xlu1 %4925 }
0x2e5c   :  { %v4932_v63 = vpop.permute.xlu0 %4931 }
0x2e5d   :  { %v4937_v32 = vsel %vm446_vm6, %v4924_v48, %v4932_v63  ;;  %v9642_v48 = vrot.slane %v5232_v47, %v9332_v2 }
0x2e5e   :  { %v4952_v9 = vcombine.high %v4937_v32, %v4937_v32  ;;  %v9569_v57 = vrot.slane %v4937_v32, %v9332_v2 }
0x2e60   :  { %v9573_v59 = vcombine.high %v9569_v57, %v9569_v57  ;;  %v4934_v12 = vpop.permute.xlu0 %4933  ;;  %v9578_v52 = vrot.slane %v4952_v9, %v9332_v2 }
0x2e61   :  { %v4938_v36 = vsel %vm446_vm6, %v4926_v4, %v4934_v12  ;;  %vm5425_vm6 = vcmask 1045504  }
0x2e62   :  { %v4984_v5 = vcombine.low %v9569_v57, %v9573_v59  ;;  %v4968_v21 = vcombine.high %v4938_v36, %v4938_v36  ;;  %v9583_v28 = vrot.slane %v4938_v36, %v9332_v2 }
0x2e64   :  { %v9586_v33 = vrot.slane %v4968_v21, %v9332_v2  ;;  %v9590_v16 = vcombine.high %v9583_v28, %v9583_v28  ;;  %v4985_v58 = vcombine.low %v9578_v52, %v9583_v28  ;;  %v4992_v1 = vrot.slane %v4984_v5, %v9332_v2 }
0x2e66   :  { %v4999_v56 = vrot.slane %v4985_v58, %v9332_v2  ;;  %v5001_v49 = vcombine.low %v9590_v16, %v9586_v33 }
0x2e68   :  { %v5008_v6 = vrot.slane %v5001_v49, %v9332_v2  ;;  %v5000_v42 = vcombine.low %v4992_v1, %v4999_v56 }
0x2e6a   :  { %7572 = vmatprep.mubr.msk.f32.mxu1 %vm121_vm0, %v5000_v42 }
0x2e6b   :  { %7573 = vmatmul.mubr.msk.f32.vlgmr.msra.gmra.mrb[40].mxu1 %vm121_vm0, %v5008_v6 }
0x2e6c   :  { %7588 = vmatprep.mubr.msk.f32.mxu1 %vm8231_vm1, %v8232_v55 }
0x2f3e   :  { %v7574_v61 = vpop.f32.mrb[40].mxu1 }
0x2f3f   :  { %v5113_v11 = vrot.slane %v7574_v61, %v9332_v2  ;;  %v5079_v14 = vpop.f32.mrb[41].mxu1 }
0x2f40   :  { %v5090_v39 = vcombine.high %v5079_v14, %v5079_v14  ;;  %v5097_v38 = vrot.slane %v5079_v14, %v9332_v2 }
0x2f41   :  { %v5114_v46 = vcombine.high %v5113_v11, %v5113_v11  ;;  %v9632_v0 = vadd.f32 %v5143_v54, %v5113_v11 }
0x2f42   :  { %v5104_v18 = vrot.slane %v5090_v39, %v9332_v2  ;;  %v5105_v3 = vcombine.high %v5097_v38, %v5097_v38  ;;  %v5147_v25 = vadd.f32 %v5135_v35, %v5097_v38 }
0x2f43   :  { %v9644_v63 = vadd.f32 %v5142_v13, %v5114_v46  ;;  %v5177_v32 = vmul.f32 %v5169_v24, %v9632_v0  ;;  %v5203_v9 = vmul.f32 %v5195_v8, %v9632_v0 }
0x2f44   :  { %v5106_v4 = vcombine.high %v5104_v18, %v5104_v18  ;;  %v5148_v12 = vadd.f32 %v5143_v54, %v5105_v3  ;;  %v5149_v36 = vadd.f32 %v5142_v13, %v5104_v18  ;;  %v5173_v5 = vmul.f32 %v5161_v45, %v5147_v25 }
0x2f45   :  { %v5561_v21 = vrot.slane %v9644_v63, %v9332_v2  ;;  %v5199_v58 = vmul.f32 %v5187_v30, %v5147_v25  ;;  %v5178_v1 = vmul.f32 %v5168_v50, %v9644_v63  ;;  %v5225_v56 = vmul.f32 %v9617_v22, %v5147_v25 }
0x2f46   :  { %v5150_v49 = vadd.f32 %v5135_v35, %v5106_v4  ;;  %v5435_v6 = vcombine.low %v5147_v25, %v5148_v12  ;;  %v5449_v42 = vrot.slane %v5149_v36, %v9332_v2  ;;  %v5174_v60 = vmul.f32 %v5169_v24, %v5148_v12 }
0x2f47   :  { %v5175_v34 = vmul.f32 %v5168_v50, %v5149_v36  ;;  %v5303_v37 = vcombine.low %v5199_v58, %v5199_v58  ;;  %v5293_v10 = vrot.slane %v5178_v1, %v9332_v2  ;;  %v5200_v54 = vmul.f32 %v5195_v8, %v5148_v12 }
0x2f48   :  { %v5442_v61 = vrot.slane %v5435_v6, %v9332_v2  ;;  %v5547_v13 = vcombine.low %v5150_v49, %v9632_v0  ;;  %v5263_v47 = vcombine.low %v5173_v5, %v5174_v60  ;;  %v5176_v11 = vmul.f32 %v5161_v45, %v5150_v49 }
0x2f49   :  { %v5277_v14 = vrot.slane %v5175_v34, %v9332_v2  ;;  %v5310_v39 = vrot.slane %v5303_v37, %v9332_v2  ;;  %v5202_v35 = vmul.f32 %v5187_v30, %v5150_v49  ;;  %v5201_v38 = vmul.f32 %v5194_v44, %v5149_v36 }
0x2f4a   :  { %v9658_v46 = vcombine.low %v5442_v61, %v5449_v42  ;;  %v5554_v24 = vrot.slane %v5547_v13, %v9332_v2  ;;  %v5270_v50 = vrot.slane %v5263_v47, %v9332_v2  ;;  %v5279_v18 = vcombine.low %v5176_v11, %v5177_v32 }
0x2f4b   :  { %v5311_v8 = vcombine.low %v5310_v39, %v5310_v39  ;;  %v5320_v3 = vcombine.low %v5202_v35, %v5202_v35  ;;  %v5226_v4 = vmul.f32 %v5221_v40, %v5148_v12  ;;  %v5312_v58 = vcombine.low %v5200_v54, %v5201_v38 }
0x2f4c   :  { %5451 = vrot.lane.b32.xlu1 %v9658_v46, %s8233_s29  ;;  %v9664_v45 = vcombine.low %v5554_v24, %v5561_v21  ;;  %v5278_v5 = vcombine.low %v5270_v50, %v5277_v14  ;;  %v5286_v30 = vrot.slane %v5279_v18, %v9332_v2  ;;  %v5204_v1 = vmul.f32 %v5194_v44, %v9644_v63 }
0x2f4d   :  { %v5327_v6 = vrot.slane %v5320_v3, %v9332_v2  ;;  %v5347_v42 = vcombine.low %v5225_v56, %v5226_v4  ;;  %v5228_v60 = vmul.f32 %v9617_v22, %v5150_v49  ;;  %v5229_v32 = vmul.f32 %v5221_v40, %v9632_v0 }
0x2f4e   :  { %5563 = vrot.lane.b32.xlu0 %v9664_v45, %s8233_s29  ;;  %v5426_v34 = vsel %vm5425_vm6, %v5278_v5, %v5311_v8  ;;  %v5294_v37 = vcombine.low %v5286_v30, %v5293_v10  ;;  %v5329_v21 = vcombine.low %v5203_v9, %v5204_v1  ;;  %v5220_v54 = vrot.slane %v5206_v15, %v9332_v2 }
0x2f4f   :  { %v5328_v61 = vcombine.low %v5327_v6, %v5327_v6  ;;  %v5354_v13 = vrot.slane %v5347_v42, %v9332_v2  ;;  %v5363_v44 = vcombine.low %v5228_v60, %v5229_v32  ;;  %v5251_v47 = vmul.f32 %v9621_v31, %v5147_v25  ;;  %v9729_v60 = vld [vmem:[%s10059_s21 + $0x1] sm:$0x1] }
0x2f50   :  { %v5319_v56 = vrot.slane %v5312_v58, %v9332_v2  ;;  %v5252_v22 = vmul.f32 %v9638_v27, %v5148_v12  ;;  %v5253_v40 = vmul.f32 %v9642_v48, %v5149_v36  ;;  %v5336_v15 = vrot.slane %v5329_v21, %v9332_v2 }
0x2f51   :  { %v5427_v11 = vsel %vm5425_vm6, %v5294_v37, %v5328_v61  ;;  %v5355_v14 = vcombine.low %v5354_v13, %v5354_v13  ;;  %v5370_v10 = vrot.slane %v5363_v44, %v9332_v2  ;;  %v5389_v9 = vcombine.low %v5251_v47, %v5251_v47 }
0x2f52   :  { %v5227_v39 = vmul.f32 %v5220_v54, %v5149_v36  ;;  %v5390_v35 = vcombine.low %v5252_v22, %v5253_v40  ;;  %v5254_v38 = vmul.f32 %v9621_v31, %v5150_v49  ;;  %v5255_v12 = vmul.f32 %v9638_v27, %v9632_v0 }
0x2f53   :  { %v5428_v25 = vsel %vm2740_vm15, %v5319_v56, %v5355_v14  ;;  %v5371_v24 = vcombine.low %v5370_v10, %v5370_v10  ;;  %v5256_v50 = vmul.f32 %v9642_v48, %v9644_v63  ;;  %v5397_v18 = vrot.slane %v5389_v9, %v9332_v2 }
0x2f54   :  { %v5404_v8 = vrot.slane %v5390_v35, %v9332_v2  ;;  %v5406_v3 = vcombine.low %v5254_v38, %v5254_v38  ;;  %v5230_v36 = vmul.f32 %v5220_v54, %v9644_v63  ;;  %v5362_v31 = vrot.slane %v5227_v39, %v9332_v2  ;;  %v9724_v63 = vld [vmem:[%s10059_s21] sm:$0x1] }
0x2f55   :  { %v5429_v4 = vsel %vm2740_vm15, %v5336_v15, %v5371_v24  ;;  %v5407_v58 = vcombine.low %v5255_v12, %v5256_v50  ;;  %v4941_v32 = vsub.f32 1.0, %v9724_v63 }
0x2f56   :  { %v5405_v49 = vcombine.low %v5397_v18, %v5404_v8  ;;  %v5414_v5 = vrot.slane %v5406_v3, %v9332_v2  ;;  %v5378_v48 = vrot.slane %v5230_v36, %v9332_v2 }
0x2f57   :  { %v5421_v0 = vrot.slane %v5407_v58, %v9332_v2  ;;  %v4943_v37 = vmul.f32 -10000.0, %v4941_v32 }
0x2f58   :  { %v5430_v27 = vsel %vm2016_vm11, %v5362_v31, %v5405_v49 }
0x2f59   :  { %v5422_v30 = vcombine.low %v5414_v5, %v5421_v0  ;;  %v5667_v54 = vrot.slane %v4943_v37, %v8598_v43 }
0x2f5b   :  { %v5431_v1 = vsel %vm2016_vm11, %v5378_v48, %v5422_v30 }
0x2fbe   :  { %v5452_v6 = vpop.permute.xlu1 %5451 }
0x2fbf   :  { %7576 = vmatpush3.xpose.msk.msra.mxu0 %vm121_vm0, %v5452_v6 }
0x2fc0   :  { %v5564_v42 = vpop.permute.xlu0 %5563  ;;  %7597 = vmatprep.subr.mxu0 %v8232_v55 }
0x2fc1   :  { %7587 = vmatpush3.xpose.msk.msra.mxu1 %vm121_vm0, %v5564_v42 }
0x2fc2   :  { %7578 = vmatmul.mubr.msk.f32.vlgmr.msra.gmra.mrb[54].mxu0 %vm121_vm0, %v5426_v34  ;;  %7608 = vmatprep.subr.mxu1 %v8232_v55  ;;  %v4942_v34 = vsub.f32 1.0, %v9729_v60 }
0x2fc3   :  { %7580 = vmatprep.mubr.msk.f32.mxu0 %vm8231_vm1, %v8232_v55 }
0x2fc4   :  { %7589 = vmatmul.mubr.msk.f32.vlgmr.msra.gmra.mrb[42].mxu1 %vm121_vm0, %v5427_v11  ;;  %v4944_v21 = vmul.f32 -10000.0, %v4942_v34 }
0x2fc5   :  { %7591 = vmatprep.mubr.msk.f32.mxu1 %vm8231_vm1, %v8232_v55 }
0x2fc6   :  { %7581 = vmatmul.mubr.msk.f32.gmra.mrb[56].mxu0 %vm121_vm0, %v5428_v25  ;;  %v5671_v47 = vrot.slane %v4944_v21, %v8598_v43 }
0x2fc7   :  { %7583 = vmatprep.mubr.msk.f32.mxu0 %vm8231_vm1, %v8232_v55 }
0x2fc8   :  { %7592 = vmatmul.mubr.msk.f32.gmra.mrb[44].mxu1 %vm121_vm0, %v5429_v4 }
0x2fc9   :  { %7594 = vmatprep.mubr.msk.f32.mxu1 %vm8231_vm1, %v8232_v55 }
0x2fca   :  { %7584 = vmatmul.mubr.msk.f32.gmra.mrb[58].mxu0 %vm121_vm0, %v5430_v27 }
0x2fcb   :  { %7599 = vmatprep.mubr.msk.f32.mxu0 %vm8231_vm1, %v8232_v55 }
0x2fcc   :  { %7595 = vmatmul.mubr.msk.f32.gmra.mrb[46].mxu1 %vm121_vm0, %v5431_v1 }
0x2fcd   :  { %7610 = vmatprep.mubr.msk.f32.mxu1 %vm8231_vm1, %v8232_v55 }
0x3095   :  { %v5530_v61 = vpop.f32.mrb[54].mxu0 }
0x3096   :  { %v5656_v13 = vmul.f32 0.35355338, %v5530_v61  ;;  %v7579_v44 = vpop.f32.mrb[55].mxu0 }
0x3097   :  { %v5642_v56 = vpop.f32.mrb[42].mxu1 }
0x3098   :  { %v5674_v22 = vadd.f32 %v5667_v54, %v5656_v13  ;;  %v5659_v40 = vmul.f32 0.35355338, %v5642_v56  ;;  %v7590_v11 = vpop.f32.mrb[43].mxu1 }
0x3099   :  { %v5535_v14 = vpop.f32.mrb[56].mxu0 }
0x309a   :  { %v5677_v10 = vadd.f32 %v5671_v47, %v5659_v40  ;;  %v5657_v9 = vmul.f32 0.35355338, %v5535_v14  ;;  %v7582_v15 = vpop.f32.mrb[57].mxu0  ;;  %v5681_v39 = vsel %vm5680_vm10, %v5674_v22, -inf }
0x309b   :  { %v5647_v35 = vpop.f32.mrb[44].mxu1  ;;  %5682 = vmax.xlane.f32.xlu1 %v5681_v39 }
0x309c   :  { %v5675_v38 = vadd.f32 %v5667_v54, %v5657_v9  ;;  %v5660_v25 = vmul.f32 0.35355338, %v5647_v35  ;;  %v7593_v24 = vpop.f32.mrb[45].mxu1  ;;  %v5690_v12 = vsel %vm5680_vm10, %v5677_v10, -inf }
0x309d   :  { %5691 = vmax.xlane.f32.xlu0 %v5690_v12  ;;  %v5540_v43 = vpop.f32.mrb[58].mxu0 }
0x309e   :  { %v5678_v50 = vadd.f32 %v5671_v47, %v5660_v25  ;;  %v5658_v18 = vmul.f32 0.35355338, %v5540_v43  ;;  %v7585_v8 = vpop.f32.mrb[59].mxu0  ;;  %v5684_v49 = vsel %vm5680_vm10, %v5675_v38, -inf }
0x309f   :  { %v5652_v3 = vpop.f32.mrb[46].mxu1 }
0x30a0   :  { %v5676_v4 = vadd.f32 %v5667_v54, %v5658_v18  ;;  %v5661_v36 = vmul.f32 0.35355338, %v5652_v3  ;;  %v7596_v58 = vpop.f32.mrb[47].mxu1  ;;  %v5693_v31 = vsel %vm5680_vm10, %v5678_v50, -inf }
0x30a1   :  { %5694 = vmax.xlane.f32.xlu1 %v5693_v31  ;;  %5685 = vmax.xlane.f32.xlu0 %v5684_v49 }
0x30a2   :  { %v5679_v5 = vadd.f32 %v5671_v47, %v5661_v36  ;;  %v5687_v27 = vsel %vm5680_vm10, %v5676_v4, -inf }
0x30a4   :  { %v5696_v0 = vsel %vm5680_vm10, %v5679_v5, -inf }
0x30a5   :  { %5697 = vmax.xlane.f32.xlu1 %v5696_v0  ;;  %5688 = vmax.xlane.f32.xlu0 %v5687_v27 }
0x3128   :  { %v5683_v48 = vpop.xlane.xlu1 %5682 }
0x3129   :  { %v5699_v30 = vsub.f32 %v5674_v22, %v5683_v48 }
0x312a   :  { %v5692_v1 = vpop.xlane.xlu0 %5691 }
0x312b   :  { %v5705_v6 = vmul.f32 1.442695, %v5699_v30  ;;  %v5702_v42 = vsub.f32 %v5677_v10, %v5692_v1 }
0x312d   :  { %8171 = vpow2.f32 %v5705_v6  ;;  %v5711_v32 = vmul.f32 1.442695, %v5702_v42 }
0x312e   :  { %v5695_v34 = vpop.xlane.xlu1 %5694  ;;  %v5686_v37 = vpop.xlane.xlu0 %5685 }
0x312f   :  { %8173 = vpow2.f32 %v5711_v32  ;;  %v5703_v21 = vsub.f32 %v5678_v50, %v5695_v34  ;;  %v5700_v54 = vsub.f32 %v5675_v38, %v5686_v37  ;;  %v7003_v37 = vld [vmem:[%s10014_s15 + $0x40] sm:$0xff] }
0x3131   :  { %v5713_v61 = vmul.f32 1.442695, %v5703_v21  ;;  %v5707_v13 = vmul.f32 1.442695, %v5700_v54  ;;  %v7004_v21 = vld [vmem:[%s10014_s15 + $0x48] sm:$0xff]  ;;  %v7005_v54 = vld [vmem:[%s10014_s15 + $0x50] sm:$0xff] }
0x3132   :  { %v5698_v44 = vpop.xlane.xlu1 %5697  ;;  %v5689_v47 = vpop.xlane.xlu0 %5688 }
0x3133   :  { %8175 = vpow2.f32 %v5713_v61  ;;  %v5704_v56 = vsub.f32 %v5679_v5, %v5698_v44  ;;  %v5701_v40 = vsub.f32 %v5676_v4, %v5689_v47  ;;  %v7829_v61 = vpack.c.bf16 %v7004_v21, %v7003_v37 }
0x3134   :  { %8177 = vpow2.f32 %v5707_v13  ;;  %v7006_v13 = vld [vmem:[%s10014_s15 + $0x58] sm:$0xff] }
0x3135   :  { %v5715_v11 = vmul.f32 1.442695, %v5704_v56  ;;  %v5709_v22 = vmul.f32 1.442695, %v5701_v40  ;;  %v7833_v44 = vpack.c.bf16 %v7006_v13, %v7005_v54 }
0x3137   :  { %v8172_v14 = vpop.eup %8171  ;;  %8179 = vpow2.f32 %v5715_v11 }
0x3138   :  { %8181 = vpow2.f32 %v5709_v22  ;;  %v5717_v10 = vsel %vm5680_vm10, %v8172_v14, 0.0 }
0x3139   :  { %v8174_v9 = vpop.eup %8173  ;;  %5718 = vadd.xlane.f32.xlu0 %v5717_v10 }
0x313a   :  { %v5726_v15 = vsel %vm5680_vm10, %v8174_v9, 0.0 }
0x313b   :  { %5727 = vadd.xlane.f32.xlu1 %v5726_v15 }
0x313d   :  { %v8176_v39 = vpop.eup %8175 }
0x313e   :  { %v8178_v35 = vpop.eup %8177  ;;  %v5729_v38 = vsel %vm5680_vm10, %v8176_v39, 0.0 }
0x313f   :  { %5730 = vadd.xlane.f32.xlu1 %v5729_v38  ;;  %v5720_v25 = vsel %vm5680_vm10, %v8178_v35, 0.0 }
0x3140   :  { %5721 = vadd.xlane.f32.xlu0 %v5720_v25 }
0x3141   :  { %v8180_v24 = vpop.eup %8179 }
0x3142   :  { %v8182_v12 = vpop.eup %8181  ;;  %v5732_v43 = vsel %vm5680_vm10, %v8180_v24, 0.0 }
0x3143   :  { %5733 = vadd.xlane.f32.xlu1 %v5732_v43  ;;  %v5723_v50 = vsel %vm5680_vm10, %v8182_v12, 0.0 }
0x3144   :  { %5724 = vadd.xlane.f32.xlu0 %v5723_v50 }
0x3154   :  { %5840 = vrot.lane.b32.xlu1 %v9664_v45, %s8234_s1 }
0x315a   :  { %5747 = vrot.lane.b32.xlu0 %v9658_v46, %s8234_s1 }
0x31c6   :  { %v5719_v18 = vpop.xlane.xlu0 %5718 }
0x31c7   :  { %8183 = vrcp.f32 %v5719_v18 }
0x31c8   :  { %v5728_v8 = vpop.xlane.xlu1 %5727 }
0x31c9   :  { %8185 = vrcp.f32 %v5728_v8 }
0x31cc   :  { %v5731_v3 = vpop.xlane.xlu1 %5730 }
0x31cd   :  { %8187 = vrcp.f32 %v5731_v3  ;;  %v5722_v4 = vpop.xlane.xlu0 %5721 }
0x31ce   :  { %8189 = vrcp.f32 %v5722_v4 }
0x31d0   :  { %v5734_v36 = vpop.xlane.xlu1 %5733 }
0x31d1   :  { %8191 = vrcp.f32 %v5734_v36  ;;  %v5725_v58 = vpop.xlane.xlu0 %5724  ;;  %v8184_v31 = vpop.eup %8183 }
0x31d2   :  { %8193 = vrcp.f32 %v5725_v58  ;;  %v5736_v45 = vmul.f32 %v8184_v31, %v8172_v14 }
0x31d3   :  { %v8186_v49 = vpop.eup %8185 }
0x31d4   :  { %v5742_v5 = vmul.f32 %v8186_v49, %v8174_v9  ;;  %v5841_v0 = vpop.permute.xlu1 %5840 }
0x31d5   :  { %v5748_v27 = vpop.permute.xlu0 %5747  ;;  %7609 = vmatpush3.msk.msra.mxu1 %vm5425_vm6, %v5841_v0 }
0x31d6   :  { %7598 = vmatpush3.msk.msra.mxu0 %vm5425_vm6, %v5748_v27  ;;  %7611 = vmatmul.mubr.msk.f32.vlgmr.msra.gmra.mrb[48].mxu1 %vm5680_vm10, %v5742_v5 }
0x31d7   :  { %v8188_v46 = vpop.eup %8187  ;;  %7600 = vmatmul.mubr.msk.f32.vlgmr.msra.gmra.mrb[60].mxu0 %vm5680_vm10, %v5736_v45  ;;  %7613 = vmatprep.mubr.msk.f32.mxu1 %vm8231_vm1, %v8232_v55 }
0x31d8   :  { %v8190_v48 = vpop.eup %8189  ;;  %7602 = vmatprep.mubr.msk.f32.mxu0 %vm8231_vm1, %v8232_v55  ;;  %v5744_v30 = vmul.f32 %v8188_v46, %v8176_v39  ;;  %7630 = vmatprep.subr.mxu1 %v8232_v55 }
0x31d9   :  { %v5738_v1 = vmul.f32 %v8190_v48, %v8178_v35  ;;  %7830 = vmatprep.subr.bf16.mxu0 %v7829_v61 }
0x31da   :  { %7614 = vmatmul.mubr.msk.f32.gmra.mrb[50].mxu1 %vm5680_vm10, %v5744_v30  ;;  %7832 = vmatpush3.bf16.msra.mxu0 %v7829_v61 }
0x31db   :  { %v8192_v6 = vpop.eup %8191  ;;  %7603 = vmatmul.mubr.msk.f32.gmra.mrb[62].mxu0 %vm5680_vm10, %v5738_v1  ;;  %7616 = vmatprep.mubr.msk.f32.mxu1 %vm8231_vm1, %v8232_v55 }
0x31dc   :  { %v8194_v42 = vpop.eup %8193  ;;  %7605 = vmatprep.mubr.msk.f32.mxu0 %vm8231_vm1, %v8232_v55  ;;  %v5746_v32 = vmul.f32 %v8192_v6, %v8180_v24  ;;  %7834 = vmatprep.subr.bf16.mxu0 %v7833_v44 }
0x31dd   :  { %v5740_v34 = vmul.f32 %v8194_v42, %v8182_v12 }
0x31de   :  { %7617 = vmatmul.mubr.msk.f32.gmra.mrb[52].mxu1 %vm5680_vm10, %v5746_v32  ;;  %7836 = vmatpush3.bf16.msra.mxu0 %v7833_v44 }
0x31df   :  { %7606 = vmatmul.mubr.msk.f32.gmra.mrb[64].mxu0 %vm5680_vm10, %v5740_v34  ;;  %7632 = vmatprep.mubr.msk.f32.mxu1 %vm8231_vm1, %v8232_v55 }
0x31e0   :  { %7635 = vmatprep.subr.mxu0 %v8232_v55 }
0x32a9   :  { %v5919_v47 = vpop.f32.mrb[48].mxu1 }
0x32aa   :  { %v5826_v56 = vpop.f32.mrb[60].mxu0  ;;  %v7612_v40 = vpop.f32.mrb[49].mxu1  ;;  %v5937_v22 = vmul.f32 %v8542_v20, %v5919_v47  ;;  %v5934_v50 = vmul.f32 %v8506_v62, %v5919_v47 }
0x32ab   :  { %v7601_v11 = vpop.f32.mrb[61].mxu0  ;;  %v5935_v14 = vmul.f32 %v8542_v20, %v5826_v56  ;;  %v5933_v4 = vmul.f32 %v8506_v62, %v5826_v56 }
0x32ac   :  { %v5946_v25 = vrot.slane %v5937_v22, 6 }
0x32ad   :  { %v5924_v10 = vpop.f32.mrb[50].mxu1  ;;  %v5943_v43 = vrot.slane %v5935_v14, 6 }
0x32ae   :  { %v5831_v9 = vpop.f32.mrb[62].mxu0  ;;  %v5938_v15 = vmul.f32 %v8542_v20, %v5924_v10  ;;  %v7615_v39 = vpop.f32.mrb[51].mxu1  ;;  %v5955_v12 = vmul.f32 %v8550_v23, %v5924_v10 }
0x32af   :  { %v5936_v35 = vmul.f32 %v8542_v20, %v5831_v9  ;;  %v7604_v38 = vpop.f32.mrb[63].mxu0  ;;  %v5953_v8 = vmul.f32 %v8550_v23, %v5831_v9 }
0x32b0   :  { %v5947_v24 = vrot.slane %v5938_v15, 6  ;;  %v5964_v48 = vrot.slane %v5955_v12, 4 }
0x32b1   :  { %v5944_v18 = vrot.slane %v5936_v35, 6  ;;  %v5929_v3 = vpop.f32.mrb[52].mxu1  ;;  %v5961_v62 = vrot.slane %v5953_v8, 4 }
0x32b2   :  { %v5948_v36 = vsel %vm2016_vm11, %v5946_v25, %v5947_v24  ;;  %v5836_v58 = vpop.f32.mrb[64].mxu0  ;;  %v5956_v31 = vmul.f32 %v8550_v23, %v5929_v3  ;;  %v7618_v20 = vpop.f32.mrb[53].mxu1  ;;  %v5972_v45 = vmul.f32 %v8559_v26, %v5929_v3  ;;  %v7010_v25 = vld [vmem:[%s10015_s16 + $0x2] ss:$0 sm:$0xff] }
0x32b3   :  { %v5945_v49 = vsel %vm2016_vm11, %v5943_v43, %v5944_v18  ;;  %v5952_v5 = vadd.f32 %v5948_v36, %v5934_v50  ;;  %v5954_v0 = vmul.f32 %v8550_v23, %v5836_v58  ;;  %v7607_v27 = vpop.f32.mrb[65].mxu0  ;;  %v5971_v30 = vmul.f32 %v8559_v26, %v5836_v58 }
0x32b4   :  { %v5951_v46 = vadd.f32 %v5945_v49, %v5933_v4  ;;  %v5965_v1 = vrot.slane %v5956_v31, 4  ;;  %v5976_v37 = vrot.slane %v5972_v45, 2  ;;  %v6171_v24 = vrot.slane %v7010_v25, %v9332_v2 }
0x32b5   :  { %v5962_v6 = vrot.slane %v5954_v0, 4  ;;  %v5975_v54 = vrot.slane %v5971_v30, 2  ;;  %v6164_v12 = vcombine.high %v7010_v25, %v7010_v25  ;;  %vm3471_vm11 = vcmask 24576  }
0x32b6   :  { %v5966_v42 = vsel %vm2740_vm15, %v5964_v48, %v5965_v1  ;;  %v6179_v18 = vcombine.high %v6171_v24, %v6171_v24 }
0x32b7   :  { %v5963_v32 = vsel %vm2740_vm15, %v5961_v62, %v5962_v6  ;;  %v5970_v34 = vadd.f32 %v5966_v42, %v5952_v5  ;;  %v6178_v3 = vrot.slane %v6164_v12, %v9332_v2  ;;  %vm6710_vm15 = vcmask 785408  }
0x32b8   :  { %v5969_v21 = vadd.f32 %v5963_v32, %v5951_v46 }
0x32b9   :  { %v5980_v61 = vadd.f32 %v5976_v37, %v5970_v34 }
0x32ba   :  { %v5979_v23 = vadd.f32 %v5975_v54, %v5969_v21 }
0x32bb   :  { %v6004_v13 = vcombine.high %v5980_v61, %v5980_v61  ;;  %v6011_v44 = vrot.slane %v5980_v61, %v9332_v2 }
0x32bc   :  { %v5988_v47 = vcombine.high %v5979_v23, %v5979_v23  ;;  %v5995_v56 = vrot.slane %v5979_v23, %v9332_v2 }
0x32bd   :  { %v6018_v26 = vrot.slane %v6004_v13, %v9332_v2  ;;  %v6019_v40 = vcombine.high %v6011_v44, %v6011_v44 }
0x32be   :  { %v6002_v11 = vrot.slane %v5988_v47, %v9332_v2  ;;  %v6003_v22 = vcombine.high %v5995_v56, %v5995_v56  ;;  %v8240_v47 = vmov 1414812756  }
0x32bf   :  { %v6037_v9 = vcombine.low %v6019_v40, %v6018_v26 }
0x32c0   :  { %v6020_v14 = vcombine.low %v5995_v56, %v6003_v22  ;;  %v6021_v10 = vcombine.low %v6002_v11, %v6011_v44  ;;  %v6270_v56 = vunpack.c.l.s4 %v8240_v47 }
0x32c1   :  { %v6044_v38 = vrot.slane %v6037_v9, %v9332_v2 }
0x32c2   :  { %v6028_v15 = vrot.slane %v6020_v14, %v9332_v2  ;;  %v6035_v39 = vrot.slane %v6021_v10, %v9332_v2  ;;  %v6271_v11 = vunpack.c.0.s8 %v6270_v56 }
0x32c4   :  { %v6036_v35 = vcombine.low %v6028_v15, %v6035_v39  ;;  %v9837_v10 = vsub.s32 %v6271_v11, %v8595_v41 }
0x32c6   :  { %7627 = vmatprep.mubr.msk.f32.mxu0 %vm121_vm0, %v6036_v35 }
0x32c7   :  { %7628 = vmatmul.mubr.msk.f32.vlgmr.msra.gmra.mrb[66].mxu0 %vm121_vm0, %v6044_v38 }
0x32c8   :  { %7637 = vmatprep.mubr.msk.f32.mxu0 %vm8231_vm1, %v8232_v55 }
0x339a   :  { %v7629_v43 = vpop.f32.mrb[66].mxu0 }
0x339b   :  { %v6149_v50 = vrot.slane %v7629_v43, %v9332_v2  ;;  %v6115_v8 = vpop.f32.mrb[67].mxu0 }
0x339c   :  { %v6126_v4 = vcombine.high %v6115_v8, %v6115_v8  ;;  %v6133_v36 = vrot.slane %v6115_v8, %v9332_v2 }
0x339d   :  { %v6150_v58 = vcombine.high %v6149_v50, %v6149_v50  ;;  %v6187_v5 = vadd.f32 %v6179_v18, %v6149_v50 }
0x339e   :  { %v6140_v31 = vrot.slane %v6126_v4, %v9332_v2  ;;  %v6141_v20 = vcombine.high %v6133_v36, %v6133_v36  ;;  %v6183_v49 = vadd.f32 %v6171_v24, %v6133_v36 }
0x339f   :  { %v6188_v0 = vadd.f32 %v6178_v3, %v6150_v58  ;;  %v6199_v6 = vadd.f32 %v6187_v5, %v9590_v16 }
0x33a0   :  { %v6142_v45 = vcombine.high %v6140_v31, %v6140_v31  ;;  %v6184_v27 = vadd.f32 %v6179_v18, %v6141_v20  ;;  %v6185_v46 = vadd.f32 %v6178_v3, %v6140_v31  ;;  %v6195_v30 = vadd.f32 %v6183_v49, %v9569_v57 }
0x33a1   :  { %v6200_v42 = vadd.f32 %v6188_v0, %v9586_v33  ;;  %v8238_v33 = vmov 269488144  }
0x33a2   :  { %v6186_v48 = vadd.f32 %v6171_v24, %v6142_v45  ;;  %v6196_v1 = vadd.f32 %v6184_v27, %v9573_v59  ;;  %v6197_v62 = vadd.f32 %v6185_v46, %v9578_v52  ;;  %v6256_v13 = vunpack.c.l.s4 %v8238_v33 }
0x33a3   :  { %v6241_v57 = vrot.slane %v6200_v42, %v9332_v2 }
0x33a4   :  { %v6211_v32 = vcombine.low %v6195_v30, %v6196_v1  ;;  %v6198_v34 = vadd.f32 %v6186_v48, %v9583_v28  ;;  %v6225_v21 = vrot.slane %v6197_v62, %v9332_v2  ;;  %v8239_v28 = vmov 842150450  }
0x33a5   :  { %v6263_v44 = vunpack.c.l.s4 %v8239_v28  ;;  %v6257_v26 = vunpack.c.0.s8 %v6256_v13 }
0x33a6   :  { %v6218_v37 = vrot.slane %v6211_v32, %v9332_v2  ;;  %v6227_v54 = vcombine.low %v6198_v34, %v6199_v6  ;;  %v8211_v32 = vld [vmem:[%s10056_s30 + $0x1] sm:$0x1] }
0x33a7   :  { %v6264_v40 = vunpack.c.0.s8 %v6263_v44  ;;  %v9831_v22 = vsub.s32 %v6257_v26, %v8595_v41 }
0x33a8   :  { %v6226_v61 = vcombine.low %v6218_v37, %v6225_v21  ;;  %v6234_v23 = vrot.slane %v6227_v54, %v9332_v2  ;;  %v8212_v21 = vld [vmem:[%s10051_s10 + $0x1] sm:$0x1] }
0x33a9   :  { %v9834_v14 = vsub.s32 %v6264_v40, %v8595_v41  ;;  %v1613_v54 = vsel %vm1609_vm12, %v8212_v21, 0.0 }
0x33aa   :  { %v6245_v59 = vsel %vm3684_vm5, %v6226_v61, 0.0  ;;  %v6242_v52 = vcombine.low %v6234_v23, %v6241_v57  ;;  %v6675_v61 = vsel %vm6671_vm13, %v9729_v60, 0.0  ;;  %v8213_v23 = vld [vmem:[%s10051_s10] sm:$0x1] }
0x33ab   :  { %6246 = vadd.xlane.f32.xlu0 %v6245_v59  ;;  %v1610_v57 = vsel %vm1609_vm12, %v8213_v23, 0.0  ;;  %v6672_v59 = vsel %vm6671_vm13, %v9724_v63, 0.0 }
0x33ac   :  { %v6248_v16 = vsel %vm3684_vm5, %v6242_v52, 0.0  ;;  %v8214_v52 = vld [vmem:[%s10056_s30] sm:$0x1] }
0x33ad   :  { %6249 = vadd.xlane.f32.xlu1 %v6248_v16  ;;  %v3472_v16 = vsel %vm3471_vm11, %v8214_v52, 0.0 }
0x3438   :  { %v6247_v9 = vpop.xlane.xlu0 %6246 }
0x3439   :  { %v6251_v15 = vmul.f32 0.03125, %v6247_v9 }
0x343a   :  { %v6250_v39 = vpop.xlane.xlu1 %6249 }
0x343b   :  { %v6261_v35 = vrot.slane %v6251_v15, %v9831_v22  ;;  %v6268_v38 = vrot.slane %v6251_v15, %v9834_v14  ;;  %v6275_v25 = vrot.slane %v6251_v15, %v9837_v10  ;;  %v6252_v24 = vmul.f32 0.03125, %v6250_v39  ;;  %v7013_v15 = vld [vmem:[%s10016_s17 + $0x2] ss:$0 sm:$0xff] }
0x343c   :  { %v7014_v39 = vld [vmem:[%s10017_s18 + $0x2] ss:$0 sm:$0xff] }
0x343d   :  { %v9842_v12 = vsub.f32 %v6195_v30, %v6261_v35  ;;  %v9844_v43 = vsub.f32 %v6196_v1, %v6268_v38  ;;  %v9846_v50 = vsub.f32 %v6197_v62, %v6275_v25  ;;  %v6282_v18 = vrot.slane %v6252_v24, %v9831_v22 }
0x343e   :  { %v6289_v41 = vrot.slane %v6252_v24, %v9834_v14  ;;  %v6296_v8 = vrot.slane %v6252_v24, %v9837_v10  ;;  %v6428_v38 = vcombine.high %v7013_v15, %v7013_v15  ;;  %v6435_v25 = vrot.slane %v7013_v15, %v9332_v2 }
0x343f   :  { %v6309_v3 = vmul.f32 %v9842_v12, %v9842_v12  ;;  %v6310_v4 = vmul.f32 %v9844_v43, %v9844_v43  ;;  %v9855_v36 = vsub.f32 %v6198_v34, %v6282_v18  ;;  %v6311_v58 = vmul.f32 %v9846_v50, %v9846_v50 }
0x3440   :  { %v9859_v31 = vsub.f32 %v6199_v6, %v6289_v41  ;;  %v9861_v20 = vsub.f32 %v6200_v42, %v6296_v8  ;;  %v3475_v34 = vsel %vm3471_vm11, %v8211_v32, 0.0  ;;  %v6458_v18 = vcombine.high %v7014_v39, %v7014_v39 }
0x3441   :  { %v6312_v49 = vmul.f32 %v9855_v36, %v9855_v36  ;;  %v6321_v5 = vcombine.low %v6309_v3, %v6310_v4  ;;  %v6335_v46 = vrot.slane %v6311_v58, %v9332_v2  ;;  %v6465_v41 = vrot.slane %v7014_v39, %v9332_v2 }
0x3442   :  { %v6313_v0 = vmul.f32 %v9859_v31, %v9859_v31  ;;  %v6314_v45 = vmul.f32 %v9861_v20, %v9861_v20  ;;  %v6442_v4 = vrot.slane %v6428_v38, %v9332_v2  ;;  %v6443_v58 = vcombine.high %v6435_v25, %v6435_v25 }
0x3443   :  { %v6328_v27 = vrot.slane %v6321_v5, %v9332_v2 }
0x3444   :  { %v6337_v48 = vcombine.low %v6312_v49, %v6313_v0  ;;  %v6351_v62 = vrot.slane %v6314_v45, %v9332_v2 }
0x3445   :  { %v6336_v30 = vcombine.low %v6328_v27, %v6335_v46  ;;  %v6472_v27 = vrot.slane %v6458_v18, %v9332_v2  ;;  %v6473_v46 = vcombine.high %v6465_v41, %v6465_v41 }
0x3446   :  { %v6344_v1 = vrot.slane %v6337_v48, %v9332_v2 }
0x3447   :  { %v6355_v6 = vsel %vm3684_vm5, %v6336_v30, 0.0 }
0x3448   :  { %6356 = vadd.xlane.f32.xlu1 %v6355_v6  ;;  %v6352_v42 = vcombine.low %v6344_v1, %v6351_v62 }
0x344a   :  { %v6358_v37 = vsel %vm3684_vm5, %v6352_v42, 0.0 }
0x344b   :  { %6359 = vadd.xlane.f32.xlu0 %v6358_v37 }
0x344c   :  { %3476 = vadd.xlane.f32.xlu1 %v3475_v34 }
0x344f   :  { %1614 = vadd.xlane.f32.xlu0 %v1613_v54 }
0x3450   :  { %6676 = vadd.xlane.f32.xlu1 %v6675_v61 }
0x3453   :  { %1611 = vadd.xlane.f32.xlu0 %v1610_v57 }
0x3454   :  { %6673 = vadd.xlane.f32.xlu1 %v6672_v59 }
0x3457   :  { %3473 = vadd.xlane.f32.xlu0 %v3472_v16 }
0x34d5   :  { %v6357_v33 = vpop.xlane.xlu1 %6356 }
0x34d6   :  { %v6361_v13 = vmul.f32 0.03125, %v6357_v33 }
0x34d8   :  { %v6363_v28 = vadd.f32 1e-12, %v6361_v13  ;;  %v6360_v44 = vpop.xlane.xlu0 %6359 }
0x34d9   :  { %v6362_v47 = vmul.f32 0.03125, %v6360_v44  ;;  %v3477_v56 = vpop.xlane.xlu1 %3476 }
0x34da   :  { %8195 = vrsqrt.f32 %v6363_v28  ;;  %v3479_v40 = vmax.f32 %v3477_v56, 1e-09 }
0x34db   :  { %v6364_v26 = vadd.f32 1e-12, %v6362_v47 }
0x34dc   :  { %v1615_v11 = vpop.xlane.xlu0 %1614 }
0x34dd   :  { %8197 = vrsqrt.f32 %v6364_v26  ;;  %v1617_v9 = vmax.f32 %v1615_v11, 1e-09 }
0x34df   :  { %8199 = vrcp.f32 %v1617_v9 }
0x34e0   :  { %8201 = vrcp.f32 %v3479_v40  ;;  %v1612_v35 = vpop.xlane.xlu0 %1611 }
0x34e1   :  { %v1616_v24 = vmax.f32 %v1612_v35, 1e-09 }
0x34e3   :  { %8203 = vrcp.f32 %v1616_v24  ;;  %v6717_v24 = vld [vmem:[%s10023_s24 + $0x28] sm:$0xff] }
0x34e4   :  { %v8196_v8 = vpop.eup %8195  ;;  %v3474_v3 = vpop.xlane.xlu0 %3473 }
0x34e5   :  { %v3478_v49 = vmax.f32 %v3474_v3, 1e-09  ;;  %v6375_v5 = vrot.slane %v8196_v8, %v9831_v22  ;;  %v6382_v0 = vrot.slane %v8196_v8, %v9834_v14  ;;  %v6389_v45 = vrot.slane %v8196_v8, %v9837_v10  ;;  %v6719_v8 = vld [vmem:[%s10023_s24 + $0x38] sm:$0xff] }
0x34e7   :  { %v8198_v48 = vpop.eup %8197  ;;  %8205 = vrcp.f32 %v3478_v49  ;;  %v6417_v30 = vmul.f32 %v6375_v5, %v9842_v12  ;;  %v6418_v1 = vmul.f32 %v6382_v0, %v9844_v43  ;;  %v6419_v62 = vmul.f32 %v6389_v45, %v9846_v50  ;;  %v6722_v5 = vld [vmem:[%s10023_s24 + $0x50] sm:$0xff]  ;;  %v6723_v0 = vld [vmem:[%s10023_s24 + $0x58] sm:$0xff] }
0x34e8   :  { %v6396_v6 = vrot.slane %v8198_v48, %v9831_v22  ;;  %v6403_v42 = vrot.slane %v8198_v48, %v9834_v14  ;;  %v6410_v32 = vrot.slane %v8198_v48, %v9837_v10  ;;  %v7853_v45 = vpack.c.bf16 %v6723_v0, %v6722_v5 }
0x34e9   :  { %v8200_v34 = vpop.eup %8199  ;;  %v6447_v37 = vmul.f32 %v6435_v25, %v6417_v30  ;;  %v6448_v21 = vmul.f32 %v6443_v58, %v6418_v1  ;;  %v6449_v54 = vmul.f32 %v6442_v4, %v6419_v62  ;;  %v6726_v30 = vld [vmem:[%s10023_s24 + $0x70] sm:$0xff]  ;;  %v6727_v1 = vld [vmem:[%s10023_s24 + $0x78] sm:$0xff] }
0x34ea   :  { %v8202_v61 = vpop.eup %8201  ;;  %v1621_v23 = vmul.f32 %v8200_v34, %v8904_v51  ;;  %v6420_v57 = vmul.f32 %v6396_v6, %v9855_v36  ;;  %v6421_v12 = vmul.f32 %v6403_v42, %v9859_v31  ;;  %v6422_v22 = vmul.f32 %v6410_v32, %v9861_v20  ;;  %v6677_v6 = vpop.xlane.xlu1 %6676 }
0x34eb   :  { %v6477_v43 = vadd.f32 %v6465_v41, %v6447_v37  ;;  %v6478_v59 = vadd.f32 %v6473_v46, %v6448_v21  ;;  %v6479_v50 = vadd.f32 %v6472_v27, %v6449_v54  ;;  %v3483_v33 = vmul.f32 %v8202_v61, %v9280_v17 }
0x34ec   :  { %v6450_v52 = vmul.f32 %v6435_v25, %v6420_v57  ;;  %v6451_v14 = vmul.f32 %v6443_v58, %v6421_v12  ;;  %v6452_v13 = vmul.f32 %v6442_v4, %v6422_v22  ;;  %v6688_v44 = vrot.slane %v1621_v23, 7  ;;  %v6720_v4 = vld [vmem:[%s10023_s24 + $0x40] sm:$0xff]  ;;  %v6721_v58 = vld [vmem:[%s10023_s24 + $0x48] sm:$0xff] }
0x34ed   :  { %v8204_v16 = vpop.eup %8203  ;;  %v6486_v10 = vcombine.low %v6477_v43, %v6478_v59  ;;  %v6500_v31 = vrot.slane %v6479_v50, %v9332_v2  ;;  %v6695_v9 = vrot.slane %v3483_v33, 7  ;;  %v7850_v49 = vpack.c.bf16 %v6721_v58, %v6720_v4 }
0x34ee   :  { %v1619_v28 = vmul.f32 %v8204_v16, %v8901_v53  ;;  %v6480_v51 = vadd.f32 %v6465_v41, %v6450_v52  ;;  %v6481_v47 = vadd.f32 %v6473_v46, %v6451_v14  ;;  %v6482_v56 = vadd.f32 %v6472_v27, %v6452_v13  ;;  %v6718_v41 = vld [vmem:[%s10023_s24 + $0x30] sm:$0xff]  ;;  %v6724_v27 = vld [vmem:[%s10023_s24 + $0x60] sm:$0xff]  ;;  %v6725_v46 = vld [vmem:[%s10023_s24 + $0x68] sm:$0xff]  ;;  %v6674_v42 = vpop.xlane.xlu1 %6673 }
0x34ef   :  { %v6493_v36 = vrot.slane %v6486_v10, %v9332_v2  ;;  %v7847_v3 = vpack.c.bf16 %v6719_v8, %v6718_v41  ;;  %v7856_v48 = vpack.c.bf16 %v6725_v46, %v6724_v27  ;;  %v7859_v62 = vpack.c.bf16 %v6727_v1, %v6726_v30 }
0x34f0   :  { %v6689_v26 = vsel %vm119_vm2, %v6688_v44, %v1619_v28  ;;  %v6580_v20 = vcombine.low %v6480_v51, %v6481_v47  ;;  %v6594_v15 = vrot.slane %v6482_v56, %v9332_v2  ;;  %v6678_v32 = vmax.f32 %v6674_v42, 1e-09  ;;  %v7019_v44 = vld [vmem:[#allocation2] ss:$0 sm:$0xff] }
0x34f1   :  { %v8206_v40 = vpop.eup %8205  ;;  %6690 = vrot.lane.b32.xlu0 %v6689_v26, %s8236_s2  ;;  %v6501_v11 = vcombine.low %v6493_v36, %v6500_v31  ;;  %v6679_v34 = vmax.f32 %v6677_v6, 1e-09 }
0x34f2   :  { %v3481_v17 = vmul.f32 %v8206_v40, %v9278_v29  ;;  %v6587_v53 = vrot.slane %v6580_v20, %v9332_v2  ;;  %v6712_v29 = vld [vmem:[%s10023_s24] sm:$0xff]  ;;  %v6713_v2 = vld [vmem:[%s10023_s24 + $0x8] sm:$0xff]  ;;  %8207 = vrcp.f32 %v6678_v32 }
0x34f3   :  { %7631 = vmatpush3.msk.msra.mxu1 %vm5425_vm6, %v6501_v11  ;;  %v7838_v38 = vpack.c.bf16 %v6713_v2, %v6712_v29  ;;  %8209 = vrcp.f32 %v6679_v34 }
0x34f4   :  { %v6696_v39 = vsel %vm119_vm2, %v6695_v9, %v3481_v17  ;;  %v6595_v35 = vcombine.low %v6587_v53, %v6594_v15  ;;  %7633 = vmatmul.mubr.msk.f32.vlgmr.msra.gmra.mrb[54].mxu1 %vm5680_vm10, %v9724_v63  ;;  %7837 = vmatprep.subr.bf16.mxu1 %v8230_v19  ;;  %v6714_v63 = vld [vmem:[%s10023_s24 + $0x10] sm:$0xff] }
0x34f5   :  { %6697 = vrot.lane.b32.xlu1 %v6696_v39, %s8234_s1  ;;  %7672 = vmatprep.mubr.msk.f32.mxu1 %vm8231_vm1, %v8232_v55  ;;  %v6715_v55 = vld [vmem:[%s10023_s24 + $0x18] sm:$0xff]  ;;  %vm6708_vm1 = vcmask 523264  }
0x34f6   :  { %7636 = vmatpush3.msk.msra.mxu0 %vm5425_vm6, %v6595_v35  ;;  %7839 = vmatpush3.bf16.msra.mxu1 %v7838_v38  ;;  %v7841_v25 = vpack.c.bf16 %v6715_v55, %v6714_v63 }
0x34f7   :  { %7638 = vmatmul.mubr.msk.f32.vlgmr.msra.gmra.mrb[68].mxu0 %vm5680_vm10, %v9729_v60  ;;  %7840 = vmatprep.subr.bf16.mxu1 %v8230_v19  ;;  %v6716_v60 = vld [vmem:[%s10023_s24 + $0x20] sm:$0xff] }
0x34f8   :  { %v7844_v18 = vpack.c.bf16 %v6717_v24, %v6716_v60 }
0x34fa   :  { %7842 = vmatpush3.bf16.msra.mxu1 %v7841_v25 }
0x34fb   :  { %7843 = vmatprep.subr.bf16.mxu1 %v8230_v19 }
0x34fc   :  { %v8208_v21 = vpop.eup %8207 }
0x34fd   :  { %v8210_v61 = vpop.eup %8209 }
0x34fe   :  { %7845 = vmatpush3.bf16.msra.mxu1 %v7844_v18 }
0x34ff   :  { %7846 = vmatprep.subr.bf16.mxu1 %v8230_v19 }
0x3502   :  { %7848 = vmatpush3.bf16.msra.mxu1 %v7847_v3 }
0x3503   :  { %7849 = vmatprep.subr.bf16.mxu1 %v8230_v19 }
0x3506   :  { %7851 = vmatpush3.bf16.msra.mxu1 %v7850_v49 }
0x3507   :  { %7852 = vmatprep.subr.bf16.mxu1 %v8230_v19 }
0x350a   :  { %7854 = vmatpush3.bf16.msra.mxu1 %v7853_v45 }
0x350b   :  { %7855 = vmatprep.subr.bf16.mxu1 %v8230_v19 }
0x350e   :  { %7857 = vmatpush3.bf16.msra.mxu1 %v7856_v48 }
0x350f   :  { %7858 = vmatprep.subr.bf16.mxu1 %v8230_v19  ;;  %v6816_v19 = vld [vmem:[%s10060_s7] ss:$0 sm:$0xff] }
0x3510   :  { %v191_v22 = vadd.f32 %v6816_v19, %v8521_v7 }
0x3512   :  { %7860 = vmatpush3.bf16.msra.mxu1 %v7859_v62  ;;  %v194_v16 = vmax.f32 %v191_v22, 0.0 }
0x3563   :  { %v6691_v52 = vpop.permute.xlu0 %6690 }
0x3564   :  { %v6707_v10 = vsel %vm121_vm0, %v194_v16, %v6691_v52 }
0x3567   :  { %v6698_v14 = vpop.permute.xlu1 %6697 }
0x3568   :  { %v6709_v33 = vsel %vm6708_vm1, %v6707_v10, %v6698_v14 }
0x35c7   :  { %v6573_v37 = vpop.f32.mrb[54].mxu1 }
0x35c8   :  { %v7634_v54 = vpop.f32.mrb[55].mxu1  ;;  %v6681_v12 = vmul.f32 %v8208_v21, %v6573_v37 }
0x35ca   :  { %v6667_v23 = vpop.f32.mrb[68].mxu0 }
0x35cb   :  { %v6683_v57 = vmul.f32 %v8210_v61, %v6667_v23  ;;  %v7639_v43 = vpop.f32.mrb[69].mxu0 }
0x35cd   :  { %v6702_v59 = vrot.slane %v6683_v57, 7 }
0x35cf   :  { %v6703_v50 = vsel %vm119_vm2, %v6702_v59, %v6681_v12  ;;  %vm6805_vm2 = vcmask 1024  }
0x35d0   :  { %6704 = vrot.lane.b32.xlu1 %v6703_v50, %s8233_s29 }
0x3642   :  { %v6705_v13 = vpop.permute.xlu1 %6704 }
0x3643   :  { %v6711_v28 = vsel %vm6710_vm15, %v6709_v33, %v6705_v13 }
0x3644   :  { %7673 = vmatmul.mubr.f32.vlgmr.msra.gmra.mrb[56].mxu1 %v6711_v28 }
0x3717   :  { %v6801_v51 = vpop.f32.mrb[56].mxu1 }
0x3718   :  { %v6802_v47 = vadd.f32 %v7019_v44, %v6801_v51  ;;  %v7674_v36 = vpop.f32.mrb[57].mxu1 }
0x371a   :  { %6806 = vst.msk [vmem:[%s10025_s26] sm:$0x3] %vm6805_vm2, %v6802_v47 }
0x371b   :  { %6811 = vsyncpa [#allocation4], 1 }

</bundles_post_ra>
